<compile_context>
chip_gen: v5e
topology: v5e:2x2
jax: 0.10.0
libtpu: 0.0.40
codegen_flags: <defaults>
</compile_context>

<pallas_src>
import functools

import jax
import jax.numpy as jnp
from jax import lax
from jax.experimental import pallas as pl
from jax.experimental.pallas import tpu as pltpu
import numpy as np

LEAKY_SLOPE = 0.01   # nn.LeakyReLU default
BN_EPS = 1e-5
LANE = 128           # channel (lane) padding target
SUBLANE = 8          # width (sublane) padding target
HALO = 8             # aligned left halo width inside the conv2 scratch


def _round_up(x, m):
    return (x + m - 1) // m * m


def _leaky(x):
    return jnp.where(x > 0, x, LEAKY_SLOPE * x)


def resblock_kernel(x_ref, w1_ref, b1_ref, w2_ref, b2_ref, ws_ref, bs_ref,
                    o_ref, h1pad, *, TH, H, W, W_pad, Cin, Cout):
    """One (batch, row-tile) step producing TH output rows.

    x_ref block: (1, TH+4, Wp, Cin) bf16 -- image rows [r*TH-2, r*TH+TH+2) with a 1-col zero
    halo (image col w at slab col w+1); out-of-image rows/cols are zero.  Weights are
    BN-scale-folded bf16; w1/w2 are im2col-reshaped wrapper-side to (9*C, Cout).
    """
    r = pl.program_id(1)
    xs = x_ref[0]                                   # (TH+4, Wp, Cin) bf16
    R1 = TH + 2                                     # conv1 output rows (incl. 1-row halos)

    # ---- conv1: one MXU pass over the lane-concatenated 9-tap im2col patch ----
    pieces = []
    x_center = None
    for dh in range(3):
        for dw in range(3):
            p = xs[dh:dh + R1, dw:dw + W_pad, :].reshape(R1 * W_pad, Cin)
            if dh == 1 and dw == 1:
                x_center = p                        # unshifted x, reused by the shortcut
            pieces.append(p)
    patch1 = jnp.concatenate(pieces, axis=-1)       # (R1*W_pad, 9*Cin)
    acc1 = jnp.dot(patch1, w1_ref[...], preferred_element_type=jnp.float32)
    h1 = _leaky(acc1 + b1_ref[...])                 # BN1 scale folded into w1

    # Zero h1 rows/cols outside the true image (conv2's zero padding); the select fuses into
    # the bf16 cast + scratch store.
    h1 = h1.reshape(R1, W_pad, Cout)
    g_row = r * TH - 1 + lax.broadcasted_iota(jnp.int32, (R1, W_pad, 1), 0)
    g_col = lax.broadcasted_iota(jnp.int32, (R1, W_pad, 1), 1)
    valid = (g_row >= 0) & (g_row < H) & (g_col < W)
    h1 = jnp.where(valid, h1, 0.0)

    # ---- stage h1 in the persistent scratch with aligned 8-wide zero column halos ----
    Ws = h1pad.shape[1]
    h1pad[:, 0:HALO, :] = jnp.zeros((R1, HALO, Cout), h1pad.dtype)
    h1pad[:, HALO + W_pad:Ws, :] = jnp.zeros((R1, Ws - HALO - W_pad, Cout), h1pad.dtype)
    h1pad[:, HALO:HALO + W_pad, :] = h1.astype(h1pad.dtype)

    # ---- conv2: one MXU pass over the 9-tap patch of h1 ----
    h1p = h1pad[...]                                # (R1, Ws, Cout) bf16
    pieces2 = [
        h1p[dh:dh + TH, HALO - 1 + dw:HALO - 1 + dw + W_pad, :].reshape(TH * W_pad, Cout)
        for dh in range(3) for dw in range(3)
    ]
    patch2 = jnp.concatenate(pieces2, axis=-1)      # (TH*W_pad, 9*Cout)
    acc2 = jnp.dot(patch2, w2_ref[...], preferred_element_type=jnp.float32)
    h2 = acc2 + b2_ref[...]                         # BN2 scale folded into w2

    # ---- shortcut: 1x1 conv + BN (scale folded), reusing the center tap of patch1 ----
    x_in = x_center[W_pad:(TH + 1) * W_pad]         # (TH*W_pad, Cin), aligned row slice
    sc = jnp.dot(x_in, ws_ref[...], preferred_element_type=jnp.float32) + bs_ref[...]

    out = _leaky(h2 + sc)
    o_ref[0] = out.reshape(TH, W_pad, Cout).astype(o_ref.dtype)


def _vmem_bytes(TH, W, Cin_p, Cout_p):
    """Conservative per-step VMEM estimate: pipelined blocks + scratch + in-kernel temporaries."""
    W_pad = _round_up(W, SUBLANE)
    Wp = _round_up(W_pad + 2, SUBLANE)
    Ws = _round_up(HALO + W_pad + 1, SUBLANE)
    rows1, rows2 = (TH + 2) * W_pad, TH * W_pad
    blocks = 2 * ((TH + 4) * Wp * Cin_p * 2                          # input tile (bf16, 2-buf)
                  + TH * W_pad * Cout_p * 2                          # output tile (bf16, 2-buf)
                  + (9 * Cin_p + 9 * Cout_p + Cin_p) * Cout_p * 2    # weights (bf16)
                  + 3 * Cout_p * 4)                                  # bias vectors (f32)
    scratch = (TH + 2) * Ws * Cout_p * 2                             # persistent h1pad
    temps = (rows1 * 9 * Cin_p * 2 + rows1 * Cout_p * 4              # patch1 + acc1/h1
             + rows2 * 9 * Cout_p * 2 + 2 * rows2 * Cout_p * 4       # patch2 + acc2/sc
             + rows2 * Cin_p * 2)                                    # shortcut operand
    return blocks + scratch + temps


def resblock_pallas(x_nchw, params):
    """x_nchw: (B, Cin, H, W) float32 -> (B, Cout, H, W) float32 (eval-mode BN)."""
    (w1, s1, b1, w2, s2, b2, ws, ss, bs) = params
    B, Cin, H, W = x_nchw.shape
    Cout = w1.shape[-1]
    Cin_p, Cout_p = _round_up(Cin, LANE), _round_up(Cout, LANE)
    W_pad = _round_up(W, SUBLANE)
    Wp = _round_up(W_pad + 2, SUBLANE)
    Ws = _round_up(HALO + W_pad + 1, SUBLANE)

    # Generation-aware VMEM budget; shrink the row tile until the estimate fits.
    try:
        vmem_cap = int(pltpu.get_tpu_info().vmem_capacity_bytes)
    except Exception:
        vmem_cap = 64 << 20                        # v7x floor
    budget = int(vmem_cap * 0.7)
    TH = 32 if H >= 64 else (8 if H >= 8 else H)
    while TH > 8 and _vmem_bytes(TH, W, Cin_p, Cout_p) > budget:
        TH //= 2
    H_pad = _round_up(H, TH)
    n_tiles = H_pad // TH

    # NCHW -> NHWC, pad (2-row halos for the conv1+conv2 recompute, 1-col halo, W/C pad),
    # bf16, then cut overlapping per-tile row slabs (TH+4 rows each).  One fused wrapper pass.
    x = jnp.transpose(x_nchw, (0, 2, 3, 1))
    x = jnp.pad(x, ((0, 0), (2, H_pad - H + 2), (1, Wp - W - 1), (0, Cin_p - Cin)))
    x = x.astype(jnp.bfloat16)                     # (B, H_pad+4, Wp, Cin_p)
    slabs = [lax.slice_in_dim(x, t * TH, t * TH + TH + 4, axis=1) for t in range(n_tiles)]
    xt = jnp.stack(slabs, axis=1).reshape(B * n_tiles, TH + 4, Wp, Cin_p)

    # Fold BN scale into the (bf16) conv weights; reshape the 3x3 weights for the im2col matmul.
    cpi, cpo = Cin_p - Cin, Cout_p - Cout
    w1p = jnp.pad(w1 * s1.reshape(1, 1, 1, -1), ((0, 0), (0, 0), (0, cpi), (0, cpo)))
    w1p = w1p.reshape(9 * Cin_p, Cout_p).astype(jnp.bfloat16)
    w2p = jnp.pad(w2 * s2.reshape(1, 1, 1, -1), ((0, 0), (0, 0), (0, cpo), (0, cpo)))
    w2p = w2p.reshape(9 * Cout_p, Cout_p).astype(jnp.bfloat16)
    wsp = jnp.pad(ws * ss.reshape(1, -1), ((0, cpi), (0, cpo))).astype(jnp.bfloat16)
    padb = lambda v: jnp.pad(v, ((0, 0), (0, cpo)))            # (1,Cout) -> (1,Cout_p), f32
    b1p, b2p, bsp = padb(b1), padb(b2), padb(bs)

    kern = functools.partial(resblock_kernel, TH=TH, H=H, W=W, W_pad=W_pad,
                             Cin=Cin_p, Cout=Cout_p)

    est = _vmem_bytes(TH, W, Cin_p, Cout_p)
    vmem_limit = int(min(vmem_cap * 0.9, est + (16 << 20)))

    rows1, rows2 = (TH + 2) * W_pad, TH * W_pad
    flops = 2 * B * n_tiles * (rows1 * 9 * Cin_p + rows2 * 9 * Cout_p + rows2 * Cin_p) * Cout_p
    bytes_accessed = (B * n_tiles * (TH + 4) * Wp * Cin_p * 2
                      + (9 * Cin_p + 9 * Cout_p + Cin_p) * Cout_p * 2 + 3 * Cout_p * 4
                      + B * H_pad * W_pad * Cout_p * 2)

    nt = n_tiles
    out = pl.pallas_call(
        kern,
        out_shape=jax.ShapeDtypeStruct((B, H_pad, W_pad, Cout_p), jnp.bfloat16),
        grid_spec=pltpu.PrefetchScalarGridSpec(
            num_scalar_prefetch=0,
            grid=(B, n_tiles),
            in_specs=[
                pl.BlockSpec((1, TH + 4, Wp, Cin_p), lambda b, r: (b * nt + r, 0, 0, 0)),
                pl.BlockSpec((9 * Cin_p, Cout_p), lambda b, r: (0, 0)),
                pl.BlockSpec((1, Cout_p), lambda b, r: (0, 0)),
                pl.BlockSpec((9 * Cout_p, Cout_p), lambda b, r: (0, 0)),
                pl.BlockSpec((1, Cout_p), lambda b, r: (0, 0)),
                pl.BlockSpec((Cin_p, Cout_p), lambda b, r: (0, 0)),
                pl.BlockSpec((1, Cout_p), lambda b, r: (0, 0)),
            ],
            out_specs=pl.BlockSpec((1, TH, W_pad, Cout_p), lambda b, r: (b, r, 0, 0)),
            scratch_shapes=[pltpu.VMEM((TH + 2, Ws, Cout_p), jnp.bfloat16)],
        ),
        compiler_params=pltpu.CompilerParams(
            dimension_semantics=("parallel", "parallel"),
            vmem_limit_bytes=vmem_limit),
        cost_estimate=pl.CostEstimate(flops=int(flops), transcendentals=0,
                                      bytes_accessed=int(bytes_accessed)),
    )(xt, w1p, b1p, w2p, b2p, wsp, bsp)

    # Drop the spatial/channel padding, back to NCHW float32.
    return jnp.transpose(out[:, :H, :W, :Cout], (0, 3, 1, 2)).astype(jnp.float32)


def make_params(key, Cin, Cout):
    """Deterministic synthetic parameters; BN folded to per-channel scale/bias (eval mode)."""
    ks = jax.random.split(key, 18)

    def conv_w(k, kh, kw, ci, co):
        return jax.random.normal(k, (kh, kw, ci, co), jnp.float32) * 0.1   # HWIO

    def bn(k0, k1, k2, k3, c):
        gamma = 1.0 + 0.1 * jax.random.normal(k0, (c,), jnp.float32)
        beta = 0.1 * jax.random.normal(k1, (c,), jnp.float32)
        mean = 0.1 * jax.random.normal(k2, (c,), jnp.float32)
        var = jnp.abs(jax.random.normal(k3, (c,), jnp.float32)) + 0.5
        return gamma, beta, mean, var

    def fold(gamma, beta, mean, var, conv_bias):
        scale = gamma / jnp.sqrt(var + BN_EPS)
        bias = beta + (conv_bias - mean) * scale
        return scale.reshape(1, -1), bias.reshape(1, -1)

    w1 = conv_w(ks[0], 3, 3, Cin, Cout)
    cb1 = 0.05 * jax.random.normal(ks[1], (Cout,), jnp.float32)
    s1, b1 = fold(*bn(ks[2], ks[3], ks[4], ks[5], Cout), cb1)

    w2 = conv_w(ks[6], 3, 3, Cout, Cout)
    cb2 = 0.05 * jax.random.normal(ks[7], (Cout,), jnp.float32)
    s2, b2 = fold(*bn(ks[8], ks[9], ks[10], ks[11], Cout), cb2)

    ws = jax.random.normal(ks[12], (Cin, Cout), jnp.float32) * 0.1          # 1x1 conv as matmul
    cbs = 0.05 * jax.random.normal(ks[13], (Cout,), jnp.float32)
    ss, bs = fold(*bn(ks[14], ks[15], ks[16], ks[17], Cout), cbs)

    return (w1, s1, b1, w2, s2, b2, ws, ss, bs)


def resblock_ref(x_nchw, params):
    """Pure-JAX reference mirroring the kernel numerics: BN scale folded into bf16 weights,
    f32 accumulation, f32 eval-mode bias + LeakyReLU epilogue."""
    (w1, s1, b1, w2, s2, b2, ws, ss, bs) = params
    x = jnp.transpose(x_nchw, (0, 2, 3, 1)).astype(jnp.bfloat16)
    dn = ('NHWC', 'HWIO', 'NHWC')
    w1s = (w1 * s1.reshape(1, 1, 1, -1)).astype(jnp.bfloat16)
    c1 = lax.conv_general_dilated(x, w1s, (1, 1), 'SAME', dimension_numbers=dn,
                                  preferred_element_type=jnp.float32)
    h1 = _leaky(c1 + b1.reshape(1, 1, 1, -1))
    w2s = (w2 * s2.reshape(1, 1, 1, -1)).astype(jnp.bfloat16)
    c2 = lax.conv_general_dilated(h1.astype(jnp.bfloat16), w2s, (1, 1), 'SAME',
                                  dimension_numbers=dn, preferred_element_type=jnp.float32)
    h2 = c2 + b2.reshape(1, 1, 1, -1)
    wss = (ws * ss.reshape(1, -1)).astype(jnp.bfloat16)
    sc = jnp.einsum('nhwc,cd->nhwd', x, wss,
                    preferred_element_type=jnp.float32) + bs.reshape(1, 1, 1, -1)
    out = _leaky(h2 + sc)
    return jnp.transpose(out, (0, 3, 1, 2))


if __name__ == "__main__":
    B, Cin, Cout, H, W = 2, 4, 8, 16, 16      # Cout != Cin -> 1x1-conv shortcut exercised
    key = jax.random.PRNGKey(0)
    kx, kp = jax.random.split(key)
    x = jax.random.normal(kx, (B, Cin, H, W), jnp.float32)
    params = make_params(kp, Cin, Cout)

    y = jax.block_until_ready(resblock_pallas(x, params))
    y_ref = jax.block_until_ready(resblock_ref(x, params))
    np.testing.assert_allclose(np.asarray(y), np.asarray(y_ref), rtol=2e-2, atol=2e-2)

    print("KERNEL_OK")
</pallas_src>

<mosaic_0001>
module attributes {stable_mosaic.version = 11 : i64} {
  func.func @resblock_kernel(%arg0: i32, %arg1: i32, %arg2: memref<1x12x24x128xbf16, #tpu.memory_space<vmem>>, %arg3: memref<1152x128xbf16, #tpu.memory_space<vmem>>, %arg4: memref<1x128xf32, #tpu.memory_space<vmem>>, %arg5: memref<1152x128xbf16, #tpu.memory_space<vmem>>, %arg6: memref<1x128xf32, #tpu.memory_space<vmem>>, %arg7: memref<128x128xbf16, #tpu.memory_space<vmem>>, %arg8: memref<1x128xf32, #tpu.memory_space<vmem>>, %arg9: memref<1x8x16x128xbf16, #tpu.memory_space<vmem>>, %arg10: memref<10x32x128xbf16, #tpu.memory_space<vmem>>) attributes {dimension_semantics = [#tpu.dimension_semantics<parallel>, #tpu.dimension_semantics<parallel>], iteration_bounds = array<i64: 2, 2>, scalar_prefetch = 0 : i64, scratch_operands = 1 : i64, tpu.core_type = #tpu.core_type<tc>, window_params = [{transform_indices = @transform_0, window_bounds = array<i64: 1, 12, 24, 128>}, {pipeline_mode = #tpu.pipeline_mode<synchronous>, transform_indices = @transform_1, window_bounds = array<i64: 1152, 128>}, {pipeline_mode = #tpu.pipeline_mode<synchronous>, transform_indices = @transform_2, window_bounds = array<i64: 1, 128>}, {pipeline_mode = #tpu.pipeline_mode<synchronous>, transform_indices = @transform_3, window_bounds = array<i64: 1152, 128>}, {pipeline_mode = #tpu.pipeline_mode<synchronous>, transform_indices = @transform_4, window_bounds = array<i64: 1, 128>}, {pipeline_mode = #tpu.pipeline_mode<synchronous>, transform_indices = @transform_5, window_bounds = array<i64: 128, 128>}, {pipeline_mode = #tpu.pipeline_mode<synchronous>, transform_indices = @transform_6, window_bounds = array<i64: 1, 128>}, {transform_indices = @transform_7, window_bounds = array<i64: 1, 8, 16, 128>}]} {
    %c0 = arith.constant 0 : index
    %c0_0 = arith.constant 0 : index
    %c0_1 = arith.constant 0 : index
    %c0_2 = arith.constant 0 : index
    %0 = vector.load %arg2[%c0, %c0_0, %c0_1, %c0_2] : memref<1x12x24x128xbf16, #tpu.memory_space<vmem>>, vector<1x12x24x128xbf16>
    %1 = vector.shape_cast %0 : vector<1x12x24x128xbf16> to vector<12x24x128xbf16>
    %2 = vector.extract_strided_slice %1 {offsets = [0, 0, 0], sizes = [10, 16, 128], strides = [1, 1, 1]} : vector<12x24x128xbf16> to vector<10x16x128xbf16>
    %3 = vector.shape_cast %2 : vector<10x16x128xbf16> to vector<160x128xbf16>
    %4 = vector.extract_strided_slice %1 {offsets = [0, 1, 0], sizes = [10, 16, 128], strides = [1, 1, 1]} : vector<12x24x128xbf16> to vector<10x16x128xbf16>
    %5 = vector.shape_cast %4 : vector<10x16x128xbf16> to vector<160x128xbf16>
    %6 = vector.extract_strided_slice %1 {offsets = [0, 2, 0], sizes = [10, 16, 128], strides = [1, 1, 1]} : vector<12x24x128xbf16> to vector<10x16x128xbf16>
    %7 = vector.shape_cast %6 : vector<10x16x128xbf16> to vector<160x128xbf16>
    %8 = vector.extract_strided_slice %1 {offsets = [1, 0, 0], sizes = [10, 16, 128], strides = [1, 1, 1]} : vector<12x24x128xbf16> to vector<10x16x128xbf16>
    %9 = vector.shape_cast %8 : vector<10x16x128xbf16> to vector<160x128xbf16>
    %10 = vector.extract_strided_slice %1 {offsets = [1, 1, 0], sizes = [10, 16, 128], strides = [1, 1, 1]} : vector<12x24x128xbf16> to vector<10x16x128xbf16>
    %11 = vector.shape_cast %10 : vector<10x16x128xbf16> to vector<160x128xbf16>
    %12 = vector.extract_strided_slice %1 {offsets = [1, 2, 0], sizes = [10, 16, 128], strides = [1, 1, 1]} : vector<12x24x128xbf16> to vector<10x16x128xbf16>
    %13 = vector.shape_cast %12 : vector<10x16x128xbf16> to vector<160x128xbf16>
    %14 = vector.extract_strided_slice %1 {offsets = [2, 0, 0], sizes = [10, 16, 128], strides = [1, 1, 1]} : vector<12x24x128xbf16> to vector<10x16x128xbf16>
    %15 = vector.shape_cast %14 : vector<10x16x128xbf16> to vector<160x128xbf16>
    %16 = vector.extract_strided_slice %1 {offsets = [2, 1, 0], sizes = [10, 16, 128], strides = [1, 1, 1]} : vector<12x24x128xbf16> to vector<10x16x128xbf16>
    %17 = vector.shape_cast %16 : vector<10x16x128xbf16> to vector<160x128xbf16>
    %18 = vector.extract_strided_slice %1 {offsets = [2, 2, 0], sizes = [10, 16, 128], strides = [1, 1, 1]} : vector<12x24x128xbf16> to vector<10x16x128xbf16>
    %19 = vector.shape_cast %18 : vector<10x16x128xbf16> to vector<160x128xbf16>
    %20 = tpu.concatenate %3, %5, %7, %9, %11, %13, %15, %17, %19 in 1 : vector<160x128xbf16>, vector<160x128xbf16>, vector<160x128xbf16>, vector<160x128xbf16>, vector<160x128xbf16>, vector<160x128xbf16>, vector<160x128xbf16>, vector<160x128xbf16>, vector<160x128xbf16> -> vector<160x1152xbf16>
    %c0_3 = arith.constant 0 : index
    %c0_4 = arith.constant 0 : index
    %21 = vector.load %arg3[%c0_3, %c0_4] : memref<1152x128xbf16, #tpu.memory_space<vmem>>, vector<1152x128xbf16>
    %cst = arith.constant dense<0.000000e+00> : vector<160x128xf32>
    %22 = tpu.matmul %20, %21, %cst {dimension_numbers = #tpu.dot_dimension_numbers<[1], [0], [0], [1], [0, 0, 1, 1], [], []>} : vector<160x1152xbf16>, vector<1152x128xbf16>, vector<160x128xf32> -> vector<160x128xf32>
    %c0_5 = arith.constant 0 : index
    %c0_6 = arith.constant 0 : index
    %23 = vector.load %arg4[%c0_5, %c0_6] : memref<1x128xf32, #tpu.memory_space<vmem>>, vector<1x128xf32>
    %24 = vector.broadcast %23 : vector<1x128xf32> to vector<160x128xf32>
    %25 = arith.addf %22, %24 : vector<160x128xf32>
    %cst_7 = arith.constant 0.000000e+00 : f32
    %26 = vector.broadcast %cst_7 : f32 to vector<160x128xf32>
    %27 = arith.cmpf ogt, %25, %26 : vector<160x128xf32>
    %cst_8 = arith.constant 0.00999999977 : f32
    %28 = vector.broadcast %cst_8 : f32 to vector<160x128xf32>
    %29 = arith.mulf %28, %25 : vector<160x128xf32>
    %30 = arith.select %27, %25, %29 : vector<160x128xi1>, vector<160x128xf32>
    %31 = vector.shape_cast %30 : vector<160x128xf32> to vector<10x16x128xf32>
    %c8_i32 = arith.constant 8 : i32
    %32 = arith.muli %arg1, %c8_i32 : i32
    %c1_i32 = arith.constant 1 : i32
    %33 = arith.subi %32, %c1_i32 : i32
    %34 = tpu.iota {dimensions = array<i32: 0>} : vector<10x16x1xi32>
    %35 = vector.broadcast %33 : i32 to vector<10x16x1xi32>
    %36 = arith.addi %35, %34 : vector<10x16x1xi32>
    %37 = tpu.iota {dimensions = array<i32: 1>} : vector<10x16x1xi32>
    %c0_i32 = arith.constant 0 : i32
    %38 = vector.broadcast %c0_i32 : i32 to vector<10x16x1xi32>
    %39 = arith.cmpi sge, %36, %38 : vector<10x16x1xi32>
    %c16_i32 = arith.constant 16 : i32
    %40 = vector.broadcast %c16_i32 : i32 to vector<10x16x1xi32>
    %41 = arith.cmpi slt, %36, %40 : vector<10x16x1xi32>
    %42 = arith.andi %39, %41 : vector<10x16x1xi1>
    %c16_i32_9 = arith.constant 16 : i32
    %43 = vector.broadcast %c16_i32_9 : i32 to vector<10x16x1xi32>
    %44 = arith.cmpi slt, %37, %43 : vector<10x16x1xi32>
    %45 = arith.andi %42, %44 : vector<10x16x1xi1>
    %cst_10 = arith.constant 0.000000e+00 : f32
    %46 = vector.shape_cast %45 : vector<10x16x1xi1> to vector<10x16x1xi1>
    %47 = vector.broadcast %46 : vector<10x16x1xi1> to vector<10x16x128xi1>
    %48 = vector.broadcast %cst_10 : f32 to vector<10x16x128xf32>
    %49 = arith.select %47, %31, %48 : vector<10x16x128xi1>, vector<10x16x128xf32>
    %cst_11 = arith.constant 0.000000e+00 : bf16
    %50 = vector.broadcast %cst_11 : bf16 to vector<10x8x128xbf16>
    %c0_12 = arith.constant 0 : index
    %c0_13 = arith.constant 0 : index
    %c0_14 = arith.constant 0 : index
    %51 = vector.load %arg10[%c0_12, %c0_13, %c0_14] : memref<10x32x128xbf16, #tpu.memory_space<vmem>>, vector<10x8x128xbf16>
    tpu.vector_store %arg10[%c0_12, %c0_13, %c0_14], %50 {strides = array<i32>} : memref<10x32x128xbf16, #tpu.memory_space<vmem>>, vector<10x8x128xbf16>,
    %cst_15 = arith.constant 0.000000e+00 : bf16
    %52 = vector.broadcast %cst_15 : bf16 to vector<10x8x128xbf16>
    %c0_16 = arith.constant 0 : index
    %c24 = arith.constant 24 : index
    %c0_17 = arith.constant 0 : index
    %53 = vector.load %arg10[%c0_16, %c24, %c0_17] : memref<10x32x128xbf16, #tpu.memory_space<vmem>>, vector<10x8x128xbf16>
    tpu.vector_store %arg10[%c0_16, %c24, %c0_17], %52 {strides = array<i32>} : memref<10x32x128xbf16, #tpu.memory_space<vmem>>, vector<10x8x128xbf16>,
    %54 = arith.truncf %49 : vector<10x16x128xf32> to vector<10x16x128xbf16>
    %c0_18 = arith.constant 0 : index
    %c8 = arith.constant 8 : index
    %c0_19 = arith.constant 0 : index
    %55 = vector.load %arg10[%c0_18, %c8, %c0_19] : memref<10x32x128xbf16, #tpu.memory_space<vmem>>, vector<10x16x128xbf16>
    tpu.vector_store %arg10[%c0_18, %c8, %c0_19], %54 {strides = array<i32>} : memref<10x32x128xbf16, #tpu.memory_space<vmem>>, vector<10x16x128xbf16>,
    %c0_20 = arith.constant 0 : index
    %c0_21 = arith.constant 0 : index
    %c0_22 = arith.constant 0 : index
    %56 = vector.load %arg10[%c0_20, %c0_21, %c0_22] : memref<10x32x128xbf16, #tpu.memory_space<vmem>>, vector<10x32x128xbf16>
    %57 = vector.extract_strided_slice %56 {offsets = [0, 7, 0], sizes = [8, 16, 128], strides = [1, 1, 1]} : vector<10x32x128xbf16> to vector<8x16x128xbf16>
    %58 = vector.shape_cast %57 : vector<8x16x128xbf16> to vector<128x128xbf16>
    %59 = vector.extract_strided_slice %56 {offsets = [0, 8, 0], sizes = [8, 16, 128], strides = [1, 1, 1]} : vector<10x32x128xbf16> to vector<8x16x128xbf16>
    %60 = vector.shape_cast %59 : vector<8x16x128xbf16> to vector<128x128xbf16>
    %61 = vector.extract_strided_slice %56 {offsets = [0, 9, 0], sizes = [8, 16, 128], strides = [1, 1, 1]} : vector<10x32x128xbf16> to vector<8x16x128xbf16>
    %62 = vector.shape_cast %61 : vector<8x16x128xbf16> to vector<128x128xbf16>
    %63 = vector.extract_strided_slice %56 {offsets = [1, 7, 0], sizes = [8, 16, 128], strides = [1, 1, 1]} : vector<10x32x128xbf16> to vector<8x16x128xbf16>
    %64 = vector.shape_cast %63 : vector<8x16x128xbf16> to vector<128x128xbf16>
    %65 = vector.extract_strided_slice %56 {offsets = [1, 8, 0], sizes = [8, 16, 128], strides = [1, 1, 1]} : vector<10x32x128xbf16> to vector<8x16x128xbf16>
    %66 = vector.shape_cast %65 : vector<8x16x128xbf16> to vector<128x128xbf16>
    %67 = vector.extract_strided_slice %56 {offsets = [1, 9, 0], sizes = [8, 16, 128], strides = [1, 1, 1]} : vector<10x32x128xbf16> to vector<8x16x128xbf16>
    %68 = vector.shape_cast %67 : vector<8x16x128xbf16> to vector<128x128xbf16>
    %69 = vector.extract_strided_slice %56 {offsets = [2, 7, 0], sizes = [8, 16, 128], strides = [1, 1, 1]} : vector<10x32x128xbf16> to vector<8x16x128xbf16>
    %70 = vector.shape_cast %69 : vector<8x16x128xbf16> to vector<128x128xbf16>
    %71 = vector.extract_strided_slice %56 {offsets = [2, 8, 0], sizes = [8, 16, 128], strides = [1, 1, 1]} : vector<10x32x128xbf16> to vector<8x16x128xbf16>
    %72 = vector.shape_cast %71 : vector<8x16x128xbf16> to vector<128x128xbf16>
    %73 = vector.extract_strided_slice %56 {offsets = [2, 9, 0], sizes = [8, 16, 128], strides = [1, 1, 1]} : vector<10x32x128xbf16> to vector<8x16x128xbf16>
    %74 = vector.shape_cast %73 : vector<8x16x128xbf16> to vector<128x128xbf16>
    %75 = tpu.concatenate %58, %60, %62, %64, %66, %68, %70, %72, %74 in 1 : vector<128x128xbf16>, vector<128x128xbf16>, vector<128x128xbf16>, vector<128x128xbf16>, vector<128x128xbf16>, vector<128x128xbf16>, vector<128x128xbf16>, vector<128x128xbf16>, vector<128x128xbf16> -> vector<128x1152xbf16>
    %c0_23 = arith.constant 0 : index
    %c0_24 = arith.constant 0 : index
    %76 = vector.load %arg5[%c0_23, %c0_24] : memref<1152x128xbf16, #tpu.memory_space<vmem>>, vector<1152x128xbf16>
    %cst_25 = arith.constant dense<0.000000e+00> : vector<128x128xf32>
    %77 = tpu.matmul %75, %76, %cst_25 {dimension_numbers = #tpu.dot_dimension_numbers<[1], [0], [0], [1], [0, 0, 1, 1], [], []>} : vector<128x1152xbf16>, vector<1152x128xbf16>, vector<128x128xf32> -> vector<128x128xf32>
    %c0_26 = arith.constant 0 : index
    %c0_27 = arith.constant 0 : index
    %78 = vector.load %arg6[%c0_26, %c0_27] : memref<1x128xf32, #tpu.memory_space<vmem>>, vector<1x128xf32>
    %79 = vector.broadcast %78 : vector<1x128xf32> to vector<128x128xf32>
    %80 = arith.addf %77, %79 : vector<128x128xf32>
    %81 = vector.extract_strided_slice %11 {offsets = [16, 0], sizes = [128, 128], strides = [1, 1]} : vector<160x128xbf16> to vector<128x128xbf16>
    %c0_28 = arith.constant 0 : index
    %c0_29 = arith.constant 0 : index
    %82 = vector.load %arg7[%c0_28, %c0_29] : memref<128x128xbf16, #tpu.memory_space<vmem>>, vector<128x128xbf16>
    %cst_30 = arith.constant dense<0.000000e+00> : vector<128x128xf32>
    %83 = tpu.matmul %81, %82, %cst_30 {dimension_numbers = #tpu.dot_dimension_numbers<[1], [0], [0], [1], [0, 0, 1, 1], [], []>} : vector<128x128xbf16>, vector<128x128xbf16>, vector<128x128xf32> -> vector<128x128xf32>
    %c0_31 = arith.constant 0 : index
    %c0_32 = arith.constant 0 : index
    %84 = vector.load %arg8[%c0_31, %c0_32] : memref<1x128xf32, #tpu.memory_space<vmem>>, vector<1x128xf32>
    %85 = vector.broadcast %84 : vector<1x128xf32> to vector<128x128xf32>
    %86 = arith.addf %83, %85 : vector<128x128xf32>
    %87 = arith.addf %80, %86 : vector<128x128xf32>
    %cst_33 = arith.constant 0.000000e+00 : f32
    %88 = vector.broadcast %cst_33 : f32 to vector<128x128xf32>
    %89 = arith.cmpf ogt, %87, %88 : vector<128x128xf32>
    %cst_34 = arith.constant 0.00999999977 : f32
    %90 = vector.broadcast %cst_34 : f32 to vector<128x128xf32>
    %91 = arith.mulf %90, %87 : vector<128x128xf32>
    %92 = arith.select %89, %87, %91 : vector<128x128xi1>, vector<128x128xf32>
    %93 = vector.shape_cast %92 : vector<128x128xf32> to vector<8x16x128xf32>
    %94 = arith.truncf %93 : vector<8x16x128xf32> to vector<8x16x128xbf16>
    %c0_35 = arith.constant 0 : index
    %c0_36 = arith.constant 0 : index
    %c0_37 = arith.constant 0 : index
    %c0_38 = arith.constant 0 : index
    %95 = vector.load %arg9[%c0_35, %c0_36, %c0_37, %c0_38] : memref<1x8x16x128xbf16, #tpu.memory_space<vmem>>, vector<1x8x16x128xbf16>
    %96 = vector.shape_cast %95 : vector<1x8x16x128xbf16> to vector<8x16x128xbf16>
    %97 = vector.shape_cast %94 : vector<8x16x128xbf16> to vector<1x8x16x128xbf16>
    tpu.vector_store %arg9[%c0_35, %c0_36, %c0_37, %c0_38], %97 {strides = array<i32>} : memref<1x8x16x128xbf16, #tpu.memory_space<vmem>>, vector<1x8x16x128xbf16>,
    return
  }
  func.func @transform_0(%arg0: i32, %arg1: i32) -> (i32, i32, i32, i32) {
    %c2_i32 = arith.constant 2 : i32
    %0 = arith.muli %arg0, %c2_i32 : i32
    %1 = arith.addi %0, %arg1 : i32
    %c0_i32 = arith.constant 0 : i32
    %c0_i32_0 = arith.constant 0 : i32
    %c0_i32_1 = arith.constant 0 : i32
    %c0_i32_2 = arith.constant 0 : i32
    return %1, %c0_i32, %c0_i32_0, %c0_i32_1 : i32, i32, i32, i32
  }
  func.func @transform_1(%arg0: i32, %arg1: i32) -> (i32, i32) {
    %c0_i32 = arith.constant 0 : i32
    %c0_i32_0 = arith.constant 0 : i32
    %c0_i32_1 = arith.constant 0 : i32
    return %c0_i32, %c0_i32_0 : i32, i32
  }
  func.func @transform_2(%arg0: i32, %arg1: i32) -> (i32, i32) {
    %c0_i32 = arith.constant 0 : i32
    %c0_i32_0 = arith.constant 0 : i32
    %c0_i32_1 = arith.constant 0 : i32
    return %c0_i32, %c0_i32_0 : i32, i32
  }
  func.func @transform_3(%arg0: i32, %arg1: i32) -> (i32, i32) {
    %c0_i32 = arith.constant 0 : i32
    %c0_i32_0 = arith.constant 0 : i32
    %c0_i32_1 = arith.constant 0 : i32
    return %c0_i32, %c0_i32_0 : i32, i32
  }
  func.func @transform_4(%arg0: i32, %arg1: i32) -> (i32, i32) {
    %c0_i32 = arith.constant 0 : i32
    %c0_i32_0 = arith.constant 0 : i32
    %c0_i32_1 = arith.constant 0 : i32
    return %c0_i32, %c0_i32_0 : i32, i32
  }
  func.func @transform_5(%arg0: i32, %arg1: i32) -> (i32, i32) {
    %c0_i32 = arith.constant 0 : i32
    %c0_i32_0 = arith.constant 0 : i32
    %c0_i32_1 = arith.constant 0 : i32
    return %c0_i32, %c0_i32_0 : i32, i32
  }
  func.func @transform_6(%arg0: i32, %arg1: i32) -> (i32, i32) {
    %c0_i32 = arith.constant 0 : i32
    %c0_i32_0 = arith.constant 0 : i32
    %c0_i32_1 = arith.constant 0 : i32
    return %c0_i32, %c0_i32_0 : i32, i32
  }
  func.func @transform_7(%arg0: i32, %arg1: i32) -> (i32, i32, i32, i32) {
    %c0_i32 = arith.constant 0 : i32
    %c0_i32_0 = arith.constant 0 : i32
    %c0_i32_1 = arith.constant 0 : i32
    return %arg0, %arg1, %c0_i32, %c0_i32_0 : i32, i32, i32, i32
  }
}

</mosaic_0001>

<bundles_post_ra>
// kernel: tpu_custom_call.1
= control target key start
LH: loop header
LB: loop body
LE: loop exit
PB: predicated region body
PF: predicated region fallthrough
CT: control target
= control target key end

     0   :  { %s7106_s0 = inlined_call_operand.hbm [shape: bf16[4,12,24,128], index: 0, kind: input, shape index: {}]   ;;  %s7107_s1 = inlined_call_operand.hbm [shape: bf16[1152,128], index: 1, kind: input, shape index: {}]   ;;  %s7108_s2 = inlined_call_operand.vmem [shape: f32[1,128], index: 2, kind: input, shape index: {}]   ;;  %s7109_s3 = inlined_call_operand.hbm [shape: bf16[1152,128], index: 3, kind: input, shape index: {}]   ;;  %s7110_s4 = inlined_call_operand.vmem [shape: f32[1,128], index: 4, kind: input, shape index: {}]   ;;  %s7111_s5 = inlined_call_operand.hbm [shape: bf16[128,128], index: 5, kind: input, shape index: {}]   ;;  %s7112_s6 = inlined_call_operand.vmem [shape: f32[1,128], index: 6, kind: input, shape index: {}]   ;;  %s7113_s7 = inlined_call_operand.hbm [shape: bf16[2,16,16,128], index: 7, kind: output, shape index: {}]  }
   0x1   :  { %7135 = sst [smem:[#allocation32_spill]] %s7107_s1 }
   0x2   :  { %7136 = sst [smem:[#allocation33_spill]] %s7109_s3 }
   0x3   :  { %7137 = sst [smem:[#allocation34_spill]] %s7110_s4 }
   0x4   :  { %7138 = sst [smem:[#allocation35_spill]] %s7111_s5 }
   0x5   :  { %7139 = sst [smem:[#allocation36_spill]] %s7112_s6 }
   0x6   :  { %7140 = sst [smem:[#allocation37_spill]] %s7113_s7 }
   0x7   :  { %12 = vsyncpa [#allocation4], 0 }
   0x8   :  { %14 = vsyncpa [#allocation4 + $0x1], 0 }
   0x9   :  { %15 = vsyncpa [#allocation7], 0 }
   0xa   :  { %16 = vsyncpa [#allocation10], 0 }
   0xb   :  { %17 = vsyncpa [#allocation5], 0 }
   0xc   :  { %19 = vsyncpa [#allocation5 + $0x1], 0  ;;  %s5678_s24 = smov 0   ;;  %s5680_s25 = smov 0  }
   0xd   :  { %s5682_s26 = smov 0   ;;  %s5684_s27 = smov 0  }
   0xe   :  { %s5686_s28 = smov 0   ;;  %s5688_s29 = smov 0  }
   0xf   :  { %s5690_s30 = smov 0   ;;  %s5692_s8 = smov 0  }
  0x10   :  { %s5694_s9 = smov 0   ;;  %s5696_s10 = smov 0  }
  0x11   :  { %s5698_s11 = smov 0  }
  0x12 LB: > { %7141 = sst [smem:[#allocation16_spill]] %s5588_s24  ;;  %s4239_s12 = sadd.s32 4294967295, %s5628_s11   ;;  %s5628_s11 = sphi %s5698_s11, %s25_s11   ;;  %s5624_s10 = sphi %s5696_s10, %s7222_s10   ;;  %s5620_s9 = sphi %s5694_s9, %s7221_s9   ;;  %s5616_s8 = sphi %s5692_s8, %s7220_s8   ;;  %s5612_s30 = sphi %s5690_s30, %s7213_s30   ;;  %s5608_s29 = sphi %s5688_s29, %s7219_s29   ;;  %s5604_s28 = sphi %s5686_s28, %s7218_s28   ;;  %s5600_s27 = sphi %s5684_s27, %s7217_s27   ;;  %s5596_s26 = sphi %s5682_s26, %s7216_s26   ;;  %s5592_s25 = sphi %s5680_s25, %s7215_s25   ;;  %s5588_s24 = sphi %s5678_s24, %s7212_s24  }
  0x13   : > { %7142 = sst [smem:[#allocation17_spill]] %s5592_s25  ;;  %s4240_s13 = sadd.s32 4294967294, %s5628_s11  }
  0x14   : > { %7143 = sst [smem:[#allocation18_spill]] %s5616_s8  ;;  %p61_p0 = scmp.ne.s32.totalorder %s5604_s28, %s5600_s27 }
  0x15   : > { %7144 = sst [smem:[#allocation19_spill]] %s5620_s9  ;;  %p5734_p1 = scmp.eq.s32.totalorder %s4239_s12, 0 }
  0x16   : > { %7145 = sst [smem:[#allocation20_spill]] %s5628_s11  ;;  %p212_p2 = scmp.ne.s32.totalorder %s5596_s26, %s5592_s25 }
  0x17   : > { %p213_p3 = scmp.eq.s32.totalorder %s4239_s12, 3  ;;  %p5742_p4 = por %p5734_p1, %p61_p0 }
  0x18   : > { %p218_p5 = scmp.ne.s32.totalorder %s5592_s25, %s5588_s24  ;;  %p219_p7 = scmp.eq.s32.totalorder %s4240_s13, 3 }
  0x19   : > { %p5748_p6 = por %p213_p3, %p212_p2  ;;  %p4243_p8 = scmp.ge.s32.totalorder %s5628_s11, 1 }
  0x1a   : > { %p226_p9 = scmp.lt.s32.totalorder %s5628_s11, 5  ;;  %p5754_p10 = por %p219_p7, %p218_p5 }
  0x1b   : > { %s7148_s16 = scalar_select %p5748_p6, 1, 0 }
  0x1c   : > { %s7150_s17 = scalar_select %p5754_p10, 1, 0 }
  0x1d   : > { %7149 = sst [smem:[#allocation21_spill]] %s7148_s16  ;;  %p5758_p11 = pnand %p4243_p8, %p226_p9 }
  0x1e   : > { %7151 = sst [smem:[#allocation22_spill]] %s7150_s17  ;;  %s5630_s22 = smov [#allocation6]  }
  0x1f   : > { %s7153_s1 = sld [smem:[#allocation32_spill]]  ;;  %p5247_p12 = pneg %p5758_p11 }
  0x20   : > { %s239_s23 = sshll.u32 %s5630_s22, 4  ;;  %s7155_s3 = sld [smem:[#allocation33_spill]]  ;;  %s240_s23 = int_to_ptr.vmem [resolvable:$true] %s239_s23 }
  0x21   : > { %p5769_p13 = pnand %p5247_p12, %p5734_p1  ;;  %s7116_s20 = smov 64  }
  0x22   : > { %s7156_s5 = sld [smem:[#allocation35_spill]]  ;;  %s5633_s13 = smov [#allocation8]  }
  0x23   : > { %s5634_s24 = smov [#allocation9]   ;;  %s34_s17 = sadd.s32 1, %s5620_s9 }
  0x24   : > { %p35_p0 = scmp.ge.s32.totalorder %s34_s17, 2  ;;  %s4241_s22 = sshll.u32 %s5624_s10, 1 }
  0x25   : > { %s237_s21 = sshll.u32 %s7153_s1, 4  ;;  %s7117_s1 = smov 4   ;;  %s238_s21 = int_to_ptr.hbm [resolvable:$true] %s237_s21 }
  0x26   : > { %s254_s19 = sshll.u32 %s7155_s3, 4  ;;  %s256_s3 = sshll.u32 %s5633_s13, 4  ;;  %s255_s19 = int_to_ptr.hbm [resolvable:$true] %s254_s19  ;;  %s257_s3 = int_to_ptr.vmem [resolvable:$true] %s256_s3 }
  0x27   : > { %5250 = dma.hbm_to_vmem [thread:$0]  (!%p5769_p13), %s238_s21, 9216, %s240_s23, [#allocation7], %s7116_s20, %s7116_s20, %s7117_s1  }
  0x28   : > { %s271_s12 = sshll.u32 %s7156_s5, 4  ;;  %s273_s21 = sshll.u32 %s5634_s24, 4  ;;  %s272_s12 = int_to_ptr.hbm [resolvable:$true] %s271_s12  ;;  %s274_s21 = int_to_ptr.vmem [resolvable:$true] %s273_s21 }
  0x29   : > { %5253 = dma.hbm_to_vmem [thread:$0]  (!%p5769_p13), %s255_s19, 9216, %s257_s3, [#allocation7], %s7116_s20, %s7116_s20, %s7117_s1  }
  0x2a   : > { %5256 = dma.hbm_to_vmem [thread:$0]  (!%p5769_p13), %s272_s12, 1024, %s274_s21, [#allocation10], %s7116_s20, %s7116_s20, %s7117_s1  }
  0x2b   : > { %s37_s23 = sadd.s32 1, %s5624_s10  ;;  %s42_s13 = sadd.s32 %s5620_s9, %s4241_s22 }
  0x2c   : > { %s7224_s17 = smov (%p35_p0, %s34_s17), 0  ;;  %s7226_s23 = smov (!%p35_p0, %s37_s23), %s5624_s10 }
  0x2d   : > { %p55_p2 = scmp.ne.s32.totalorder %s5608_s29, %s5604_s28  ;;  %p56_p3 = scmp.eq.s32.totalorder %s5628_s11, 0 }
  0x2e   : > { %p39_p5 = scmp.ge.s32.totalorder %s7226_s23, 2  ;;  %s48_s3 = sadd.s32 1, %s5608_s29 }
  0x2f   : > { %p5805_p7 = por %p56_p3, %p55_p2  ;;  %s198_s27 = ssub.s32 %s5620_s9, %s7224_s17 }
  0x30   : > { %s7228_s23 = smov (%p39_p5, %s7226_s23), 0  ;;  %s202_s19 = sadd.s32 1, %s5596_s26 }
  0x31   : > { %7158 = sst [smem:[#allocation23_spill]] %s7228_s23  ;;  %p5268_p8 = scmp.lt.s32.totalorder %s5628_s11, 4 }
  0x32   : > { %s4242_s12 = sshll.u32 %s7228_s23, 1  ;;  %s197_s21 = ssub.s32 %s5624_s10, %s7228_s23 }
  0x33   : > { %s44_s22 = sadd.s32 %s4242_s12, %s7224_s17  ;;  %s199_s20 = sor.u32 %s198_s27, %s197_s21 }
  0x34   : > { %s45_s1 = ssub.s32 %s42_s13, %s44_s22  ;;  %p200_p9 = scmp.eq.s32.totalorder %s199_s20, 0 }
  0x35   : > { %p46_p12 = scmp.eq.s32.totalorder %s45_s1, 0  ;;  %s290_s5 = sand.u32 1, %s5608_s29  }
  0x36   : > { %s5821_s16 = scalar_select %p200_p9, %s5596_s26, %s202_s19  }
  0x37   : > { %s5824_s7 = scalar_select %p46_p12, %s5608_s29, %s48_s3  }
  0x38   : > { %s5228_s8 = smul.u32 144, %s290_s5  ;;  %p5258_p13 = pnand %p5268_p8, %p5805_p7 }
  0x39   : > { %s5229_s9 = smul.u32 144, %s42_s13  ;;  %s291_s20 = scalar_lea.sflag [#allocation4], %s290_s5 }
  0x3a   : > { %s294_s4 = scalar_lea.vmem [#allocation3], %s5228_s8  ;;  %s7159_s1 = smov 4  }
  0x3b   : > { %s301_s11 = scalar_lea.hbm %s7106_s0, %s5229_s9  ;;  %s304_s23 = sshll.u32 %s294_s4, 4  ;;  %s305_s23 = int_to_ptr.vmem [resolvable:$true] %s304_s23 }
  0x3c   : > { %s302_s12 = sshll.u32 %s301_s11, 4  ;;  %s7160_s27 = smov 64   ;;  %s303_s12 = int_to_ptr.hbm [resolvable:$true] %s302_s12 }
  0x3d   : > { %5260 = dma.hbm_to_vmem [thread:$0]  (!%p5258_p13), %s303_s12, 2304, %s305_s23, %s291_s20, %s7160_s27, %s7160_s27, %s7159_s1  }
  0x3e   : > { %316 = sbr.rel (%p5758_p11) target bundleno = 1098 (0x44a), region = 48 }
  0x43   : > { %s318_s13 = sand.u32 1, %s5604_s28  }
  0x44   : > { %s5230_s3 = smul.u32 144, %s318_s13  ;;  %s319_s24 = scalar_lea.sflag [#allocation4], %s318_s13 }
  0x46   : > { %s5837_s6 = scalar_lea.vmem [#allocation3], %s5230_s3 }
  0x47   : > { %5571 = dma.done.wait (%p5742_p4), %s319_s24, 2304  }
  0x48   : > { %5573 = vsyncadd (%p5742_p4), %s319_s24, 4294964992 }
  0x49   : > { %5575 = dma.done.wait (%p5734_p1), [#allocation7], 18432  }
  0x4a   : > { %5577 = vsyncadd (%p5734_p1), [#allocation7], 4294948864 }
  0x4b   : > { %5579 = dma.done.wait (%p5734_p1), [#allocation10], 1024  }
  0x4c   : > { %5581 = vsyncadd (%p5734_p1), [#allocation10], 4294966272  ;;  %v5001_v0 = vld [vmem:[#allocation6 + $0x38] sm:$0xff]  ;;  %v5000_v4 = vld [vmem:[#allocation6 + $0x30] sm:$0xff]  ;;  %vm682_vm0 = vcmask 1042432   ;;  %vm683_vm1 = vcmask 1046532  }
  0x4d   : > { %v5017_v1 = vld [vmem:[#allocation6 + $0xb8] sm:$0xff]  ;;  %1547 = vmatpush.bf16.msra.mxu0 %v5001_v0  ;;  %v5016_v5 = vld [vmem:[#allocation6 + $0xb0] sm:$0xff]  ;;  %v4999_v8 = vld [vmem:[#allocation6 + $0x28] sm:$0xff]  ;;  %vm409_vm2 = vsmask.f32 3328  ;;  %s4603_s25 = sshll.u32 %s5612_s30, 3 }
  0x4e   : > { %v5009_v2 = vld [vmem:[#allocation6 + $0x78] sm:$0xff]  ;;  %1665 = vmatpush.bf16.msra.mxu2 %v5017_v1  ;;  %v5008_v6 = vld [vmem:[#allocation6 + $0x70] sm:$0xff]  ;;  %v5015_v9 = vld [vmem:[#allocation6 + $0xa8] sm:$0xff]  ;;  %vm410_vm3 = vsmask.f32 7440  ;;  %s4604_s8 = sadd.s32 4294967295, %s4603_s25 }
  0x4f   : > { %v5025_v3 = vld [vmem:[#allocation6 + $0xf8] sm:$0xff]  ;;  %1606 = vmatpush.bf16.msra.mxu1 %v5009_v2  ;;  %v5024_v7 = vld [vmem:[#allocation6 + $0xf0] sm:$0xff]  ;;  %v5007_v10 = vld [vmem:[#allocation6 + $0x68] sm:$0xff]  ;;  %vm2365_vm15 = vsmask.f32 256  ;;  %s7195_s18 = sld [smem:[#allocation34_spill]] }
  0x50   : > { %1724 = vmatpush.bf16.msra.mxu3 %v5025_v3  ;;  %v5023_v11 = vld [vmem:[#allocation6 + $0xe8] sm:$0xff]  ;;  %v4998_v12 = vld [vmem:[#allocation6 + $0x20] sm:$0xff]  ;;  %v4997_v20 = vld [vmem:[#allocation6 + $0x18] sm:$0xff]  ;;  %s7201_s21 = sld [smem:[#allocation36_spill]]  ;;  %s5156_s13 = sshll.u32 %s5612_s30, 4 }
  0x51   : > { %1548 = vmatpush.bf16.msra.mxu0 %v5000_v4  ;;  %v5014_v13 = vld [vmem:[#allocation6 + $0xa0] sm:$0xff]  ;;  %v375_v18 = vld [vmem:[%s5837_s6 + $0x8] sm:$0xf]  ;;  %v4996_v35 = vld [vmem:[#allocation6 + $0x10] sm:$0xff]  ;;  %s7202_s22 = sld [smem:[#allocation17_spill]] }
  0x52   : > { %1666 = vmatpush.bf16.msra.mxu2 %v5016_v5  ;;  %v5006_v14 = vld [vmem:[#allocation6 + $0x60] sm:$0xff]  ;;  %v5013_v24 = vld [vmem:[#allocation6 + $0x98] sm:$0xff]  ;;  %v432_v32 = vshll.u32 %v375_v18, 16  ;;  %v5012_v36 = vld [vmem:[#allocation6 + $0x90] sm:$0xff]  ;;  %v690_v40 = vrot.slane %v375_v18, 5  ;;  %s7206_s27 = sld [smem:[#allocation18_spill]] }
  0x53   : > { %1607 = vmatpush.bf16.msra.mxu1 %v5008_v6  ;;  %v5022_v15 = vld [vmem:[#allocation6 + $0xe0] sm:$0xff]  ;;  %v5005_v25 = vld [vmem:[#allocation6 + $0x58] sm:$0xff]  ;;  %v5004_v37 = vld [vmem:[#allocation6 + $0x50] sm:$0xff]  ;;  %s7207_s5 = sld [smem:[#allocation37_spill]] }
  0x54   : > { %1725 = vmatpush.bf16.msra.mxu3 %v5024_v7  ;;  %v373_v16 = vld [vmem:[%s5837_s6] sm:$0xf]  ;;  %v374_v17 = vld [vmem:[%s5837_s6 + $0x4] sm:$0xf]  ;;  %v5021_v26 = vld [vmem:[#allocation6 + $0xd8] sm:$0xff]  ;;  %v434_v45 = vrot.slane %v432_v32, 5 }
  0x55   : > { %1549 = vmatpush.bf16.msra.mxu0 %v4999_v8  ;;  %v413_v19 = vshrl.u32 %v373_v16, 16  ;;  %v416_v21 = vshll.u32 %v373_v16, 16  ;;  %v422_v22 = vshll.u32 %v374_v17, 16  ;;  %v426_v23 = vshrl.u32 %v374_v17, 16  ;;  %v5020_v41 = vld [vmem:[#allocation6 + $0xd0] sm:$0xff]  ;;  %vm5856_vm4 = vmor %vm682_vm0, %vm683_vm1  ;;  %v4995_v49 = vld [vmem:[#allocation6 + $0x8] sm:$0xff] }
  0x56   : > { %1667 = vmatpush.bf16.msra.mxu2 %v5015_v9  ;;  %v687_v27 = vrot.slane %v374_v17, 5  ;;  %v4255_v38 = vrot.slane %v373_v16, 9  ;;  %v5861_v46 = vld [vmem:[%s5837_s6 + $0xc] sm:$0xf]  ;;  %vm5865_vm5 = vmor %vm409_vm2, %vm410_vm3  ;;  %v5870_v48 = vld [vmem:[%s5837_s6 + $0x10] sm:$0xf] }
  0x57   : > { %1608 = vmatpush.bf16.msra.mxu1 %v5007_v10  ;;  %v415_v28 = vrot.slane %v413_v19, 4  ;;  %v418_v29 = vrot.slane %v416_v21, 5  ;;  %v424_v30 = vrot.slane %v422_v22, 5  ;;  %v428_v31 = vrot.slane %v426_v23, 4  ;;  %v5011_v50 = vld [vmem:[#allocation6 + $0x88] sm:$0xff]  ;;  %v4994_v63 = vld [vmem:[#allocation6] sm:$0xff] }
  0x58   : > { %1726 = vmatpush.bf16.msra.mxu3 %v5023_v11  ;;  %v689_v39 = vrot.slane %v687_v27, 4  ;;  %v688_v51 = vsel %vm5856_vm4, %v4255_v38, %v687_v27  ;;  %v437_v53 = vshrl.u32 %v5861_v46, 16  ;;  %v440_v54 = vshll.u32 %v5861_v46, 16  ;;  %v5003_v55 = vld [vmem:[#allocation6 + $0x48] sm:$0xff]  ;;  %v5010_v0 = vld [vmem:[#allocation6 + $0x80] sm:$0xff]  ;;  %v5033_v9 = vld [vmem:[#allocation6 + $0x138] sm:$0xff] }
  0x59   : > { %1550 = vmatpush.bf16.msra.mxu0 %v4998_v12  ;;  %v419_v33 = vor.u32 %v418_v29, %v415_v28  ;;  %v429_v34 = vor.u32 %v428_v31, %v424_v30  ;;  %v5019_v56 = vld [vmem:[#allocation6 + $0xc8] sm:$0xff]  ;;  %v446_v59 = vshll.u32 %v5870_v48, 16  ;;  %v450_v60 = vshrl.u32 %v5870_v48, 16  ;;  %v5002_v3 = vld [vmem:[#allocation6 + $0x40] sm:$0xff]  ;;  %v5032_v19 = vld [vmem:[#allocation6 + $0x130] sm:$0xff]  ;;  %s366_s12 = sand.u32 1, %s7202_s22  }
  0x5a   : > { %1668 = vmatpush.bf16.msra.mxu2 %v5014_v13  ;;  %v691_v52 = vsel %vm5856_vm4, %v689_v39, %v690_v40  ;;  %v903_v61 = vunpack.c.l.b16 %v688_v51  ;;  %v5018_v4 = vld [vmem:[#allocation6 + $0xc0] sm:$0xff]  ;;  %v439_v5 = vrot.slane %v437_v53, 4  ;;  %v442_v6 = vrot.slane %v440_v54, 5  ;;  %v379_v23 = vld [vmem:[%s5837_s6 + $0x18] sm:$0xf]  ;;  %s4254_s20 = sshll.u32 %s366_s12, 6 }
  0x5b   : > { %1609 = vmatpush.bf16.msra.mxu1 %v5006_v14  ;;  %v420_v43 = vrot.slane %v419_v33, 4  ;;  %v430_v44 = vrot.slane %v429_v34, 4  ;;  %v904_v62 = vunpack.c.l.b16 %v691_v52  ;;  %v448_v7 = vrot.slane %v446_v59, 5  ;;  %v378_v10 = vld [vmem:[%s5837_s6 + $0x14] sm:$0xf]  ;;  %v4982_v11 = vld [vmem:[%s5837_s6] sm:$0xff] }
  0x5c   : > { %1727 = vmatpush.bf16.msra.mxu3 %v5022_v15  ;;  %v452_v8 = vrot.slane %v450_v60, 4  ;;  %v4983_v14 = vld [vmem:[%s5837_s6 + $0xc] sm:$0xff]  ;;  %v694_v15 = vrot.slane %v5870_v48, 5  ;;  %v443_v16 = vor.u32 %v442_v6, %v439_v5  ;;  %v456_v18 = vshll.u32 %v378_v10, 16  ;;  %v380_v27 = vld [vmem:[%s5837_s6 + $0x1c] sm:$0xf] }
  0x5d   : > { %1551 = vmatpush.bf16.msra.mxu0 %v4997_v20  ;;  %v425_v57 = vsel %vm5865_vm5, %v420_v43, %v424_v30  ;;  %v435_v58 = vsel %vm5865_vm5, %v430_v44, %v434_v45  ;;  %v923_v12 = vpack.c.b16 %v904_v62, %v903_v61  ;;  %v4256_v20 = vrot.slane %v5861_v46, 9  ;;  %v5031_v28 = vld [vmem:[#allocation6 + $0x128] sm:$0xff]  ;;  %v381_v46 = vld [vmem:[%s5837_s6 + $0x20] sm:$0xf]  ;;  %v382_v62 = vld [vmem:[%s5837_s6 + $0x24] sm:$0xf] }
  0x5e   : > { %1669 = vmatpush.bf16.msra.mxu2 %v5013_v24  ;;  %v863_v1 = vunpack.c.l.b16 %v425_v57  ;;  %v864_v2 = vunpack.c.l.b16 %v435_v58  ;;  %v453_v17 = vor.u32 %v452_v8, %v448_v7  ;;  %v696_v21 = vrot.slane %v694_v15, 4  ;;  %v5905_v51 = vld [vmem:[%s5837_s6 + $0x18] sm:$0xff]  ;;  %v5030_v61 = vld [vmem:[#allocation6 + $0x120] sm:$0xff]  ;;  %s6974_s1 = scalar_lea.vmem [#allocation11], %s4254_s20  ;;  %s4978_s3 = sshll.u32 %s7206_s27, 5 }
  0x5f   : > { %1610 = vmatpush.bf16.msra.mxu1 %v5005_v25  ;;  %v697_v22 = vrot.slane %v378_v10, 5  ;;  %v444_v24 = vrot.slane %v443_v16, 4  ;;  %v461_v29 = vshrl.u32 %v379_v23, 16  ;;  %v464_v30 = vshll.u32 %v379_v23, 16  ;;  %v384_v16 = vld [vmem:[%s5837_s6 + $0x2c] sm:$0xf]  ;;  %s4115_s24 = sadd.s32 %s5156_s13, %s4978_s3 }
  0x60   : > { %1728 = vmatpush.bf16.msra.mxu3 %v5021_v26  ;;  %v883_v13 = vpack.c.b16 %v864_v2, %v863_v1  ;;  %v454_v25 = vrot.slane %v453_v17, 4  ;;  %v458_v26 = vrot.slane %v456_v18, 5  ;;  %v695_v31 = vsel %vm5856_vm4, %v4256_v20, %v694_v15  ;;  %v5926_v20 = vld [vmem:[%s5837_s6 + $0x24] sm:$0xff]  ;;  %s4118_s9 = sshll.u32 %s6974_s1, 4  ;;  %s4103_s14 = scalar_lea.sflag [#allocation5], %s366_s12  ;;  %s4119_s9 = int_to_ptr.vmem [resolvable:$true] %s4118_s9 }
  0x61   : > { %1552 = vmatpush.bf16.msra.mxu0 %v4996_v35  ;;  %v698_v32 = vsel %vm5856_vm4, %v696_v21, %v697_v22  ;;  %v474_v33 = vshrl.u32 %v380_v27, 16  ;;  %v470_v34 = vshll.u32 %v380_v27, 16  ;;  %v449_v35 = vsel %vm5865_vm5, %v444_v24, %v448_v7 }
  0x62   : > { %1670 = vmatpush.bf16.msra.mxu2 %v5012_v36  ;;  %v459_v36 = vsel %vm5865_vm5, %v454_v25, %v458_v26  ;;  %v906_v38 = vunpack.c.l.b16 %v698_v32  ;;  %v463_v39 = vrot.slane %v461_v29, 4  ;;  %v466_v40 = vrot.slane %v464_v30, 5 }
  0x63   : > { %1611 = vmatpush.bf16.msra.mxu1 %v5004_v37  ;;  %v905_v37 = vunpack.c.l.b16 %v695_v31  ;;  %v866_v43 = vunpack.c.l.b16 %v459_v36  ;;  %v476_v44 = vrot.slane %v474_v33, 4  ;;  %v472_v45 = vrot.slane %v470_v34, 5 }
  0x64   : > { %1729 = vmatpush.bf16.msra.mxu3 %v5020_v41  ;;  %v865_v41 = vunpack.c.l.b16 %v449_v35  ;;  %v480_v52 = vshll.u32 %v381_v46, 16  ;;  %v467_v53 = vor.u32 %v466_v40, %v463_v39  ;;  %v704_v58 = vrot.slane %v381_v46, 5 }
  0x65   : > { %1553 = vmatpush.bf16.msra.mxu0 %v4995_v49  ;;  %v5900_v48 = vpack.c.b16 %v906_v38, %v905_v37  ;;  %v701_v49 = vrot.slane %v380_v27, 5  ;;  %v477_v54 = vor.u32 %v476_v44, %v472_v45  ;;  %v488_v5 = vshll.u32 %v382_v62, 16  ;;  %v385_v27 = vld [vmem:[%s5837_s6 + $0x30] sm:$0xf] }
  0x66   : > { %1671 = vmatpush.bf16.msra.mxu2 %v5011_v50  ;;  %v5902_v50 = vpack.c.b16 %v866_v43, %v865_v41  ;;  %v482_v57 = vrot.slane %v480_v52, 5  ;;  %v468_v59 = vrot.slane %v467_v53, 4  ;;  %v504_v21 = vshll.u32 %v384_v16, 16  ;;  %v387_v53 = vld [vmem:[%s5837_s6 + $0x38] sm:$0xf] }
  0x67   : > { %1612 = vmatpush.bf16.msra.mxu1 %v5003_v55  ;;  %v4257_v55 = vrot.slane %v379_v23, 9  ;;  %v478_v60 = vrot.slane %v477_v54, 4  ;;  %v4258_v24 = vrot.slane %v382_v62, 9  ;;  %v711_v26 = vrot.slane %v384_v16, 5 }
  0x68   : > { %1730 = vmatpush.bf16.msra.mxu3 %v5019_v56  ;;  %v703_v56 = vrot.slane %v701_v49, 4  ;;  %v473_v2 = vsel %vm5865_vm5, %v468_v59, %v472_v45  ;;  %v506_v29 = vrot.slane %v504_v21, 5  ;;  %v509_v34 = vshrl.u32 %v385_v27, 16 }
  0x69   : > { %1554 = vmatpush.bf16.msra.mxu0 %v4994_v63  ;;  %v383_v63 = vld [vmem:[%s5837_s6 + $0x28] sm:$0xf]  ;;  %v867_v10 = vunpack.c.l.b16 %v473_v2  ;;  %v512_v35 = vshll.u32 %v385_v27, 16  ;;  %vm2366_vm0 = vsmask.f32 4368 }
  0x6a   : > { %1672 = vmatpush.bf16.msra.mxu2 %v5010_v0  ;;  %v702_v0 = vsel %vm5856_vm4, %v4257_v55, %v701_v49  ;;  %v705_v1 = vsel %vm5856_vm4, %v703_v56, %v704_v58  ;;  %v498_v6 = vshrl.u32 %v383_v63, 16  ;;  %v494_v7 = vshll.u32 %v383_v63, 16  ;;  %vm6411_vm1 = vmor %vm2365_vm15, %vm2366_vm0 }
  0x6b   : > { %1613 = vmatpush.bf16.msra.mxu1 %v5002_v3  ;;  %v483_v3 = vsel %vm5865_vm5, %v478_v60, %v482_v57  ;;  %v907_v8 = vunpack.c.l.b16 %v702_v0  ;;  %v708_v17 = vrot.slane %v383_v63, 5  ;;  %v511_v43 = vrot.slane %v509_v34, 4  ;;  %v5948_v60 = vld [vmem:[%s5837_s6 + $0x30] sm:$0xff] }
  0x6c   : > { %1731 = vmatpush.bf16.msra.mxu3 %v5018_v4  ;;  %1555 = vmatmul.bf16.vlgmr.msra.gmra.mxu0 %v4982_v11  ;;  %v485_v4 = vshrl.u32 %v382_v62, 16  ;;  %v868_v11 = vunpack.c.l.b16 %v483_v3  ;;  %v496_v15 = vrot.slane %v494_v7, 5  ;;  %v514_v44 = vrot.slane %v512_v35, 5  ;;  %v5029_v3 = vld [vmem:[#allocation6 + $0x118] sm:$0xff] }
  0x6d   : > { %1783 = vmatpush.bf16.msrb.mxu0 %v5033_v9  ;;  %1673 = vmatmul.bf16.vlgmr.msra.gmra.mxu2 %v923_v12  ;;  %v908_v9 = vunpack.c.l.b16 %v705_v1  ;;  %v710_v25 = vrot.slane %v708_v17, 4  ;;  %v709_v32 = vsel %vm5856_vm4, %v4258_v24, %v708_v17  ;;  %v528_v56 = vshll.u32 %v387_v53, 16 }
  0x6e   : > { %1614 = vmatmul.bf16.vlgmr.msra.gmra.mxu1 %v883_v13  ;;  %v487_v12 = vrot.slane %v485_v4, 4  ;;  %v490_v13 = vrot.slane %v488_v5, 5  ;;  %v909_v40 = vunpack.c.l.b16 %v709_v32  ;;  %v515_v57 = vor.u32 %v514_v44, %v511_v43  ;;  %v388_v4 = vld [vmem:[%s5837_s6 + $0x3c] sm:$0xf]  ;;  %v389_v5 = vld [vmem:[%s5837_s6 + $0x40] sm:$0xf] }
  0x6f   : > { %1732 = vmatmul.bf16.vlgmr.msra.gmra.mxu3 %v4983_v14  ;;  %v5921_v18 = vpack.c.b16 %v908_v9, %v907_v8  ;;  %v712_v33 = vsel %vm5856_vm4, %v710_v25, %v711_v26  ;;  %v530_v63 = vrot.slane %v528_v56, 5  ;;  %v718_v0 = vrot.slane %v387_v53, 5  ;;  %v390_v25 = vld [vmem:[%s5837_s6 + $0x44] sm:$0xf] }
  0x70   : > { %v491_v22 = vor.u32 %v490_v13, %v487_v12  ;;  %v910_v41 = vunpack.c.l.b16 %v712_v33  ;;  %v516_v1 = vrot.slane %v515_v57, 4  ;;  %v546_v12 = vshrl.u32 %v389_v5, 16 }
  0x71   : > { %1784 = vmatpush.bf16.msrb.mxu0 %v5032_v19  ;;  %v5923_v19 = vpack.c.b16 %v868_v11, %v867_v10  ;;  %v533_v10 = vshrl.u32 %v388_v4, 16  ;;  %v536_v11 = vshll.u32 %v388_v4, 16  ;;  %v542_v13 = vshll.u32 %v389_v5, 16 }
  0x72   : > { %v492_v30 = vrot.slane %v491_v22, 4  ;;  %v5943_v55 = vpack.c.b16 %v910_v41, %v909_v40  ;;  %v4260_v33 = vrot.slane %v388_v4, 9  ;;  %v391_v40 = vld [vmem:[%s5837_s6 + $0x48] sm:$0xf]  ;;  %v392_v41 = vld [vmem:[%s5837_s6 + $0x4c] sm:$0xf] }
  0x73   : > { %7165 = vst [vmem:[#allocation24_spill] sm:$0xff] %v5923_v19  ;;  %v535_v21 = vrot.slane %v533_v10, 4  ;;  %v538_v22 = vrot.slane %v536_v11, 5  ;;  %v544_v24 = vrot.slane %v542_v13, 5  ;;  %v570_v53 = vshrl.u32 %v392_v41, 16 }
  0x74   : > { %v497_v38 = vsel %vm5865_vm5, %v492_v30, %v496_v15  ;;  %v552_v30 = vshll.u32 %v390_v25, 16  ;;  %v4261_v10 = vrot.slane %v391_v40, 9  ;;  %v394_v13 = vld [vmem:[%s5837_s6 + $0x54] sm:$0xf] }
  0x75   : > { %1785 = vmatpush.bf16.msrb.mxu0 %v5031_v28  ;;  %v386_v28 = vld [vmem:[%s5837_s6 + $0x34] sm:$0xf]  ;;  %v869_v49 = vunpack.c.l.b16 %v497_v38 }
  0x76   : > { %v522_v36 = vshrl.u32 %v386_v28, 16  ;;  %v518_v37 = vshll.u32 %v386_v28, 16  ;;  %v715_v54 = vrot.slane %v386_v28, 5  ;;  %v554_v35 = vrot.slane %v552_v30, 5 }
  0x78   : > { %v524_v45 = vrot.slane %v522_v36, 4  ;;  %v520_v46 = vrot.slane %v518_v37, 5  ;;  %v717_v62 = vrot.slane %v715_v54, 4  ;;  %v725_v36 = vrot.slane %v390_v25, 5 }
  0x79   : > { %1786 = vmatpush.bf16.msrb.mxu0 %v5030_v61  ;;  %v4259_v61 = vrot.slane %v385_v27, 9  ;;  %v722_v27 = vrot.slane %v389_v5, 5  ;;  %v584_v25 = vshll.u32 %v394_v13, 16 }
  0x7a   : > { %v525_v58 = vor.u32 %v524_v45, %v520_v46  ;;  %v719_v7 = vsel %vm5856_vm4, %v717_v62, %v718_v0  ;;  %v521_v8 = vsel %vm5865_vm5, %v516_v1, %v520_v46  ;;  %v572_v0 = vrot.slane %v570_v53, 4  ;;  %v6014_v53 = vld [vmem:[%s5837_s6 + $0x54] sm:$0xff] }
  0x7b   : > { %v871_v16 = vunpack.c.l.b16 %v521_v8  ;;  %v724_v34 = vrot.slane %v722_v27, 4  ;;  %v723_v43 = vsel %vm5856_vm4, %v4260_v33, %v722_v27 }
  0x7c   : > { %1560 = vmatmul.bf16.gmra.mxu0 %v4983_v14  ;;  %v500_v14 = vrot.slane %v498_v6, 4  ;;  %v526_v2 = vrot.slane %v525_v58, 4  ;;  %v716_v6 = vsel %vm5856_vm4, %v4259_v61, %v715_v54  ;;  %v566_v54 = vshll.u32 %v392_v41, 16 }
  0x7d   : > { %1678 = vmatmul.bf16.gmra.mxu2 %v5900_v48  ;;  %1787 = vmatpush.bf16.msrb.mxu0 %v5029_v3  ;;  %v726_v44 = vsel %vm5856_vm4, %v724_v34, %v725_v36  ;;  %v913_v56 = vunpack.c.l.b16 %v723_v43  ;;  %v729_v3 = vrot.slane %v392_v41, 5  ;;  %v586_v36 = vrot.slane %v584_v25, 5  ;;  %v396_v41 = vld [vmem:[%s5837_s6 + $0x5c] sm:$0xf] }
  0x7e   : > { %1619 = vmatmul.bf16.gmra.mxu1 %v5902_v50  ;;  %v501_v23 = vor.u32 %v500_v14, %v496_v15  ;;  %v531_v9 = vsel %vm5865_vm5, %v526_v2, %v530_v63  ;;  %v911_v14 = vunpack.c.l.b16 %v716_v6  ;;  %v912_v15 = vunpack.c.l.b16 %v719_v7  ;;  %v393_v2 = vld [vmem:[%s5837_s6 + $0x50] sm:$0xf]  ;;  %v5992_v6 = vld [vmem:[%s5837_s6 + $0x48] sm:$0xff] }
  0x7f   : > { %1737 = vmatmul.bf16.gmra.mxu3 %v5905_v51  ;;  %v872_v17 = vunpack.c.l.b16 %v531_v9  ;;  %v914_v57 = vunpack.c.l.b16 %v726_v44  ;;  %v568_v1 = vrot.slane %v566_v54, 5  ;;  %v576_v7 = vshll.u32 %v393_v2, 16 }
  0x80   : > { %v502_v31 = vrot.slane %v501_v23, 4  ;;  %v548_v23 = vrot.slane %v546_v12, 4  ;;  %v5965_v26 = vpack.c.b16 %v912_v15, %v911_v14  ;;  %v731_v11 = vrot.slane %v729_v3, 4  ;;  %v395_v14 = vld [vmem:[%s5837_s6 + $0x58] sm:$0xf] }
  0x81   : > { %v5967_v28 = vpack.c.b16 %v872_v17, %v871_v16  ;;  %v5987_v4 = vpack.c.b16 %v914_v57, %v913_v56  ;;  %v573_v9 = vor.u32 %v572_v0, %v568_v1  ;;  %v732_v12 = vrot.slane %v393_v2, 5  ;;  %v5027_v15 = vld [vmem:[#allocation6 + $0x108] sm:$0xff]  ;;  %v5049_v57 = vld [vmem:[#allocation6 + $0x1b8] sm:$0xff]  ;;  %v6021_v2 = vld [vmem:[%s5837_s6 + $0x60] sm:$0xf] }
  0x82   : > { %v507_v39 = vsel %vm5865_vm5, %v502_v31, %v506_v29  ;;  %v5970_v29 = vld [vmem:[%s5837_s6 + $0x3c] sm:$0xff]  ;;  %v539_v31 = vor.u32 %v538_v22, %v535_v21  ;;  %v549_v32 = vor.u32 %v548_v23, %v544_v24  ;;  %v578_v16 = vrot.slane %v576_v7, 5  ;;  %1901 = vmatpush.bf16.msrb.mxu2 %v5049_v57 }
  0x83   : > { %v870_v52 = vunpack.c.l.b16 %v507_v39  ;;  %7167 = vst [vmem:[#allocation26_spill] sm:$0xff] %v5967_v28  ;;  %v5028_v39 = vld [vmem:[#allocation6 + $0x110] sm:$0xff]  ;;  %v574_v21 = vrot.slane %v573_v9, 4  ;;  %v730_v22 = vsel %vm5856_vm4, %v4261_v10, %v729_v3  ;;  %v733_v23 = vsel %vm5856_vm4, %v731_v11, %v732_v12  ;;  %v5041_v0 = vld [vmem:[#allocation6 + $0x178] sm:$0xff] }
  0x84   : > { %v540_v37 = vrot.slane %v539_v31, 4  ;;  %v550_v38 = vrot.slane %v549_v32, 4  ;;  %1788 = vmatpush.bf16.msrb.mxu0 %v5028_v39  ;;  %v594_v27 = vshrl.u32 %v395_v14, 16  ;;  %v590_v30 = vshll.u32 %v395_v14, 16  ;;  %v6024_v3 = vld [vmem:[%s5837_s6 + $0x64] sm:$0xf]  ;;  %1842 = vmatpush.bf16.msrb.mxu1 %v5041_v0 }
  0x85   : > { %v5945_v59 = vpack.c.b16 %v870_v52, %v869_v49  ;;  %v557_v49 = vshrl.u32 %v391_v40, 16  ;;  %v560_v52 = vshll.u32 %v391_v40, 16  ;;  %v579_v32 = vsel %vm5865_vm5, %v574_v21, %v578_v16  ;;  %v5048_v7 = vld [vmem:[#allocation6 + $0x1b0] sm:$0xff]  ;;  %v5047_v21 = vld [vmem:[#allocation6 + $0x1a8] sm:$0xff] }
  0x86   : > { %v545_v45 = vsel %vm5865_vm5, %v540_v37, %v544_v24  ;;  %v555_v46 = vsel %vm5865_vm5, %v550_v38, %v554_v35  ;;  %v581_v24 = vshrl.u32 %v394_v13, 16  ;;  %v915_v33 = vunpack.c.l.b16 %v730_v22  ;;  %v5040_v16 = vld [vmem:[#allocation6 + $0x170] sm:$0xff]  ;;  %1902 = vmatpush.bf16.msrb.mxu2 %v5048_v7  ;;  %v6053_v7 = vld [vmem:[%s5837_s6 + $0x6c] sm:$0xf] }
  0x87   : > { %7166 = vst [vmem:[#allocation25_spill] sm:$0xff] %v5945_v59  ;;  %v873_v58 = vunpack.c.l.b16 %v545_v45  ;;  %v874_v61 = vunpack.c.l.b16 %v555_v46  ;;  %v559_v62 = vrot.slane %v557_v49, 4  ;;  %v562_v63 = vrot.slane %v560_v52, 5 }
  0x88   : > { %1789 = vmatpush.bf16.msrb.mxu0 %v5027_v15  ;;  %v916_v34 = vunpack.c.l.b16 %v733_v23  ;;  %v583_v35 = vrot.slane %v581_v24, 4  ;;  %v596_v37 = vrot.slane %v594_v27, 4  ;;  %v592_v38 = vrot.slane %v590_v30, 5  ;;  %1843 = vmatpush.bf16.msrb.mxu1 %v5040_v16 }
  0x89   : > { %v5989_v5 = vpack.c.b16 %v874_v61, %v873_v58  ;;  %v563_v8 = vor.u32 %v562_v63, %v559_v62  ;;  %v876_v40 = vunpack.c.l.b16 %v579_v32  ;;  %v736_v43 = vrot.slane %v395_v14, 5 }
  0x8a   : > { %v6009_v44 = vpack.c.b16 %v916_v34, %v915_v33  ;;  %v600_v45 = vshll.u32 %v396_v41, 16  ;;  %v587_v46 = vor.u32 %v586_v36, %v583_v35  ;;  %v597_v49 = vor.u32 %v596_v37, %v592_v38  ;;  %v5039_v33 = vld [vmem:[#allocation6 + $0x168] sm:$0xff]  ;;  %1903 = vmatpush.bf16.msrb.mxu2 %v5047_v21  ;;  %v5046_v36 = vld [vmem:[#allocation6 + $0x1a0] sm:$0xff] }
  0x8b   : > { %7168 = vst [vmem:[#allocation27_spill] sm:$0xff] %v5989_v5  ;;  %v564_v17 = vrot.slane %v563_v8, 4  ;;  %v4262_v54 = vrot.slane %v394_v13, 9  ;;  %v738_v56 = vrot.slane %v736_v43, 4  ;;  %v739_v61 = vrot.slane %v396_v41, 5  ;;  %v5055_v34 = vld [vmem:[#allocation6 + $0x1e8] sm:$0xff] }
  0x8c   : > { %1565 = vmatmul.bf16.gmra.mxu0 %v5905_v51  ;;  %v602_v58 = vrot.slane %v600_v45, 5  ;;  %v588_v62 = vrot.slane %v587_v46, 4  ;;  %v598_v63 = vrot.slane %v597_v49, 4  ;;  %v605_v12 = vshrl.u32 %v6021_v2, 16  ;;  %v399_v35 = vld [vmem:[%s5837_s6 + $0x68] sm:$0xf]  ;;  %1844 = vmatpush.bf16.msrb.mxu1 %v5039_v33 }
  0x8d   : > { %1683 = vmatmul.bf16.gmra.mxu2 %v5921_v18  ;;  %v569_v31 = vsel %vm5865_vm5, %v564_v17, %v568_v1  ;;  %v5057_v1 = vld [vmem:[#allocation6 + $0x1f8] sm:$0xff]  ;;  %v737_v8 = vsel %vm5856_vm4, %v4262_v54, %v736_v43  ;;  %v740_v9 = vsel %vm5856_vm4, %v738_v56, %v739_v61  ;;  %v608_v13 = vshll.u32 %v6021_v2, 16  ;;  %v5056_v17 = vld [vmem:[#allocation6 + $0x1f0] sm:$0xff]  ;;  %v5038_v49 = vld [vmem:[#allocation6 + $0x160] sm:$0xff] }
  0x8e   : > { %1624 = vmatmul.bf16.gmra.mxu1 %v5923_v19  ;;  %v875_v39 = vunpack.c.l.b16 %v569_v31  ;;  %1960 = vmatpush.bf16.msrb.mxu3 %v5057_v1  ;;  %v593_v10 = vsel %vm5865_vm5, %v588_v62, %v592_v38  ;;  %v603_v11 = vsel %vm5865_vm5, %v598_v63, %v602_v58  ;;  %v618_v14 = vshrl.u32 %v6024_v3, 16  ;;  %v6045_v41 = vld [vmem:[%s5837_s6 + $0x60] sm:$0xff]  ;;  %v5045_v56 = vld [vmem:[#allocation6 + $0x198] sm:$0xff] }
  0x8f   : > { %1742 = vmatmul.bf16.gmra.mxu3 %v5926_v20  ;;  %v614_v15 = vshll.u32 %v6024_v3, 16  ;;  %v917_v22 = vunpack.c.l.b16 %v737_v8  ;;  %v918_v23 = vunpack.c.l.b16 %v740_v9  ;;  %v877_v24 = vunpack.c.l.b16 %v593_v10  ;;  %v5054_v54 = vld [vmem:[#allocation6 + $0x1e0] sm:$0xff]  ;;  %1904 = vmatpush.bf16.msrb.mxu2 %v5046_v36  ;;  %v5037_v1 = vld [vmem:[#allocation6 + $0x158] sm:$0xff]  ;;  %v5044_v9 = vld [vmem:[#allocation6 + $0x190] sm:$0xff] }
  0x90   : > { %v6011_v52 = vpack.c.b16 %v876_v40, %v875_v39  ;;  %v878_v25 = vunpack.c.l.b16 %v603_v11  ;;  %v607_v27 = vrot.slane %v605_v12, 4  ;;  %v610_v30 = vrot.slane %v608_v13, 5  ;;  %v5026_v39 = vld [vmem:[#allocation6 + $0x100] sm:$0xff]  ;;  %1845 = vmatpush.bf16.msrb.mxu1 %v5038_v49  ;;  %v5036_v13 = vld [vmem:[#allocation6 + $0x150] sm:$0xff] }
  0x91   : > { %v620_v31 = vrot.slane %v618_v14, 4  ;;  %v616_v32 = vrot.slane %v614_v15, 5  ;;  %v6039_v37 = vpack.c.b16 %v918_v23, %v917_v22  ;;  %v743_v38 = vrot.slane %v6024_v3, 5  ;;  %1790 = vmatpush.bf16.msrb.mxu0 %v5026_v39  ;;  %v5053_v3 = vld [vmem:[#allocation6 + $0x1d8] sm:$0xff]  ;;  %v6056_v8 = vld [vmem:[%s5837_s6 + $0x70] sm:$0xf] }
  0x92   : > { %7169 = vst [vmem:[#allocation28_spill] sm:$0xff] %v6011_v52  ;;  %1961 = vmatpush.bf16.msrb.mxu3 %v5056_v17  ;;  %v6042_v40 = vpack.c.b16 %v878_v25, %v877_v24  ;;  %v624_v43 = vshll.u32 %v399_v35, 16  ;;  %v611_v45 = vor.u32 %v610_v30, %v607_v27  ;;  %v4263_v57 = vrot.slane %v6021_v2, 9  ;;  %v5052_v14 = vld [vmem:[#allocation6 + $0x1d0] sm:$0xff]  ;;  %v5043_v22 = vld [vmem:[#allocation6 + $0x188] sm:$0xff]  ;;  %v5042_v39 = vld [vmem:[#allocation6 + $0x180] sm:$0xff] }
  0x93   : > { %v621_v46 = vor.u32 %v620_v31, %v616_v32  ;;  %v745_v58 = vrot.slane %v743_v38, 4  ;;  %v746_v62 = vrot.slane %v399_v35, 5  ;;  %1905 = vmatpush.bf16.msrb.mxu2 %v5045_v56  ;;  %v629_v15 = vshrl.u32 %v6053_v7, 16  ;;  %v5035_v30 = vld [vmem:[#allocation6 + $0x148] sm:$0xff]  ;;  %v5034_v56 = vld [vmem:[#allocation6 + $0x140] sm:$0xff] }
  0x94   : > { %7170 = vst [vmem:[#allocation29_spill] sm:$0xff] %v6042_v40  ;;  %v626_v61 = vrot.slane %v624_v43, 5  ;;  %v612_v63 = vrot.slane %v611_v45, 4  ;;  %1846 = vmatpush.bf16.msrb.mxu1 %v5037_v1  ;;  %v744_v2 = vsel %vm5856_vm4, %v4263_v57, %v743_v38  ;;  %v632_v16 = vshll.u32 %v6053_v7, 16  ;;  %v5051_v31 = vld [vmem:[#allocation6 + $0x1c8] sm:$0xff]  ;;  %v5050_v57 = vld [vmem:[#allocation6 + $0x1c0] sm:$0xff] }
  0x95   : > { %v622_v0 = vrot.slane %v621_v46, 4  ;;  %v747_v10 = vsel %vm5856_vm4, %v745_v58, %v746_v62  ;;  %v642_v17 = vshrl.u32 %v6056_v8, 16  ;;  %v638_v21 = vshll.u32 %v6056_v8, 16  ;;  %v402_v38 = vld [vmem:[%s5837_s6 + $0x74] sm:$0xf]  ;;  %v6081_v49 = vld [vmem:[%s5837_s6 + $0x6c] sm:$0xff] }
  0x96   : > { %1962 = vmatpush.bf16.msrb.mxu3 %v5055_v34  ;;  %v617_v11 = vsel %vm5865_vm5, %v612_v63, %v616_v32  ;;  %v919_v23 = vunpack.c.l.b16 %v744_v2  ;;  %v920_v24 = vunpack.c.l.b16 %v747_v10  ;;  %v6073_v32 = vld [vmem:[%s7108_s2] ss:$0 sm:$0xff]  ;;  %v631_v33 = vrot.slane %v629_v15, 4 }
  0x97   : > { %v627_v12 = vsel %vm5865_vm5, %v622_v0, %v626_v61  ;;  %1906 = vmatpush.bf16.msrb.mxu2 %v5044_v9  ;;  %v879_v25 = vunpack.c.l.b16 %v617_v11  ;;  %v634_v34 = vrot.slane %v632_v16, 5  ;;  %v644_v35 = vrot.slane %v642_v17, 4 }
  0x98   : > { %1847 = vmatpush.bf16.msrb.mxu1 %v5036_v13  ;;  %v880_v27 = vunpack.c.l.b16 %v627_v12  ;;  %v640_v36 = vrot.slane %v638_v21, 5  ;;  %v6076_v43 = vpack.c.b16 %v920_v24, %v919_v23  ;;  %v648_v62 = vshll.u32 %v402_v38, 16 }
  0x99   : > { %v635_v63 = vor.u32 %v634_v34, %v631_v33  ;;  %v753_v2 = vrot.slane %v402_v38, 5 }
  0x9a   : > { %1963 = vmatpush.bf16.msrb.mxu3 %v5054_v54  ;;  %v6078_v46 = vpack.c.b16 %v880_v27, %v879_v25  ;;  %v750_v54 = vrot.slane %v6056_v8, 5  ;;  %v645_v0 = vor.u32 %v644_v35, %v640_v36  ;;  %v4264_v8 = vrot.slane %v6053_v7, 9 }
  0x9b   : > { %1907 = vmatpush.bf16.msrb.mxu2 %v5043_v22  ;;  %v650_v10 = vrot.slane %v648_v62, 5  ;;  %v636_v11 = vrot.slane %v635_v63, 4 }
  0x9c   : > { %1570 = vmatmul.bf16.gmra.mxu0 %v5926_v20  ;;  %1848 = vmatpush.bf16.msrb.mxu1 %v5035_v30  ;;  %7171 = vst [vmem:[#allocation30_spill] sm:$0xff] %v6078_v46  ;;  %v752_v9 = vrot.slane %v750_v54, 4  ;;  %v646_v12 = vrot.slane %v645_v0, 4  ;;  %v751_v17 = vsel %vm5856_vm4, %v4264_v8, %v750_v54 }
  0x9d   : > { %1688 = vmatmul.bf16.gmra.mxu2 %v5943_v55  ;;  %v641_v24 = vsel %vm5865_vm5, %v636_v11, %v640_v36  ;;  %v921_v30 = vunpack.c.l.b16 %v751_v17 }
  0x9e   : > { %1629 = vmatmul.bf16.gmra.mxu1 %v5945_v59  ;;  %1964 = vmatpush.bf16.msrb.mxu3 %v5053_v3  ;;  %v5065_v3 = vld [vmem:[#allocation6 + $0x238] sm:$0xff]  ;;  %v754_v21 = vsel %vm5856_vm4, %v752_v9, %v753_v2  ;;  %v651_v25 = vsel %vm5865_vm5, %v646_v12, %v650_v10  ;;  %v881_v33 = vunpack.c.l.b16 %v641_v24 }
  0x9f   : > { %1747 = vmatmul.bf16.gmra.mxu3 %v5948_v60  ;;  %1908 = vmatpush.bf16.msrb.mxu2 %v5042_v39  ;;  %v882_v34 = vunpack.c.l.b16 %v651_v25 }
  0xa0   : > { %1849 = vmatpush.bf16.msrb.mxu1 %v5034_v56  ;;  %2019 = vmatpush.bf16.msra.mxu0 %v5065_v3  ;;  %v5064_v3 = vld [vmem:[#allocation6 + $0x230] sm:$0xff] }
  0xa1   : > { %v6103_v56 = vpack.c.b16 %v882_v34, %v881_v33 }
  0xa2   : > { %1965 = vmatpush.bf16.msrb.mxu3 %v5052_v14 }
  0xa3   : > { %7172 = vst [vmem:[#allocation31_spill] sm:$0xff] %v6103_v56 }
  0xa4   : > { %2020 = vmatpush.bf16.msra.mxu0 %v5064_v3 }
  0xa6   : > { %1966 = vmatpush.bf16.msrb.mxu3 %v5051_v31  ;;  %v922_v31 = vunpack.c.l.b16 %v754_v21 }
  0xaa   : > { %1967 = vmatpush.bf16.msrb.mxu3 %v5050_v57  ;;  %v6106_v57 = vld [vmem:[%s5837_s6 + $0x78] sm:$0xff] }
  0xac   : > { %1575 = vmatmul.bf16.gmra.mxu0 %v5948_v60 }
  0xad   : > { %1693 = vmatmul.bf16.gmra.mxu2 %v5965_v26 }
  0xae   : > { %1634 = vmatmul.bf16.gmra.mxu1 %v5967_v28 }
  0xaf   : > { %1752 = vmatmul.bf16.gmra.mxu3 %v5970_v29 }
  0xbc   : > { %1580 = vmatmul.bf16.gmra.mxu0 %v5970_v29 }
  0xbd   : > { %1698 = vmatmul.bf16.gmra.mxu2 %v5987_v4 }
  0xbe   : > { %1639 = vmatmul.bf16.gmra.mxu1 %v5989_v5 }
  0xbf   : > { %1757 = vmatmul.bf16.gmra.mxu3 %v5992_v6 }
  0xcc   : > { %1585 = vmatmul.bf16.gmra.mxu0 %v5992_v6 }
  0xcd   : > { %1703 = vmatmul.bf16.gmra.mxu2 %v6009_v44 }
  0xce   : > { %1644 = vmatmul.bf16.gmra.mxu1 %v6011_v52 }
  0xcf   : > { %1762 = vmatmul.bf16.gmra.mxu3 %v6014_v53 }
  0xdc   : > { %1590 = vmatmul.bf16.gmra.mxu0 %v6014_v53 }
  0xdd   : > { %1708 = vmatmul.bf16.gmra.mxu2 %v6039_v37 }
  0xde   : > { %1649 = vmatmul.bf16.gmra.mxu1 %v6042_v40 }
  0xdf   : > { %1767 = vmatmul.bf16.gmra.mxu3 %v6045_v41 }
  0xe9   : > { %v1556_v45 = vpop.f32.mrf.mxu0 }
  0xea   : > { %v1557_v58 = vadd.f32 %v6073_v32, %v1556_v45  ;;  %v6101_v45 = vpack.c.b16 %v922_v31, %v921_v30 }
  0xeb   : > { %v1615_v61 = vpop.f32.mrf.mxu1 }
  0xec   : > { %v1616_v1 = vadd.f32 %v1615_v61, %v1557_v58  ;;  %1595 = vmatmul.bf16.gmra.mxu0 %v6045_v41 }
  0xed   : > { %1713 = vmatmul.bf16.gmra.mxu2 %v6076_v43 }
  0xee   : > { %1654 = vmatmul.bf16.gmra.mxu1 %v6078_v46 }
  0xef   : > { %1772 = vmatmul.bf16.gmra.mxu3 %v6081_v49 }
  0xf0   : > { %v1674_v13 = vpop.f32.mrf.mxu2 }
  0xf1   : > { %v1675_v14 = vadd.f32 %v1674_v13, %v1616_v1  ;;  %v1558_v16 = vpop.f32.mrf.mxu0 }
  0xf2   : > { %v1733_v15 = vpop.f32.mrf.mxu3  ;;  %v1559_v22 = vadd.f32 %v6073_v32, %v1558_v16 }
  0xf3   : > { %v6095_v7 = vadd.f32 %v1733_v15, %v1675_v14  ;;  %v1617_v23 = vpop.f32.mrf.mxu1 }
  0xf4   : > { %v1618_v27 = vadd.f32 %v1617_v23, %v1559_v22 }
  0xf8   : > { %v1676_v35 = vpop.f32.mrf.mxu2 }
  0xf9   : > { %v1677_v38 = vadd.f32 %v1676_v35, %v1618_v27  ;;  %v1561_v54 = vpop.f32.mrf.mxu0  ;;  %v5063_v35 = vld [vmem:[#allocation6 + $0x228] sm:$0xff] }
  0xfa   : > { %v1735_v39 = vpop.f32.mrf.mxu3  ;;  %v1562_v36 = vadd.f32 %v6073_v32, %v1561_v54  ;;  %2021 = vmatpush.bf16.msra.mxu0 %v5063_v35 }
  0xfb   : > { %v6109_v58 = vadd.f32 %v1735_v39, %v1677_v38  ;;  %v1620_v61 = vpop.f32.mrf.mxu1 }
  0xfc   : > { %v1621_v62 = vadd.f32 %v1620_v61, %v1562_v36  ;;  %1600 = vmatmul.bf16.gmra.mxu0 %v6081_v49 }
  0xfd   : > { %1718 = vmatmul.bf16.gmra.mxu2 %v6101_v45 }
  0xfe   : > { %1659 = vmatmul.bf16.gmra.mxu1 %v6103_v56 }
  0xff   : > { %1777 = vmatmul.bf16.gmra.mxu3 %v6106_v57 }
 0x100   : > { %v1679_v63 = vpop.f32.mrf.mxu2 }
 0x101   : > { %v1680_v0 = vadd.f32 %v1679_v63, %v1621_v62  ;;  %v1563_v8 = vpop.f32.mrf.mxu0 }
 0x102   : > { %v1738_v1 = vpop.f32.mrf.mxu3  ;;  %v1564_v9 = vadd.f32 %v6073_v32, %v1563_v8 }
 0x103   : > { %v6116_v2 = vadd.f32 %v1738_v1, %v1680_v0  ;;  %v1622_v10 = vpop.f32.mrf.mxu1 }
 0x104   : > { %v1623_v11 = vadd.f32 %v1622_v10, %v1564_v9 }
 0x108   : > { %v1681_v12 = vpop.f32.mrf.mxu2 }
 0x109   : > { %v1682_v13 = vadd.f32 %v1681_v12, %v1623_v11  ;;  %v1566_v15 = vpop.f32.mrf.mxu0 }
 0x10a   : > { %v1740_v14 = vpop.f32.mrf.mxu3  ;;  %v1567_v16 = vadd.f32 %v6073_v32, %v1566_v15 }
 0x10b   : > { %v6119_v17 = vadd.f32 %v1740_v14, %v1682_v13  ;;  %v1625_v21 = vpop.f32.mrf.mxu1  ;;  %v5062_v14 = vld [vmem:[#allocation6 + $0x220] sm:$0xff] }
 0x10c   : > { %v1626_v22 = vadd.f32 %v1625_v21, %v1567_v16  ;;  %1791 = vmatmul.bf16.vlgmr.msrb.gmra.mxu0 %v5902_v50 }
 0x10d   : > { %1909 = vmatmul.bf16.vlgmr.msrb.gmra.mxu2 %v5905_v51  ;;  %2022 = vmatpush.bf16.msra.mxu0 %v5062_v14 }
 0x10e   : > { %1850 = vmatmul.bf16.vlgmr.msrb.gmra.mxu1 %v5900_v48 }
 0x10f   : > { %1968 = vmatmul.bf16.vlgmr.msrb.gmra.mxu3 %v5923_v19 }
 0x110   : > { %v1684_v23 = vpop.f32.mrf.mxu2 }
 0x111   : > { %v1685_v24 = vadd.f32 %v1684_v23, %v1626_v22  ;;  %v1568_v27 = vpop.f32.mrf.mxu0 }
 0x112   : > { %v1743_v25 = vpop.f32.mrf.mxu3  ;;  %v1569_v30 = vadd.f32 %v6073_v32, %v1568_v27 }
 0x113   : > { %v6126_v31 = vadd.f32 %v1743_v25, %v1685_v24  ;;  %v1627_v33 = vpop.f32.mrf.mxu1 }
 0x114   : > { %v1628_v34 = vadd.f32 %v1627_v33, %v1569_v30 }
 0x118   : > { %v1686_v38 = vpop.f32.mrf.mxu2 }
 0x119   : > { %v1687_v50 = vadd.f32 %v1686_v38, %v1628_v34  ;;  %v1571_v51 = vpop.f32.mrf.mxu0 }
 0x11a   : > { %v1745_v39 = vpop.f32.mrf.mxu3  ;;  %v1572_v48 = vadd.f32 %v6073_v32, %v1571_v51 }
 0x11b   : > { %v6129_v54 = vadd.f32 %v1745_v39, %v1687_v50  ;;  %v1630_v36 = vpop.f32.mrf.mxu1 }
 0x11c   : > { %v1631_v61 = vadd.f32 %v1630_v36, %v1572_v48  ;;  %1796 = vmatmul.bf16.gmra.mxu0 %v5923_v19 }
 0x11d   : > { %1914 = vmatmul.bf16.gmra.mxu2 %v5926_v20 }
 0x11e   : > { %1855 = vmatmul.bf16.gmra.mxu1 %v5921_v18 }
 0x11f   : > { %1973 = vmatmul.bf16.gmra.mxu3 %v5945_v59 }
 0x120   : > { %v1689_v62 = vpop.f32.mrf.mxu2 }
 0x121   : > { %v1690_v63 = vadd.f32 %v1689_v62, %v1631_v61  ;;  %v1573_v1 = vpop.f32.mrf.mxu0  ;;  %v5061_v62 = vld [vmem:[#allocation6 + $0x218] sm:$0xff] }
 0x122   : > { %v1748_v0 = vpop.f32.mrf.mxu3  ;;  %v1574_v3 = vadd.f32 %v6073_v32, %v1573_v1  ;;  %2023 = vmatpush.bf16.msra.mxu0 %v5061_v62 }
 0x123   : > { %v6136_v8 = vadd.f32 %v1748_v0, %v1690_v63  ;;  %v1632_v9 = vpop.f32.mrf.mxu1 }
 0x124   : > { %v1633_v10 = vadd.f32 %v1632_v9, %v1574_v3 }
 0x128   : > { %v1691_v11 = vpop.f32.mrf.mxu2 }
 0x129   : > { %v1692_v12 = vadd.f32 %v1691_v11, %v1633_v10  ;;  %v1576_v15 = vpop.f32.mrf.mxu0 }
 0x12a   : > { %v1750_v13 = vpop.f32.mrf.mxu3  ;;  %v1577_v20 = vadd.f32 %v6073_v32, %v1576_v15 }
 0x12b   : > { %v6139_v16 = vadd.f32 %v1750_v13, %v1692_v12  ;;  %v1635_v21 = vpop.f32.mrf.mxu1 }
 0x12c   : > { %v1636_v22 = vadd.f32 %v1635_v21, %v1577_v20  ;;  %1801 = vmatmul.bf16.gmra.mxu0 %v5945_v59 }
 0x12d   : > { %1919 = vmatmul.bf16.gmra.mxu2 %v5948_v60 }
 0x12e   : > { %1860 = vmatmul.bf16.gmra.mxu1 %v5943_v55 }
 0x12f   : > { %1978 = vmatmul.bf16.gmra.mxu3 %v5967_v28 }
 0x130   : > { %v1694_v23 = vpop.f32.mrf.mxu2 }
 0x131   : > { %v1695_v24 = vadd.f32 %v1694_v23, %v1636_v22  ;;  %v1578_v27 = vpop.f32.mrf.mxu0 }
 0x132   : > { %v1753_v25 = vpop.f32.mrf.mxu3  ;;  %v1579_v30 = vadd.f32 %v6073_v32, %v1578_v27 }
 0x133   : > { %v6146_v33 = vadd.f32 %v1753_v25, %v1695_v24  ;;  %v1637_v34 = vpop.f32.mrf.mxu1 }
 0x134   : > { %v1638_v35 = vadd.f32 %v1637_v34, %v1579_v30  ;;  %v5060_v30 = vld [vmem:[#allocation6 + $0x210] sm:$0xff] }
 0x135   : > { %2024 = vmatpush.bf16.msra.mxu0 %v5060_v30 }
 0x138   : > { %v1696_v38 = vpop.f32.mrf.mxu2 }
 0x139   : > { %v1697_v50 = vadd.f32 %v1696_v38, %v1638_v35  ;;  %v1581_v51 = vpop.f32.mrf.mxu0 }
 0x13a   : > { %v1755_v39 = vpop.f32.mrf.mxu3  ;;  %v1582_v60 = vadd.f32 %v6073_v32, %v1581_v51 }
 0x13b   : > { %v6149_v48 = vadd.f32 %v1755_v39, %v1697_v50  ;;  %v1640_v36 = vpop.f32.mrf.mxu1 }
 0x13c   : > { %v1641_v61 = vadd.f32 %v1640_v36, %v1582_v60  ;;  %1806 = vmatmul.bf16.gmra.mxu0 %v5967_v28 }
 0x13d   : > { %1924 = vmatmul.bf16.gmra.mxu2 %v5970_v29 }
 0x13e   : > { %1865 = vmatmul.bf16.gmra.mxu1 %v5965_v26 }
 0x13f   : > { %1983 = vmatmul.bf16.gmra.mxu3 %v5989_v5 }
 0x140   : > { %v1699_v63 = vpop.f32.mrf.mxu2 }
 0x141   : > { %v1700_v0 = vadd.f32 %v1699_v63, %v1641_v61  ;;  %v1583_v3 = vpop.f32.mrf.mxu0 }
 0x142   : > { %v1758_v1 = vpop.f32.mrf.mxu3  ;;  %v1584_v9 = vadd.f32 %v6073_v32, %v1583_v3 }
 0x143   : > { %v6156_v10 = vadd.f32 %v1758_v1, %v1700_v0  ;;  %v1642_v11 = vpop.f32.mrf.mxu1 }
 0x144   : > { %v1643_v12 = vadd.f32 %v1642_v11, %v1584_v9 }
 0x148   : > { %v1701_v13 = vpop.f32.mrf.mxu2 }
 0x149   : > { %v1702_v14 = vadd.f32 %v1701_v13, %v1643_v12  ;;  %v1586_v29 = vpop.f32.mrf.mxu0 }
 0x14a   : > { %v1760_v15 = vpop.f32.mrf.mxu3  ;;  %v1587_v20 = vadd.f32 %v6073_v32, %v1586_v29  ;;  %v5059_v29 = vld [vmem:[#allocation6 + $0x208] sm:$0xff] }
 0x14b   : > { %v6159_v21 = vadd.f32 %v1760_v15, %v1702_v14  ;;  %v1645_v22 = vpop.f32.mrf.mxu1  ;;  %2025 = vmatpush.bf16.msra.mxu0 %v5059_v29  ;;  %v5058_v29 = vld [vmem:[#allocation6 + $0x200] sm:$0xff] }
 0x14c   : > { %v1646_v23 = vadd.f32 %v1645_v22, %v1587_v20  ;;  %1811 = vmatmul.bf16.gmra.mxu0 %v5989_v5 }
 0x14d   : > { %1929 = vmatmul.bf16.gmra.mxu2 %v5992_v6 }
 0x14e   : > { %1870 = vmatmul.bf16.gmra.mxu1 %v5987_v4 }
 0x14f   : > { %1988 = vmatmul.bf16.gmra.mxu3 %v6011_v52  ;;  %2026 = vmatpush.bf16.msra.mxu0 %v5058_v29 }
 0x150   : > { %v1704_v24 = vpop.f32.mrf.mxu2 }
 0x151   : > { %v1705_v25 = vadd.f32 %v1704_v24, %v1646_v23  ;;  %v1588_v34 = vpop.f32.mrf.mxu0 }
 0x152   : > { %v1763_v27 = vpop.f32.mrf.mxu3  ;;  %v1589_v35 = vadd.f32 %v6073_v32, %v1588_v34  ;;  %v6186_v34 = vld [vmem:[%s5837_s6 + $0x78] sm:$0xf] }
 0x153   : > { %v6166_v38 = vadd.f32 %v1763_v27, %v1705_v25  ;;  %v1647_v50 = vpop.f32.mrf.mxu1 }
 0x154   : > { %v1648_v39 = vadd.f32 %v1647_v50, %v1589_v35  ;;  %v6189_v35 = vld [vmem:[%s5837_s6 + $0x7c] sm:$0xf] }
 0x158   : > { %v1706_v51 = vpop.f32.mrf.mxu2 }
 0x159   : > { %v1707_v60 = vadd.f32 %v1706_v51, %v1648_v39  ;;  %v1591_v6 = vpop.f32.mrf.mxu0 }
 0x15a   : > { %v1765_v36 = vpop.f32.mrf.mxu3  ;;  %v1592_v61 = vadd.f32 %v6073_v32, %v1591_v6  ;;  %v759_v6 = vshll.u32 %v6186_v34, 16 }
 0x15b   : > { %v6169_v62 = vadd.f32 %v1765_v36, %v1707_v60  ;;  %v1650_v63 = vpop.f32.mrf.mxu1  ;;  %v756_v36 = vshrl.u32 %v6186_v34, 16 }
 0x15c   : > { %v1651_v0 = vadd.f32 %v1650_v63, %v1592_v61  ;;  %1816 = vmatmul.bf16.gmra.mxu0 %v6011_v52  ;;  %v769_v61 = vshrl.u32 %v6189_v35, 16 }
 0x15d   : > { %1934 = vmatmul.bf16.gmra.mxu2 %v6014_v53 }
 0x15e   : > { %1875 = vmatmul.bf16.gmra.mxu1 %v6009_v44 }
 0x15f   : > { %1993 = vmatmul.bf16.gmra.mxu3 %v6042_v40 }
 0x160   : > { %v1709_v1 = vpop.f32.mrf.mxu2 }
 0x161   : > { %v1710_v3 = vadd.f32 %v1709_v1, %v1651_v0  ;;  %v1593_v11 = vpop.f32.mrf.mxu0  ;;  %v758_v1 = vrot.slane %v756_v36, 4  ;;  %v6212_v36 = vld [vmem:[%s5837_s6 + $0x84] sm:$0xf] }
 0x162   : > { %v1768_v9 = vpop.f32.mrf.mxu3  ;;  %v1594_v12 = vadd.f32 %v6073_v32, %v1593_v11  ;;  %v771_v11 = vrot.slane %v769_v61, 4 }
 0x163   : > { %v6176_v13 = vadd.f32 %v1768_v9, %v1710_v3  ;;  %v1652_v14 = vpop.f32.mrf.mxu1  ;;  %v761_v3 = vrot.slane %v759_v6, 5 }
 0x164   : > { %v1653_v15 = vadd.f32 %v1652_v14, %v1594_v12  ;;  %v405_v12 = vld [vmem:[%s5837_s6 + $0x80] sm:$0xf] }
 0x168   : > { %v1711_v20 = vpop.f32.mrf.mxu2 }
 0x169   : > { %v1712_v53 = vadd.f32 %v1711_v20, %v1653_v15  ;;  %v1596_v23 = vpop.f32.mrf.mxu0 }
 0x16a   : > { %v1770_v22 = vpop.f32.mrf.mxu3  ;;  %v1597_v24 = vadd.f32 %v6073_v32, %v1596_v23  ;;  %v775_v23 = vshll.u32 %v405_v12, 16 }
 0x16b   : > { %v6179_v25 = vadd.f32 %v1770_v22, %v1712_v53  ;;  %v1655_v27 = vpop.f32.mrf.mxu1  ;;  %v762_v53 = vor.u32 %v761_v3, %v758_v1 }
 0x16c   : > { %v1656_v30 = vadd.f32 %v1655_v27, %v1597_v24  ;;  %1821 = vmatmul.bf16.gmra.mxu0 %v6042_v40 }
 0x16d   : > { %1939 = vmatmul.bf16.gmra.mxu2 %v6045_v41  ;;  %v765_v41 = vshll.u32 %v6189_v35, 16 }
 0x16e   : > { %1880 = vmatmul.bf16.gmra.mxu1 %v6039_v37 }
 0x16f   : > { %1998 = vmatmul.bf16.gmra.mxu3 %v6078_v46  ;;  %v767_v9 = vrot.slane %v765_v41, 5  ;;  %v6215_v41 = vld [vmem:[%s5837_s6 + $0x88] sm:$0xf] }
 0x170   : > { %v1714_v50 = vpop.f32.mrf.mxu2 }
 0x171   : > { %v1715_v39 = vadd.f32 %v1714_v50, %v1656_v30  ;;  %v6191_v60 = vpop.f32.mrf.mxu0  ;;  %v772_v22 = vor.u32 %v771_v11, %v767_v9  ;;  %v763_v50 = vrot.slane %v762_v53, 4  ;;  %v790_v11 = vshrl.u32 %v6212_v36, 16 }
 0x172   : > { %v1773_v51 = vpop.f32.mrf.mxu3  ;;  %v799_v53 = vshll.u32 %v6215_v41, 16 }
 0x173   : > { %v6197_v63 = vadd.f32 %v1773_v51, %v1715_v39  ;;  %v6199_v0 = vpop.f32.mrf.mxu1  ;;  %v773_v39 = vrot.slane %v772_v22, 4  ;;  %v777_v51 = vrot.slane %v775_v23, 5  ;;  %v803_v22 = vshrl.u32 %v6215_v41, 16 }
 0x175   : > { %v778_v3 = vsel %vm5865_vm5, %v773_v39, %v777_v51  ;;  %v784_v51 = vrot.slane %v6189_v35, 5 }
 0x178   : > { %v6202_v14 = vpop.f32.mrf.mxu2 }
 0x179   : > { %v1601_v20 = vpop.f32.mrf.mxu0 }
 0x17a   : > { %v6204_v15 = vpop.f32.mrf.mxu3  ;;  %v1602_v24 = vadd.f32 %v6073_v32, %v1601_v20  ;;  %v793_v20 = vshll.u32 %v6212_v36, 16 }
 0x17b   : > { %v1660_v27 = vpop.f32.mrf.mxu1 }
 0x17c   : > { %v1661_v30 = vadd.f32 %v1660_v27, %v1602_v24  ;;  %1826 = vmatmul.bf16.gmra.mxu0 %v6078_v46  ;;  %v948_v24 = vunpack.c.l.b16 %v778_v3  ;;  %v792_v27 = vrot.slane %v790_v11, 4  ;;  %v805_v46 = vrot.slane %v803_v22, 4  ;;  %v5099_v22 = vld [vmem:[#allocation8 + $0xb8] sm:$0xff] }
 0x17d   : > { %1944 = vmatmul.bf16.gmra.mxu2 %v6081_v49  ;;  %v768_v49 = vsel %vm5865_vm5, %v763_v50, %v767_v9  ;;  %v6230_v9 = vld [vmem:[%s5837_s6 + $0x8c] sm:$0xf]  ;;  %v786_v3 = vrot.slane %v784_v51, 4  ;;  %v787_v11 = vrot.slane %v405_v12, 5  ;;  %3546 = vmatpush.bf16.msra.mxu3 %v5099_v22 }
 0x17e   : > { %1885 = vmatmul.bf16.gmra.mxu1 %v6076_v43  ;;  %v947_v23 = vunpack.c.l.b16 %v768_v49  ;;  %v809_v52 = vshll.u32 %v6230_v9, 16  ;;  %v4265_v49 = vrot.slane %v6186_v34, 9 }
 0x17f   : > { %2003 = vmatmul.bf16.gmra.mxu3 %v6103_v56 }
 0x180   : > { %v1719_v6 = vpop.f32.mrf.mxu2  ;;  %v949_v39 = vpack.c.b16 %v948_v24, %v947_v23  ;;  %v785_v23 = vsel %vm5856_vm4, %v4265_v49, %v784_v51  ;;  %v4993_v51 = vld [vmem:[%s5837_s6 + $0x84] sm:$0xff]  ;;  %s4979_s6 = sshll.u32 %s4115_s24, 2 }
 0x181   : > { %v1720_v32 = vadd.f32 %v1719_v6, %v1661_v30  ;;  %v6217_v1 = vpop.f32.mrf.mxu0  ;;  %v795_v30 = vrot.slane %v793_v20, 5  ;;  %v801_v6 = vrot.slane %v799_v53, 5  ;;  %v811_v53 = vrot.slane %v809_v52, 5  ;;  %v5083_v52 = vld [vmem:[#allocation8 + $0x38] sm:$0xff]  ;;  %s4117_s25 = scalar_lea.hbm %s7207_s5, %s4979_s6 }
 0x182   : > { %v1778_v61 = vpop.f32.mrf.mxu3  ;;  %v951_v12 = vunpack.c.l.b16 %v785_v23  ;;  %3448 = vmatpush.bf16.msra.mxu1 %v5083_v52  ;;  %v5097_v23 = vld [vmem:[#allocation8 + $0xa8] sm:$0xff]  ;;  %v5088_v52 = vld [vmem:[#allocation8 + $0x60] sm:$0xff]  ;;  %s4120_s11 = sshll.u32 %s4117_s25, 4  ;;  %s4121_s11 = int_to_ptr.hbm [resolvable:$true] %s4120_s11 }
 0x183   : > { %v6224_v29 = vadd.f32 %v1778_v61, %v1720_v32  ;;  %v796_v61 = vor.u32 %v795_v30, %v792_v27  ;;  %v806_v40 = vor.u32 %v805_v46, %v801_v6  ;;  %s5512_s15 = sshra.s32 %s4121_s11, 4  ;;  %s5513_s15 = int_to_ptr.hbm [resolvable:$true] %s5512_s15 }
 0x184   : > { %p5519_p0 = scmp.lt.s32.totalorder %s5513_s15, %s7207_s5 }
 0x185   : > { %v797_v20 = vrot.slane %v796_v61, 4  ;;  %v807_v35 = vrot.slane %v806_v40, 4 }
 0x187   : > { %v802_v34 = vsel %vm5865_vm5, %v797_v20, %v801_v6  ;;  %v812_v40 = vsel %vm5865_vm5, %v807_v35, %v811_v53  ;;  %v5090_v20 = vld [vmem:[#allocation8 + $0x70] sm:$0xff] }
 0x188   : > { %v959_v30 = vunpack.c.l.b16 %v802_v34  ;;  %v5098_v35 = vld [vmem:[#allocation8 + $0xb0] sm:$0xff]  ;;  %v5081_v34 = vld [vmem:[#allocation8 + $0x28] sm:$0xff] }
 0x189   : > { %v1792_v50 = vpop.f32.mrf.mxu0  ;;  %3547 = vmatpush.bf16.msra.mxu3 %v5098_v35  ;;  %v5082_v53 = vld [vmem:[#allocation8 + $0x30] sm:$0xff] }
 0x18a   : > { %v6234_v32 = vadd.f32 %v1792_v50, %v6095_v7  ;;  %v5091_v7 = vld [vmem:[#allocation8 + $0x78] sm:$0xff]  ;;  %v960_v50 = vunpack.c.l.b16 %v812_v40  ;;  %3449 = vmatpush.bf16.msra.mxu1 %v5082_v53  ;;  %v5086_v53 = vld [vmem:[#allocation8 + $0x50] sm:$0xff] }
 0x18b   : > { %3497 = vmatpush.bf16.msra.mxu2 %v5091_v7 }
 0x18c   : > { %1831 = vmatmul.bf16.gmra.mxu0 %v6103_v56 }
 0x18d   : > { %1949 = vmatmul.bf16.gmra.mxu2 %v6106_v57  ;;  %v788_v57 = vsel %vm5856_vm4, %v786_v3, %v787_v11  ;;  %3548 = vmatpush.bf16.msra.mxu3 %v5097_v23 }
 0x18e   : > { %1890 = vmatmul.bf16.gmra.mxu1 %v6101_v45  ;;  %v952_v27 = vunpack.c.l.b16 %v788_v57 }
 0x18f   : > { %2008 = vmatmul.bf16.gmra.mxu3 %v949_v39  ;;  %3498 = vmatpush.bf16.msra.mxu2 %v5090_v20 }
 0x190   : > { %v6253_v49 = vpack.c.b16 %v952_v27, %v951_v12  ;;  %3450 = vmatpush.bf16.msra.mxu1 %v5081_v34  ;;  %v5096_v12 = vld [vmem:[#allocation8 + $0xa0] sm:$0xff] }
 0x191   : > { %v1794_v46 = vpop.f32.mrf.mxu0  ;;  %3549 = vmatpush.bf16.msra.mxu3 %v5096_v12  ;;  %v5085_v12 = vld [vmem:[#allocation8 + $0x48] sm:$0xff] }
 0x192   : > { %v6246_v24 = vadd.f32 %v1794_v46, %v6109_v58  ;;  %v961_v58 = vpack.c.b16 %v960_v50, %v959_v30  ;;  %v5089_v46 = vld [vmem:[#allocation8 + $0x68] sm:$0xff]  ;;  %v5095_v50 = vld [vmem:[#allocation8 + $0x98] sm:$0xff] }
 0x193   : > { %3499 = vmatpush.bf16.msra.mxu2 %v5089_v46 }
 0x195   : > { %3550 = vmatpush.bf16.msra.mxu3 %v5095_v50  ;;  %v5077_v50 = vld [vmem:[#allocation8 + $0x8] sm:$0xff] }
 0x197   : > { %3500 = vmatpush.bf16.msra.mxu2 %v5088_v52 }
 0x199   : > { %v1797_v61 = vpop.f32.mrf.mxu0 }
 0x19a   : > { %v6256_v3 = vadd.f32 %v1797_v61, %v6116_v2  ;;  %v5079_v61 = vld [vmem:[#allocation8 + $0x18] sm:$0xff] }
 0x19c   : > { %1836 = vmatmul.bf16.gmra.mxu0 %v949_v39 }
 0x19d   : > { %1954 = vmatmul.bf16.gmra.mxu2 %v4993_v51 }
 0x19e   : > { %1895 = vmatmul.bf16.gmra.mxu1 %v6253_v49 }
 0x19f   : > { %2013 = vmatmul.bf16.gmra.mxu3 %v961_v58 }
 0x1a1   : > { %v1799_v6 = vpop.f32.mrf.mxu0 }
 0x1a2   : > { %v6260_v11 = vadd.f32 %v1799_v6, %v6119_v17 }
 0x1a9   : > { %v1802_v7 = vpop.f32.mrf.mxu0 }
 0x1aa   : > { %v6263_v22 = vadd.f32 %v1802_v7, %v6126_v31  ;;  %v5094_v7 = vld [vmem:[#allocation8 + $0x90] sm:$0xff] }
 0x1ab   : > { %3551 = vmatpush.bf16.msra.mxu3 %v5094_v7 }
 0x1ac   : > { %2027 = vmatmul.bf16.vlgmr.msra.gmra.mxu0 %v5921_v18 }
 0x1b1   : > { %v1804_v2 = vpop.f32.mrf.mxu0 }
 0x1b2   : > { %v6267_v39 = vadd.f32 %v1804_v2, %v6129_v54  ;;  %v5078_v2 = vld [vmem:[#allocation8 + $0x10] sm:$0xff] }
 0x1b9   : > { %v1807_v17 = vpop.f32.mrf.mxu0 }
 0x1ba   : > { %v6270_v57 = vadd.f32 %v1807_v17, %v6136_v8  ;;  %v5080_v8 = vld [vmem:[#allocation8 + $0x20] sm:$0xff] }
 0x1bb   : > { %3451 = vmatpush.bf16.msra.mxu1 %v5080_v8  ;;  %v5093_v8 = vld [vmem:[#allocation8 + $0x88] sm:$0xff] }
 0x1bc   : > { %2032 = vmatmul.bf16.gmra.mxu0 %v5943_v55  ;;  %3552 = vmatpush.bf16.msra.mxu3 %v5093_v8 }
 0x1bf   : > { %3452 = vmatpush.bf16.msra.mxu1 %v5079_v61 }
 0x1c1   : > { %v1809_v31 = vpop.f32.mrf.mxu0 }
 0x1c2   : > { %v6274_v40 = vadd.f32 %v1809_v31, %v6139_v16 }
 0x1c3   : > { %3453 = vmatpush.bf16.msra.mxu1 %v5078_v2 }
 0x1c7   : > { %3454 = vmatpush.bf16.msra.mxu1 %v5077_v50 }
 0x1c9   : > { %v1812_v18 = vpop.f32.mrf.mxu0 }
 0x1ca   : > { %v6277_v54 = vadd.f32 %v1812_v18, %v6146_v33  ;;  %v5087_v33 = vld [vmem:[#allocation8 + $0x58] sm:$0xff] }
 0x1cb   : > { %3501 = vmatpush.bf16.msra.mxu2 %v5087_v33 }
 0x1cc   : > { %2037 = vmatmul.bf16.gmra.mxu0 %v5965_v26 }
 0x1cf   : > { %3502 = vmatpush.bf16.msra.mxu2 %v5086_v53  ;;  %v5084_v53 = vld [vmem:[#allocation8 + $0x40] sm:$0xff] }
 0x1d1   : > { %v1814_v27 = vpop.f32.mrf.mxu0 }
 0x1d2   : > { %v6281_v55 = vadd.f32 %v1814_v27, %v6149_v48  ;;  %v6290_v48 = vpop.f32.mrf.mxu1 }
 0x1d3   : > { %3503 = vmatpush.bf16.msra.mxu2 %v5085_v12 }
 0x1d7   : > { %3504 = vmatpush.bf16.msra.mxu2 %v5084_v53 }
 0x1d9   : > { %v1817_v30 = vpop.f32.mrf.mxu0 }
 0x1da   : > { %v6284_v16 = vadd.f32 %v1817_v30, %v6156_v10  ;;  %v6296_v10 = vpop.f32.mrf.mxu2  ;;  %v1851_v35 = vpop.f32.mrf.mxu1 }
 0x1dc   : > { %2042 = vmatmul.bf16.gmra.mxu0 %v5987_v4 }
 0x1e1   : > { %v1819_v51 = vpop.f32.mrf.mxu0 }
 0x1e2   : > { %v6288_v26 = vadd.f32 %v1819_v51, %v6159_v21  ;;  %v6301_v21 = vpop.f32.mrf.mxu3  ;;  %v1910_v23 = vpop.f32.mrf.mxu2  ;;  %v5635_v51 = vmov 0  }
 0x1e3   : > { %v6307_v17 = vpop.f32.mrf.mxu1  ;;  %2265 = vst [vmem:[#allocation2] sm:$0xf] %v5635_v51 }
 0x1e4   : > { %2266 = vst [vmem:[#allocation2 + $0x10] sm:$0xf] %v5635_v51  ;;  %v1854_v50 = vadd.f32 %v6307_v17, %v6246_v24 }
 0x1e5   : > { %2267 = vst [vmem:[#allocation2 + $0x20] sm:$0xf] %v5635_v51 }
 0x1e6   : > { %2268 = vst [vmem:[#allocation2 + $0x30] sm:$0xf] %v5635_v51 }
 0x1e7   : > { %2269 = vst [vmem:[#allocation2 + $0x40] sm:$0xf] %v5635_v51 }
 0x1e8   : > { %2270 = vst [vmem:[#allocation2 + $0x50] sm:$0xf] %v5635_v51 }
 0x1e9   : > { %v1822_v58 = vpop.f32.mrf.mxu0  ;;  %2271 = vst [vmem:[#allocation2 + $0x60] sm:$0xf] %v5635_v51 }
 0x1ea   : > { %v6293_v6 = vadd.f32 %v1822_v58, %v6166_v38  ;;  %v6312_v31 = vpop.f32.mrf.mxu2  ;;  %2272 = vst [vmem:[#allocation2 + $0x70] sm:$0xf] %v5635_v51 }
 0x1eb   : > { %v6316_v52 = vpop.f32.mrf.mxu1  ;;  %2273 = vst [vmem:[#allocation2 + $0x80] sm:$0xf] %v5635_v51  ;;  %v1913_v53 = vadd.f32 %v6312_v31, %v1854_v50 }
 0x1ec   : > { %2047 = vmatmul.bf16.gmra.mxu0 %v6009_v44  ;;  %v1969_v44 = vpop.f32.mrf.mxu3  ;;  %2274 = vst [vmem:[#allocation2 + $0x90] sm:$0xf] %v5635_v51 }
 0x1ed   : > { %2275 = vst [vmem:[#allocation2 + $0xc] sm:$0xf] %v5635_v51 }
 0x1ee   : > { %2276 = vst [vmem:[#allocation2 + $0x1c] sm:$0xf] %v5635_v51 }
 0x1ef   : > { %2277 = vst [vmem:[#allocation2 + $0x2c] sm:$0xf] %v5635_v51 }
 0x1f0   : > { %2278 = vst [vmem:[#allocation2 + $0x3c] sm:$0xf] %v5635_v51 }
 0x1f1   : > { %v1824_v4 = vpop.f32.mrf.mxu0  ;;  %2279 = vst [vmem:[#allocation2 + $0x4c] sm:$0xf] %v5635_v51 }
 0x1f2   : > { %v6299_v20 = vadd.f32 %v1824_v4, %v6169_v62  ;;  %2280 = vst [vmem:[#allocation2 + $0x5c] sm:$0xf] %v5635_v51 }
 0x1f3   : > { %v6328_v33 = vpop.f32.mrf.mxu1  ;;  %2281 = vst [vmem:[#allocation2 + $0x6c] sm:$0xf] %v5635_v51 }
 0x1f4   : > { %v6314_v18 = vpop.f32.mrf.mxu3  ;;  %2282 = vst [vmem:[#allocation2 + $0x7c] sm:$0xf] %v5635_v51 }
 0x1f5   : > { %2283 = vst [vmem:[#allocation2 + $0x8c] sm:$0xf] %v5635_v51  ;;  %v1972_v31 = vadd.f32 %v6314_v18, %v1913_v53  ;;  %v5123_v18 = vld [vmem:[#allocation8 + $0x178] sm:$0xff] }
 0x1f6   : > { %2284 = vst [vmem:[#allocation2 + $0x9c] sm:$0xf] %v5635_v51  ;;  %v5131_v51 = vld [vmem:[#allocation8 + $0x1b8] sm:$0xff] }
 0x1f7   : > { %3742 = vmatpush.bf16.msrb.mxu0 %v5131_v51  ;;  %v5115_v51 = vld [vmem:[#allocation8 + $0x138] sm:$0xff] }
 0x1f8   : > { %3644 = vmatpush.bf16.msrb.mxu2 %v5115_v51  ;;  %v5107_v51 = vld [vmem:[#allocation8 + $0xf8] sm:$0xff] }
 0x1f9   : > { %v1827_v46 = vpop.f32.mrf.mxu0 }
 0x1fa   : > { %v6304_v38 = vadd.f32 %v1827_v46, %v6176_v13  ;;  %v5092_v46 = vld [vmem:[#allocation8 + $0x80] sm:$0xff] }
 0x1fb   : > { %v6337_v4 = vpop.f32.mrf.mxu1  ;;  %3553 = vmatpush.bf16.msra.mxu3 %v5092_v46 }
 0x1fc   : > { %2052 = vmatmul.bf16.gmra.mxu0 %v6039_v37  ;;  %v6322_v37 = vpop.f32.mrf.mxu2  ;;  %v6326_v30 = vpop.f32.mrf.mxu3 }
 0x1ff   : > { %3693 = vmatpush.bf16.msrb.mxu3 %v5123_v18 }
 0x201   : > { %v1829_v62 = vpop.f32.mrf.mxu0 }
 0x202   : > { %v6310_v34 = vadd.f32 %v1829_v62, %v6179_v25  ;;  %v5076_v62 = vld [vmem:[#allocation8] sm:$0xff] }
 0x203   : > { %3455 = vmatpush.bf16.msra.mxu1 %v5076_v62  ;;  %v6348_v8 = vpop.f32.mrf.mxu1  ;;  %v4266_v62 = vrot.slane %v6212_v36, 9 }
 0x204   : > { %v6335_v58 = vpop.f32.mrf.mxu3 }
 0x207   : > { %3595 = vmatpush.bf16.msrb.mxu1 %v5107_v51 }
 0x209   : > { %v1832_v13 = vpop.f32.mrf.mxu0 }
 0x20a   : > { %v6319_v27 = vadd.f32 %v1832_v13, %v6197_v63  ;;  %v6330_v63 = vpop.f32.mrf.mxu2  ;;  %v6350_v13 = vstv %s4604_s8 }
 0x20b   : > { %vm2153_vm6 = vcmp.ge.s32.totalorder %v6350_v13, 0  ;;  %vm2163_vm7 = vcmp.lt.s32.totalorder %v6350_v13, 16 }
 0x20c   : > { %2057 = vmatmul.bf16.gmra.mxu0 %v6076_v43  ;;  %v6346_v12 = vpop.f32.mrf.mxu3  ;;  %vm6360_vm9 = vmand %vm2153_vm6, %vm2163_vm7 }
 0x211   : > { %v6324_v25 = vpop.f32.mrf.mxu0 }
 0x212   : > { %v6344_v2 = vpop.f32.mrf.mxu2 }
 0x219   : > { %v1837_v43 = vpop.f32.mrf.mxu0 }
 0x21a   : > { %v6333_v61 = vadd.f32 %v1837_v43, %v6224_v29  ;;  %v1852_v29 = vadd.f32 %v1851_v35, %v6234_v32 }
 0x21c   : > { %2062 = vmatmul.bf16.gmra.mxu0 %v6101_v45  ;;  %v1911_v45 = vadd.f32 %v1910_v23, %v1852_v29  ;;  %v818_v23 = vrot.slane %v6215_v41, 5  ;;  %v6358_v29 = vpop.f32.mrf.mxu2 }
 0x21e   : > { %v1970_v32 = vadd.f32 %v1969_v44, %v1911_v45  ;;  %v820_v41 = vrot.slane %v818_v23, 4  ;;  %v821_v45 = vrot.slane %v6230_v9, 5  ;;  %v819_v36 = vsel %vm5856_vm4, %v4266_v62, %v818_v23 }
 0x220   : > { %v822_v9 = vsel %vm5856_vm4, %v820_v41, %v821_v45 }
 0x221   : > { %v6341_v7 = vpop.f32.mrf.mxu0  ;;  %v964_v5 = vunpack.c.l.b16 %v822_v9 }
 0x224   : > { %v6382_v23 = vpop.f32.mrf.mxu2 }
 0x229   : > { %v2028_v35 = vpop.f32.mrf.mxu0 }
 0x22a   : > { %v2029_v43 = vadd.f32 %v2028_v35, %v1970_v32  ;;  %v6370_v32 = vpop.f32.mrf.mxu3  ;;  %v6372_v35 = vpop.f32.mrf.mxu1 }
 0x22c   : > { %vm2078_vm8 = vcmp.gt.f32.partialorder %v2029_v43, 0.0  ;;  %v2098_v46 = vmul.f32 0.01, %v2029_v43  ;;  %2067 = vmatmul.bf16.gmra.mxu0 %v6253_v49  ;;  %v1857_v49 = vadd.f32 %v6316_v52, %v6256_v3  ;;  %v2141_v3 = vadd.s32 1, %v6350_v13  ;;  %v5129_v52 = vld [vmem:[#allocation8 + $0x1a8] sm:$0xff] }
 0x22e   : > { %v2118_v24 = vsel %vm2078_vm8, %v2029_v43, %v2098_v46  ;;  %v5130_v43 = vld [vmem:[#allocation8 + $0x1b0] sm:$0xff]  ;;  %v1916_v53 = vadd.f32 %v6322_v37, %v1857_v49  ;;  %vm2154_vm11 = vcmp.ge.s32.totalorder %v2141_v3, 0  ;;  %vm2164_vm12 = vcmp.lt.s32.totalorder %v2141_v3, 16 }
 0x22f   : > { %v2245_v17 = vsel %vm6360_vm9, %v2118_v24, 0.0  ;;  %3743 = vmatpush.bf16.msrb.mxu0 %v5130_v43  ;;  %v1859_v49 = vadd.f32 %v6328_v33, %v6260_v11  ;;  %v2325_v43 = vld [vmem:[#allocation2] sm:$0xf]  ;;  %vm6396_vm14 = vmand %vm2154_vm11, %vm2164_vm12  ;;  %v5127_v33 = vld [vmem:[#allocation8 + $0x198] sm:$0xff] }
 0x230   : > { %v2285_v50 = vpack.c.bf16 %v2245_v17, %v2245_v17  ;;  %v963_v17 = vunpack.c.l.b16 %v819_v36  ;;  %v1975_v62 = vadd.f32 %v6326_v30, %v1916_v53  ;;  %v2369_v11 = vshrl.u32 %v2325_v43, 16  ;;  %v5124_v53 = vld [vmem:[#allocation8 + $0x180] sm:$0xff] }
 0x231   : > { %v2030_v56 = vpop.f32.mrf.mxu0 }
 0x232   : > { %2305 = vst [vmem:[#allocation2 + $0x4] sm:$0xf] %v2285_v50  ;;  %v2031_v46 = vadd.f32 %v2030_v56, %v1972_v31  ;;  %v965_v41 = vpack.c.b16 %v964_v5, %v963_v17  ;;  %v5128_v50 = vld [vmem:[#allocation8 + $0x1a0] sm:$0xff]  ;;  %v6389_v36 = vpop.f32.mrf.mxu3  ;;  %v6391_v9 = vpop.f32.mrf.mxu1  ;;  %v1918_v5 = vadd.f32 %v6330_v63, %v1859_v49 }
 0x233   : > { %3744 = vmatpush.bf16.msrb.mxu0 %v5129_v52  ;;  %v1862_v52 = vadd.f32 %v6337_v4, %v6263_v22  ;;  %v4605_v22 = vrot.slane %v2369_v11, 11  ;;  %v5126_v4 = vld [vmem:[#allocation8 + $0x190] sm:$0xff] }
 0x234   : > { %vm2079_vm10 = vcmp.gt.f32.partialorder %v2031_v46, 0.0  ;;  %v2099_v24 = vmul.f32 0.01, %v2031_v46  ;;  %v1977_v3 = vadd.f32 %v6335_v58, %v1918_v5  ;;  %v5122_v58 = vld [vmem:[#allocation8 + $0x170] sm:$0xff]  ;;  %v2142_v5 = vadd.s32 2, %v6350_v13 }
 0x235   : > { %3694 = vmatpush.bf16.msrb.mxu3 %v5122_v58 }
 0x236   : > { %v2119_v42 = vsel %vm2079_vm10, %v2031_v46, %v2099_v24  ;;  %vm2155_vm3 = vcmp.ge.s32.totalorder %v2142_v5, 0  ;;  %vm2165_vm4 = vcmp.lt.s32.totalorder %v2142_v5, 16 }
 0x237   : > { %v2246_v56 = vsel %vm6360_vm9, %v2119_v42, 0.0  ;;  %3745 = vmatpush.bf16.msrb.mxu0 %v5128_v50  ;;  %vm6437_vm7 = vmand %vm2155_vm3, %vm2165_vm4 }
 0x238   : > { %v2286_v37 = vpack.c.bf16 %v2246_v56, %v2246_v56 }
 0x239   : > { %v2033_v45 = vpop.f32.mrf.mxu0  ;;  %v2326_v31 = vld [vmem:[#allocation2 + $0x4] sm:$0xf] }
 0x23a   : > { %2306 = vst [vmem:[#allocation2 + $0x8] sm:$0xf] %v2286_v37  ;;  %v2034_v44 = vadd.f32 %v2033_v45, %v1975_v62  ;;  %v2374_v46 = vshrl.u32 %v2326_v31, 16  ;;  %v2377_v30 = vshll.u32 %v2326_v31, 16  ;;  %v6405_v62 = vpop.f32.mrf.mxu2  ;;  %v1921_v45 = vadd.f32 %v6344_v2, %v1862_v52  ;;  %v6415_v11 = vpop.f32.mrf.mxu3 }
 0x23b   : > { %3746 = vmatpush.bf16.msrb.mxu0 %v5127_v33  ;;  %v6417_v52 = vpop.f32.mrf.mxu1 }
 0x23c   : > { %vm2080_vm13 = vcmp.gt.f32.partialorder %v2034_v44, 0.0  ;;  %v2100_v18 = vmul.f32 0.01, %v2034_v44  ;;  %2072 = vmatmul.bf16.gmra.mxu0 %v965_v41  ;;  %v2376_v17 = vrot.slane %v2374_v46, 7  ;;  %v2544_v42 = vrot.slane %v2374_v46, 4 }
 0x23d   : > { %v2545_v56 = vrot.slane %v2377_v30, 5  ;;  %v2328_v41 = vld [vmem:[#allocation2 + $0xc] sm:$0xf] }
 0x23e   : > { %v2120_v24 = vsel %vm2080_vm13, %v2034_v44, %v2100_v18  ;;  %v2379_v43 = vor.u32 %v2377_v30, %v2376_v17  ;;  %v5114_v18 = vld [vmem:[#allocation8 + $0x130] sm:$0xff] }
 0x23f   : > { %v2247_v63 = vsel %vm6396_vm14, %v2120_v24, 0.0  ;;  %v2546_v2 = vor.u32 %v2545_v56, %v2544_v42  ;;  %v2554_v24 = vshll.u32 %v2328_v41, 16  ;;  %3747 = vmatpush.bf16.msrb.mxu0 %v5126_v4  ;;  %3645 = vmatpush.bf16.msrb.mxu2 %v5114_v18  ;;  %v2381_v41 = vrot.slane %v2376_v17, 4 }
 0x240   : > { %v2287_v37 = vpack.c.bf16 %v2247_v63, %v2247_v63  ;;  %v2380_v56 = vsel %vm6411_vm1, %v4605_v22, %v2379_v43 }
 0x241   : > { %v2035_v31 = vpop.f32.mrf.mxu0  ;;  %v5066_v50 = vld [vmem:[#allocation2 + $0x4] sm:$0xff]  ;;  %v2547_v59 = vrot.slane %v2546_v2, 4  ;;  %v2556_v18 = vrot.slane %v2554_v24, 5  ;;  %v5106_v2 = vld [vmem:[#allocation8 + $0xf0] sm:$0xff] }
 0x242   : > { %v2327_v49 = vld [vmem:[#allocation2 + $0x8] sm:$0xf]  ;;  %2307 = vst [vmem:[#allocation2 + $0x14] sm:$0xf] %v2287_v37  ;;  %v2036_v44 = vadd.f32 %v2035_v31, %v1977_v3  ;;  %3505 = vmatmul.bf16.vlgmr.msra.gmra.mxu2 %v5066_v50  ;;  %v1980_v37 = vadd.f32 %v6346_v12, %v1921_v45  ;;  %v1864_v31 = vadd.f32 %v6348_v8, %v6267_v39  ;;  %v2728_v8 = vunpack.c.l.b16 %v2380_v56  ;;  %v6430_v43 = vpop.f32.mrf.mxu2 }
 0x243   : > { %v2383_v46 = vshrl.u32 %v2327_v49, 16  ;;  %v2386_v51 = vshll.u32 %v2327_v49, 16  ;;  %v5125_v49 = vld [vmem:[#allocation8 + $0x188] sm:$0xff]  ;;  %3596 = vmatpush.bf16.msrb.mxu1 %v5106_v2 }
 0x244   : > { %vm2081_vm2 = vcmp.gt.f32.partialorder %v2036_v44, 0.0  ;;  %v2101_v30 = vmul.f32 0.01, %v2036_v44  ;;  %3748 = vmatpush.bf16.msrb.mxu0 %v5125_v49  ;;  %v1923_v24 = vadd.f32 %v6358_v29, %v1864_v31  ;;  %v6441_v29 = vpop.f32.mrf.mxu3  ;;  %v6443_v31 = vpop.f32.mrf.mxu1  ;;  %v5113_v2 = vld [vmem:[#allocation8 + $0x128] sm:$0xff] }
 0x245   : > { %v2385_v63 = vrot.slane %v2383_v46, 7  ;;  %v2548_v3 = vrot.slane %v2386_v51, 5  ;;  %v2550_v50 = vrot.slane %v2383_v46, 4  ;;  %3646 = vmatpush.bf16.msrb.mxu2 %v5113_v2 }
 0x246   : > { %v2121_v42 = vsel %vm2081_vm2, %v2036_v44, %v2101_v30 }
 0x247   : > { %v2388_v4 = vor.u32 %v2386_v51, %v2385_v63  ;;  %v2248_v28 = vsel %vm6396_vm14, %v2121_v42, 0.0  ;;  %v2551_v19 = vor.u32 %v2550_v50, %v2548_v3  ;;  %v2549_v17 = vsel %vm5865_vm5, %v2547_v59, %v2548_v3  ;;  %v2329_v51 = vld [vmem:[#allocation2 + $0x10] sm:$0xf] }
 0x248   : > { %v2288_v58 = vpack.c.bf16 %v2248_v28, %v2248_v28  ;;  %3749 = vmatpush.bf16.msrb.mxu0 %v5124_v53  ;;  %v2808_v3 = vunpack.c.l.b16 %v2549_v17  ;;  %v2391_v49 = vshrl.u32 %v2329_v51, 16 }
 0x249   : > { %v2389_v39 = vsel %vm6411_vm1, %v2381_v41, %v2388_v4  ;;  %v2038_v12 = vpop.f32.mrf.mxu0  ;;  %v2552_v22 = vrot.slane %v2551_v19, 4  ;;  %v2330_v44 = vld [vmem:[#allocation2 + $0x14] sm:$0xf]  ;;  %v1867_v4 = vadd.f32 %v6372_v35, %v6270_v57 }
 0x24a   : > { %v2729_v45 = vunpack.c.l.b16 %v2389_v39  ;;  %2308 = vst [vmem:[#allocation2 + $0x18] sm:$0xf] %v2288_v58  ;;  %v2039_v46 = vadd.f32 %v2038_v12, %v1980_v37  ;;  %v2396_v28 = vshrl.u32 %v2330_v44, 16  ;;  %v2399_v50 = vshll.u32 %v2330_v44, 16 }
 0x24b   : > { %v2557_v63 = vsel %vm5865_vm5, %v2552_v22, %v2556_v18  ;;  %v1982_v39 = vadd.f32 %v6370_v32, %v1923_v24  ;;  %v4606_v53 = vrot.slane %v2391_v49, 11 }
 0x24c   : > { %v2744_v30 = vpack.c.b16 %v2729_v45, %v2728_v8  ;;  %vm2082_vm6 = vcmp.gt.f32.partialorder %v2039_v46, 0.0  ;;  %v2102_v59 = vmul.f32 0.01, %v2039_v46  ;;  %v2809_v37 = vunpack.c.l.b16 %v2557_v63  ;;  %v2332_v8 = vld [vmem:[#allocation2 + $0x1c] sm:$0xf]  ;;  %v6452_v63 = vpop.f32.mrf.mxu2 }
 0x24d   : > { %v2398_v41 = vrot.slane %v2396_v28, 7  ;;  %v2558_v18 = vrot.slane %v2396_v28, 4  ;;  %v2559_v58 = vrot.slane %v2399_v50, 5  ;;  %v1926_v45 = vadd.f32 %v6382_v23, %v1867_v4 }
 0x24e   : > { %3456 = vmatmul.bf16.vlgmr.msra.gmra.mxu1 %v2744_v30  ;;  %v2122_v42 = vsel %vm2082_vm6, %v2039_v46, %v2102_v59  ;;  %v2824_v56 = vpack.c.b16 %v2809_v37, %v2808_v3  ;;  %v5121_v30 = vld [vmem:[#allocation8 + $0x168] sm:$0xff]  ;;  %v2143_v28 = vadd.s32 3, %v6350_v13  ;;  %v2568_v24 = vshll.u32 %v2332_v8, 16  ;;  %v6461_v8 = vpop.f32.mrf.mxu3 }
 0x24f   : > { %v2249_v5 = vsel %vm6437_vm7, %v2122_v42, 0.0  ;;  %v2401_v51 = vor.u32 %v2399_v50, %v2398_v41  ;;  %v2560_v32 = vor.u32 %v2559_v58, %v2558_v18  ;;  %3695 = vmatpush.bf16.msrb.mxu3 %v5121_v30  ;;  %v1985_v37 = vadd.f32 %v6389_v36, %v1926_v45 }
 0x250   : > { %v2289_v12 = vpack.c.bf16 %v2249_v5, %v2249_v5  ;;  %3554 = vmatmul.bf16.vlgmr.msra.gmra.mxu3 %v2824_v56  ;;  %v1869_v50 = vadd.f32 %v6391_v9, %v6274_v40  ;;  %v2403_v4 = vrot.slane %v2398_v41, 4  ;;  %vm2156_vm9 = vcmp.ge.s32.totalorder %v2143_v28, 0 }
 0x251   : > { %v2040_v17 = vpop.f32.mrf.mxu0  ;;  %v5067_v22 = vld [vmem:[#allocation2 + $0x14] sm:$0xff]  ;;  %v2402_v56 = vsel %vm6411_vm1, %v4606_v53, %v2401_v51  ;;  %v2561_v58 = vrot.slane %v2560_v32, 4  ;;  %vm2166_vm10 = vcmp.lt.s32.totalorder %v2143_v28, 16 }
 0x252   : > { %v2331_v44 = vld [vmem:[#allocation2 + $0x18] sm:$0xf]  ;;  %2309 = vst [vmem:[#allocation2 + $0x24] sm:$0xf] %v2289_v12  ;;  %v2041_v46 = vadd.f32 %v2040_v17, %v1982_v39  ;;  %3510 = vmatmul.bf16.gmra.mxu2 %v5067_v22  ;;  %v2570_v12 = vrot.slane %v2568_v24, 5  ;;  %v6463_v17 = vpop.f32.mrf.mxu1  ;;  %v2730_v45 = vunpack.c.l.b16 %v2402_v56  ;;  %vm6476_vm12 = vmand %vm2156_vm9, %vm2166_vm10  ;;  %v1872_v56 = vadd.f32 %v6417_v52, %v6277_v54 }
 0x253   : > { %v2405_v57 = vshrl.u32 %v2331_v44, 16  ;;  %v2408_v35 = vshll.u32 %v2331_v44, 16 }
 0x254   : > { %vm2083_vm8 = vcmp.gt.f32.partialorder %v2041_v46, 0.0  ;;  %v2103_v23 = vmul.f32 0.01, %v2041_v46 }
 0x255   : > { %v2407_v59 = vrot.slane %v2405_v57, 7  ;;  %v2562_v3 = vrot.slane %v2408_v35, 5  ;;  %v2564_v49 = vrot.slane %v2405_v57, 4  ;;  %v5105_v57 = vld [vmem:[#allocation8 + $0xe8] sm:$0xff] }
 0x256   : > { %v2123_v42 = vsel %vm2083_vm8, %v2041_v46, %v2103_v23  ;;  %v2333_v46 = vld [vmem:[#allocation2 + $0x20] sm:$0xf]  ;;  %3597 = vmatpush.bf16.msrb.mxu1 %v5105_v57 }
 0x257   : > { %v2410_v5 = vor.u32 %v2408_v35, %v2407_v59  ;;  %v2250_v18 = vsel %vm6437_vm7, %v2123_v42, 0.0  ;;  %v2565_v39 = vor.u32 %v2564_v49, %v2562_v3  ;;  %v2563_v19 = vsel %vm5865_vm5, %v2561_v58, %v2562_v3 }
 0x258   : > { %v2290_v36 = vpack.c.bf16 %v2250_v18, %v2250_v18  ;;  %v1928_v35 = vadd.f32 %v6405_v62, %v1869_v50  ;;  %v2810_v59 = vunpack.c.l.b16 %v2563_v19  ;;  %v2413_v62 = vshrl.u32 %v2333_v46, 16 }
 0x259   : > { %v2411_v40 = vsel %vm6411_vm1, %v2403_v4, %v2410_v5  ;;  %v2043_v9 = vpop.f32.mrf.mxu0  ;;  %v2566_v22 = vrot.slane %v2565_v39, 4  ;;  %v2334_v44 = vld [vmem:[#allocation2 + $0x24] sm:$0xf]  ;;  %v2336_v39 = vld [vmem:[#allocation2 + $0x2c] sm:$0xf]  ;;  %v2144_v46 = vadd.s32 4, %v6350_v13 }
 0x25a   : > { %v2731_v41 = vunpack.c.l.b16 %v2411_v40  ;;  %2310 = vst [vmem:[#allocation2 + $0x28] sm:$0xf] %v2290_v36  ;;  %v2044_v53 = vadd.f32 %v2043_v9, %v1985_v37  ;;  %v2418_v51 = vshrl.u32 %v2334_v44, 16  ;;  %v2421_v32 = vshll.u32 %v2334_v44, 16  ;;  %v6481_v37 = vpop.f32.mrf.mxu2  ;;  %v6494_v54 = vpop.f32.mrf.mxu1 }
 0x25b   : > { %v2571_v30 = vsel %vm5865_vm5, %v2566_v22, %v2570_v12  ;;  %v1987_v18 = vadd.f32 %v6415_v11, %v1928_v35  ;;  %v1931_v12 = vadd.f32 %v6430_v43, %v1872_v56  ;;  %v5112_v11 = vld [vmem:[#allocation8 + $0x120] sm:$0xff]  ;;  %v2582_v43 = vshll.u32 %v2336_v39, 16 }
 0x25c   : > { %v6470_v2 = vpack.c.b16 %v2731_v41, %v2730_v45  ;;  %vm2084_vm11 = vcmp.gt.f32.partialorder %v2044_v53, 0.0  ;;  %v2104_v24 = vmul.f32 0.01, %v2044_v53  ;;  %v2811_v3 = vunpack.c.l.b16 %v2571_v30  ;;  %v6492_v41 = vpop.f32.mrf.mxu3  ;;  %3647 = vmatpush.bf16.msrb.mxu2 %v5112_v11 }
 0x25d   : > { %v2420_v42 = vrot.slane %v2418_v51, 7  ;;  %v2572_v4 = vrot.slane %v2418_v51, 4  ;;  %v2573_v5 = vrot.slane %v2421_v32, 5  ;;  %v4607_v45 = vrot.slane %v2413_v62, 11 }
 0x25e   : > { %3461 = vmatmul.bf16.gmra.mxu1 %v6470_v2  ;;  %v2124_v50 = vsel %vm2084_vm11, %v2044_v53, %v2104_v24  ;;  %v6483_v49 = vpack.c.b16 %v2811_v3, %v2810_v59  ;;  %v5120_v53 = vld [vmem:[#allocation8 + $0x160] sm:$0xff]  ;;  %v1990_v24 = vadd.f32 %v6441_v29, %v1931_v12  ;;  %vm2157_vm14 = vcmp.ge.s32.totalorder %v2144_v46, 0 }
 0x25f   : > { %v2251_v28 = vsel %vm6476_vm12, %v2124_v50, 0.0  ;;  %v2423_v19 = vor.u32 %v2421_v32, %v2420_v42  ;;  %v2574_v51 = vor.u32 %v2573_v5, %v2572_v4  ;;  %3696 = vmatpush.bf16.msrb.mxu3 %v5120_v53  ;;  %v1874_v32 = vadd.f32 %v6443_v31, %v6281_v55 }
 0x260   : > { %v2291_v58 = vpack.c.bf16 %v2251_v28, %v2251_v28  ;;  %3559 = vmatmul.bf16.gmra.mxu3 %v6483_v49  ;;  %v2425_v50 = vrot.slane %v2420_v42, 4  ;;  %vm2167_vm15 = vcmp.lt.s32.totalorder %v2144_v46, 16 }
 0x261   : > { %v2045_v36 = vpop.f32.mrf.mxu0  ;;  %v5068_v40 = vld [vmem:[#allocation2 + $0x24] sm:$0xff]  ;;  %v2424_v62 = vsel %vm6411_vm1, %v4607_v45, %v2423_v19  ;;  %v2575_v4 = vrot.slane %v2574_v51, 4  ;;  %v1933_v19 = vadd.f32 %v6452_v63, %v1874_v32  ;;  %vm6521_vm2 = vmand %vm2157_vm14, %vm2167_vm15 }
 0x262   : > { %v2335_v9 = vld [vmem:[#allocation2 + $0x28] sm:$0xf]  ;;  %2311 = vst [vmem:[#allocation2 + $0x34] sm:$0xf] %v2291_v58  ;;  %v2046_v52 = vadd.f32 %v2045_v36, %v1987_v18  ;;  %3515 = vmatmul.bf16.gmra.mxu2 %v5068_v40  ;;  %v2584_v18 = vrot.slane %v2582_v43, 5  ;;  %v6504_v58 = vpop.f32.mrf.mxu2  ;;  %v2732_v31 = vunpack.c.l.b16 %v2424_v62  ;;  %v6517_v51 = vpop.f32.mrf.mxu1 }
 0x263   : > { %v2427_v22 = vshrl.u32 %v2335_v9, 16  ;;  %v2430_v44 = vshll.u32 %v2335_v9, 16  ;;  %v2337_v9 = vld [vmem:[#allocation2 + $0x30] sm:$0xf] }
 0x264   : > { %vm2085_vm13 = vcmp.gt.f32.partialorder %v2046_v52, 0.0  ;;  %v2105_v57 = vmul.f32 0.01, %v2046_v52  ;;  %v6515_v53 = vpop.f32.mrf.mxu3 }
 0x265   : > { %v2429_v35 = vrot.slane %v2427_v22, 7  ;;  %v2576_v30 = vrot.slane %v2430_v44, 5  ;;  %v2578_v59 = vrot.slane %v2427_v22, 4 }
 0x266   : > { %v2125_v3 = vsel %vm2085_vm13, %v2046_v52, %v2105_v57  ;;  %v5104_v52 = vld [vmem:[#allocation8 + $0xe0] sm:$0xff] }
 0x267   : > { %v2432_v56 = vor.u32 %v2430_v44, %v2429_v35  ;;  %v2252_v28 = vsel %vm6476_vm12, %v2125_v3, 0.0  ;;  %v2579_v5 = vor.u32 %v2578_v59, %v2576_v30  ;;  %v2577_v42 = vsel %vm5865_vm5, %v2575_v4, %v2576_v30  ;;  %3598 = vmatpush.bf16.msrb.mxu1 %v5104_v52  ;;  %v2340_v4 = vld [vmem:[#allocation2 + $0x3c] sm:$0xf] }
 0x268   : > { %v2292_v39 = vpack.c.bf16 %v2252_v28, %v2252_v28  ;;  %v2812_v35 = vunpack.c.l.b16 %v2577_v42  ;;  %v2435_v30 = vshrl.u32 %v2337_v9, 16  ;;  %v1877_v3 = vadd.f32 %v6463_v17, %v6284_v16 }
 0x269   : > { %v2433_v55 = vsel %vm6411_vm1, %v2425_v50, %v2432_v56  ;;  %v2048_v29 = vpop.f32.mrf.mxu0  ;;  %v2580_v36 = vrot.slane %v2579_v5, 4  ;;  %v2338_v23 = vld [vmem:[#allocation2 + $0x34] sm:$0xf]  ;;  %v1992_v56 = vadd.f32 %v6461_v8, %v1933_v19  ;;  %v2145_v8 = vadd.s32 5, %v6350_v13 }
 0x26a   : > { %v2733_v12 = vunpack.c.l.b16 %v2433_v55  ;;  %2312 = vst [vmem:[#allocation2 + $0x38] sm:$0xf] %v2292_v39  ;;  %v2049_v40 = vadd.f32 %v2048_v29, %v1990_v24  ;;  %v2440_v45 = vshrl.u32 %v2338_v23, 16  ;;  %v2443_v11 = vshll.u32 %v2338_v23, 16  ;;  %v5119_v23 = vld [vmem:[#allocation8 + $0x158] sm:$0xff] }
 0x26b   : > { %v2585_v44 = vsel %vm5865_vm5, %v2580_v36, %v2584_v18  ;;  %v1936_v5 = vadd.f32 %v6481_v37, %v1877_v3  ;;  %v4608_v29 = vrot.slane %v2435_v30, 11  ;;  %v5111_v36 = vld [vmem:[#allocation8 + $0x118] sm:$0xff]  ;;  %v2596_v9 = vshll.u32 %v2340_v4, 16  ;;  %3697 = vmatpush.bf16.msrb.mxu3 %v5119_v23 }
 0x26c   : > { %v6511_v22 = vpack.c.b16 %v2733_v12, %v2732_v31  ;;  %vm2086_vm0 = vcmp.gt.f32.partialorder %v2049_v40, 0.0  ;;  %v2106_v43 = vmul.f32 0.01, %v2049_v40  ;;  %v2813_v63 = vunpack.c.l.b16 %v2585_v44  ;;  %v6536_v31 = vpop.f32.mrf.mxu2  ;;  %3648 = vmatpush.bf16.msrb.mxu2 %v5111_v36 }
 0x26d   : > { %v2442_v59 = vrot.slane %v2440_v45, 7  ;;  %v2586_v62 = vrot.slane %v2440_v45, 4  ;;  %v2587_v50 = vrot.slane %v2443_v11, 5  ;;  %v1995_v19 = vadd.f32 %v6492_v41, %v1936_v5 }
 0x26e   : > { %3466 = vmatmul.bf16.gmra.mxu1 %v6511_v22  ;;  %3750 = vmatmul.bf16.vlgmr.msrb.gmra.mxu0 %v6511_v22  ;;  %v2126_v24 = vsel %vm2086_vm0, %v2049_v40, %v2106_v43  ;;  %v6527_v32 = vpack.c.b16 %v2813_v63, %v2812_v35  ;;  %v1879_v44 = vadd.f32 %v6494_v54, %v6288_v26  ;;  %v6542_v43 = vpop.f32.mrf.mxu3  ;;  %v6544_v35 = vpop.f32.mrf.mxu1  ;;  %v2598_v41 = vrot.slane %v2596_v9, 5 }
 0x26f   : > { %v2253_v46 = vsel %vm6521_vm2, %v2126_v24, 0.0  ;;  %v2445_v17 = vor.u32 %v2443_v11, %v2442_v59  ;;  %v2588_v40 = vor.u32 %v2587_v50, %v2586_v62  ;;  %v2447_v24 = vrot.slane %v2442_v59, 4 }
 0x270   : > { %v2293_v28 = vpack.c.bf16 %v2253_v46, %v2253_v46  ;;  %3564 = vmatmul.bf16.gmra.mxu3 %v6527_v32  ;;  %vm2158_vm4 = vcmp.ge.s32.totalorder %v2145_v8, 0  ;;  %vm2168_vm6 = vcmp.lt.s32.totalorder %v2145_v8, 16 }
 0x271   : > { %v2050_v18 = vpop.f32.mrf.mxu0  ;;  %v5069_v39 = vld [vmem:[#allocation2 + $0x34] sm:$0xff]  ;;  %v2446_v30 = vsel %vm6411_vm1, %v4608_v29, %v2445_v17  ;;  %v2589_v62 = vrot.slane %v2588_v40, 4  ;;  %vm6563_vm8 = vmand %vm2158_vm4, %vm2168_vm6 }
 0x272   : > { %v2339_v55 = vld [vmem:[#allocation2 + $0x38] sm:$0xf]  ;;  %2313 = vst [vmem:[#allocation2 + $0x44] sm:$0xf] %v2293_v28  ;;  %v2051_v16 = vadd.f32 %v2050_v18, %v1992_v56  ;;  %3520 = vmatmul.bf16.gmra.mxu2 %v5069_v39  ;;  %v2734_v28 = vunpack.c.l.b16 %v2446_v30  ;;  %v2341_v39 = vld [vmem:[#allocation2 + $0x40] sm:$0xf] }
 0x273   : > { %v2449_v12 = vshrl.u32 %v2339_v55, 16  ;;  %v2452_v42 = vshll.u32 %v2339_v55, 16  ;;  %v5103_v29 = vld [vmem:[#allocation8 + $0xd8] sm:$0xff] }
 0x274   : > { %vm2087_vm3 = vcmp.gt.f32.partialorder %v2051_v16, 0.0  ;;  %v2107_v37 = vmul.f32 0.01, %v2051_v16  ;;  %v6559_v36 = vpop.f32.mrf.mxu2  ;;  %3599 = vmatpush.bf16.msrb.mxu1 %v5103_v29 }
 0x275   : > { %v2451_v45 = vrot.slane %v2449_v12, 7  ;;  %v2590_v52 = vrot.slane %v2452_v42, 5  ;;  %v2592_v11 = vrot.slane %v2449_v12, 4 }
 0x276   : > { %v2127_v63 = vsel %vm2087_vm3, %v2051_v16, %v2107_v37  ;;  %v1938_v16 = vadd.f32 %v6504_v58, %v1879_v44  ;;  %v2457_v58 = vshrl.u32 %v2341_v39, 16  ;;  %v1882_v44 = vadd.f32 %v6517_v51, %v6293_v6 }
 0x277   : > { %v2454_v3 = vor.u32 %v2452_v42, %v2451_v45  ;;  %v2254_v46 = vsel %vm6521_vm2, %v2127_v63, 0.0  ;;  %v2593_v50 = vor.u32 %v2592_v11, %v2590_v52  ;;  %v2591_v5 = vsel %vm5865_vm5, %v2589_v62, %v2590_v52  ;;  %v2344_v62 = vld [vmem:[#allocation2 + $0x4c] sm:$0xf] }
 0x278   : > { %v2294_v56 = vpack.c.bf16 %v2254_v46, %v2254_v46  ;;  %v2814_v9 = vunpack.c.l.b16 %v2591_v5  ;;  %v1997_v30 = vadd.f32 %v6515_v53, %v1938_v16  ;;  %v4609_v51 = vrot.slane %v2457_v58, 11  ;;  %v5118_v5 = vld [vmem:[#allocation8 + $0x150] sm:$0xff] }
 0x279   : > { %v2455_v26 = vsel %vm6411_vm1, %v2447_v24, %v2454_v3  ;;  %v2053_v54 = vpop.f32.mrf.mxu0  ;;  %v2594_v59 = vrot.slane %v2593_v50, 4  ;;  %v2342_v18 = vld [vmem:[#allocation2 + $0x44] sm:$0xf]  ;;  %v6576_v24 = vpop.f32.mrf.mxu3  ;;  %v1941_v50 = vadd.f32 %v6536_v31, %v1882_v44  ;;  %3698 = vmatpush.bf16.msrb.mxu3 %v5118_v5  ;;  %v1884_v16 = vadd.f32 %v6544_v35, %v6299_v20 }
 0x27a   : > { %v2735_v4 = vunpack.c.l.b16 %v2455_v26  ;;  %2314 = vst [vmem:[#allocation2 + $0x48] sm:$0xf] %v2294_v56  ;;  %v2054_v57 = vadd.f32 %v2053_v54, %v1995_v19  ;;  %v2462_v55 = vshrl.u32 %v2342_v18, 16  ;;  %v2465_v42 = vshll.u32 %v2342_v18, 16  ;;  %v6578_v3 = vpop.f32.mrf.mxu1 }
 0x27b   : > { %v2599_v12 = vsel %vm5865_vm5, %v2594_v59, %v2598_v41  ;;  %v2146_v59 = vadd.s32 6, %v6350_v13  ;;  %v2000_v29 = vadd.f32 %v6542_v43, %v1941_v50 }
 0x27c   : > { %v6555_v17 = vpack.c.b16 %v2735_v4, %v2734_v28  ;;  %vm2088_vm7 = vcmp.gt.f32.partialorder %v2054_v57, 0.0  ;;  %v2108_v23 = vmul.f32 0.01, %v2054_v57  ;;  %v2815_v37 = vunpack.c.l.b16 %v2599_v12  ;;  %v5110_v4 = vld [vmem:[#allocation8 + $0x110] sm:$0xff] }
 0x27d   : > { %v2464_v19 = vrot.slane %v2462_v55, 7  ;;  %v2600_v11 = vrot.slane %v2462_v55, 4  ;;  %v2601_v63 = vrot.slane %v2465_v42, 5  ;;  %3649 = vmatpush.bf16.msrb.mxu2 %v5110_v4  ;;  %vm2159_vm10 = vcmp.ge.s32.totalorder %v2146_v59, 0 }
 0x27e   : > { %3471 = vmatmul.bf16.gmra.mxu1 %v6555_v17  ;;  %3755 = vmatmul.bf16.gmra.mxu0 %v6555_v17  ;;  %v2128_v45 = vsel %vm2088_vm7, %v2054_v57, %v2108_v23  ;;  %v6569_v52 = vpack.c.b16 %v2815_v37, %v2814_v9  ;;  %v2610_v57 = vshll.u32 %v2344_v62, 16  ;;  %vm2169_vm11 = vcmp.lt.s32.totalorder %v2146_v59, 16 }
 0x27f   : > { %v2255_v8 = vsel %vm6563_vm8, %v2128_v45, 0.0  ;;  %v2467_v54 = vor.u32 %v2465_v42, %v2464_v19  ;;  %v2602_v18 = vor.u32 %v2601_v63, %v2600_v11  ;;  %v1945_v42 = vpop.f32.mrf.mxu2  ;;  %v2469_v37 = vrot.slane %v2464_v19, 4  ;;  %vm6604_vm13 = vmand %vm2159_vm10, %vm2169_vm11 }
 0x280   : > { %v2295_v46 = vpack.c.bf16 %v2255_v8, %v2255_v8  ;;  %3569 = vmatmul.bf16.gmra.mxu3 %v6569_v52  ;;  %v2612_v11 = vrot.slane %v2610_v57, 5 }
 0x281   : > { %v2055_v41 = vpop.f32.mrf.mxu0  ;;  %v6582_v56 = vld [vmem:[#allocation2 + $0x44] sm:$0xff]  ;;  %v2468_v9 = vsel %vm6411_vm1, %v4609_v51, %v2467_v54  ;;  %v2603_v44 = vrot.slane %v2602_v18, 4  ;;  %v2004_v50 = vpop.f32.mrf.mxu3  ;;  %v1943_v54 = vadd.f32 %v6559_v36, %v1884_v16  ;;  %v1887_v16 = vadd.f32 %v6578_v3, %v6304_v38 }
 0x282   : > { %v2343_v6 = vld [vmem:[#allocation2 + $0x48] sm:$0xf]  ;;  %2315 = vst [vmem:[#allocation2 + $0x54] sm:$0xf] %v2295_v46  ;;  %v2056_v26 = vadd.f32 %v2055_v41, %v1997_v30  ;;  %3525 = vmatmul.bf16.gmra.mxu2 %v6582_v56  ;;  %v2736_v35 = vunpack.c.l.b16 %v2468_v9  ;;  %v1888_v40 = vpop.f32.mrf.mxu1 }
 0x283   : > { %v2471_v28 = vshrl.u32 %v2343_v6, 16  ;;  %v2474_v53 = vshll.u32 %v2343_v6, 16  ;;  %v2345_v6 = vld [vmem:[#allocation2 + $0x50] sm:$0xf]  ;;  %v2002_v9 = vadd.f32 %v6576_v24, %v1943_v54  ;;  %v1946_v3 = vadd.f32 %v1945_v42, %v1887_v16 }
 0x284   : > { %vm2089_vm9 = vcmp.gt.f32.partialorder %v2056_v26, 0.0  ;;  %v2109_v31 = vmul.f32 0.01, %v2056_v26  ;;  %v2479_v36 = vshrl.u32 %v2345_v6, 16 }
 0x285   : > { %v2473_v39 = vrot.slane %v2471_v28, 7  ;;  %v2604_v55 = vrot.slane %v2474_v53, 5  ;;  %v2606_v12 = vrot.slane %v2471_v28, 4 }
 0x286   : > { %v2129_v23 = vsel %vm2089_vm9, %v2056_v26, %v2109_v31  ;;  %v5102_v26 = vld [vmem:[#allocation8 + $0xd0] sm:$0xff]  ;;  %v4610_v24 = vrot.slane %v2479_v36, 11 }
 0x287   : > { %v2476_v58 = vor.u32 %v2474_v53, %v2473_v39  ;;  %v2256_v45 = vsel %vm6563_vm8, %v2129_v23, 0.0  ;;  %v2607_v8 = vor.u32 %v2606_v12, %v2604_v55  ;;  %v2605_v46 = vsel %vm5865_vm5, %v2603_v44, %v2604_v55  ;;  %3600 = vmatpush.bf16.msrb.mxu1 %v5102_v26  ;;  %v6623_v44 = vld [vmem:[%s7108_s2] ss:$0 sm:$0xff] }
 0x288   : > { %v2296_v63 = vpack.c.bf16 %v2256_v45, %v2256_v45  ;;  %v2816_v57 = vunpack.c.l.b16 %v2605_v46  ;;  %v2348_v45 = vld [vmem:[#allocation2 + $0x5c] sm:$0xf]  ;;  %v1599_v38 = vadd.f32 %v6623_v44, %v6191_v60  ;;  %v5109_v46 = vld [vmem:[#allocation8 + $0x108] sm:$0xff] }
 0x289   : > { %v2477_v20 = vsel %vm6411_vm1, %v2469_v37, %v2476_v58  ;;  %v2058_v43 = vpop.f32.mrf.mxu0  ;;  %v2608_v19 = vrot.slane %v2607_v8, 4  ;;  %v2346_v62 = vld [vmem:[#allocation2 + $0x54] sm:$0xf]  ;;  %v6617_v37 = vpop.f32.mrf.mxu2  ;;  %v2624_v6 = vshll.u32 %v2348_v45, 16  ;;  %v6631_v60 = vld [vmem:[#allocation8 + $0x1f8] sm:$0xff]  ;;  %3650 = vmatpush.bf16.msrb.mxu2 %v5109_v46 }
 0x28a   : > { %v2737_v30 = vunpack.c.l.b16 %v2477_v20  ;;  %2316 = vst [vmem:[#allocation2 + $0x58] sm:$0xf] %v2296_v63  ;;  %v2059_v41 = vadd.f32 %v2058_v43, %v2000_v29  ;;  %v2484_v51 = vshrl.u32 %v2346_v62, 16  ;;  %v2487_v4 = vshll.u32 %v2346_v62, 16  ;;  %v6633_v42 = vpop.f32.mrf.mxu3  ;;  %3791 = vmatpush.bf16.msra.mxu0 %v6631_v60  ;;  %v6642_v45 = vld [vmem:[#allocation8 + $0x1f0] sm:$0xff] }
 0x28b   : > { %v2613_v53 = vsel %vm5865_vm5, %v2608_v19, %v2612_v11  ;;  %v5117_v19 = vld [vmem:[#allocation8 + $0x148] sm:$0xff]  ;;  %v2147_v62 = vadd.s32 7, %v6350_v13 }
 0x28c   : > { %v6598_v28 = vpack.c.b16 %v2737_v30, %v2736_v35  ;;  %vm2090_vm12 = vcmp.gt.f32.partialorder %v2059_v41, 0.0  ;;  %v2110_v5 = vmul.f32 0.01, %v2059_v41  ;;  %v2817_v31 = vunpack.c.l.b16 %v2613_v53  ;;  %3699 = vmatpush.bf16.msrb.mxu3 %v5117_v19 }
 0x28d   : > { %v2486_v29 = vrot.slane %v2484_v51, 7  ;;  %v2614_v12 = vrot.slane %v2484_v51, 4  ;;  %v2615_v23 = vrot.slane %v2487_v4, 5  ;;  %v1891_v51 = vpop.f32.mrf.mxu1  ;;  %vm2160_vm15 = vcmp.ge.s32.totalorder %v2147_v62, 0 }
 0x28e   : > { %3476 = vmatmul.bf16.gmra.mxu1 %v6598_v28  ;;  %3760 = vmatmul.bf16.gmra.mxu0 %v6598_v28  ;;  %v2130_v39 = vsel %vm2090_vm12, %v2059_v41, %v2110_v5  ;;  %v6610_v55 = vpack.c.b16 %v2817_v31, %v2816_v57  ;;  %v2005_v5 = vadd.f32 %v2004_v50, %v1946_v3  ;;  %vm2170_vm0 = vcmp.lt.s32.totalorder %v2147_v62, 16 }
 0x28f   : > { %v2257_v59 = vsel %vm6604_vm13, %v2130_v39, 0.0  ;;  %v2489_v43 = vor.u32 %v2487_v4, %v2486_v29  ;;  %v2616_v41 = vor.u32 %v2615_v23, %v2614_v12  ;;  %v1658_v4 = vadd.f32 %v6199_v0, %v1599_v38  ;;  %3792 = vmatpush.bf16.msra.mxu0 %v6642_v45  ;;  %vm6659_vm3 = vmand %vm2160_vm15, %vm2170_vm0 }
 0x290   : > { %v2297_v58 = vpack.c.bf16 %v2257_v59, %v2257_v59  ;;  %3574 = vmatmul.bf16.gmra.mxu3 %v6610_v55  ;;  %v1889_v57 = vadd.f32 %v1888_v40, %v6310_v34  ;;  %v2491_v16 = vrot.slane %v2486_v29, 4 }
 0x291   : > { %v2060_v8 = vpop.f32.mrf.mxu0  ;;  %v6627_v11 = vld [vmem:[#allocation2 + $0x54] sm:$0xff]  ;;  %v2490_v39 = vsel %vm6411_vm1, %v4610_v24, %v2489_v43  ;;  %v2617_v23 = vrot.slane %v2616_v41, 4 }
 0x292   : > { %v2347_v63 = vld [vmem:[#allocation2 + $0x58] sm:$0xf]  ;;  %2317 = vst [vmem:[#allocation2 + $0x64] sm:$0xf] %v2297_v58  ;;  %v2061_v20 = vadd.f32 %v2060_v8, %v2002_v9  ;;  %3530 = vmatmul.bf16.gmra.mxu2 %v6627_v11  ;;  %v2626_v58 = vrot.slane %v2624_v6, 5  ;;  %v2738_v40 = vunpack.c.l.b16 %v2490_v39  ;;  %v1717_v8 = vadd.f32 %v6202_v14, %v1658_v4  ;;  %v6655_v6 = vld [vmem:[#allocation8 + $0x1e8] sm:$0xff] }
 0x293   : > { %v2493_v35 = vshrl.u32 %v2347_v63, 16  ;;  %v2496_v30 = vshll.u32 %v2347_v63, 16  ;;  %v1950_v63 = vpop.f32.mrf.mxu2  ;;  %3793 = vmatpush.bf16.msra.mxu0 %v6655_v6  ;;  %v1892_v39 = vadd.f32 %v1891_v51, %v6319_v27 }
 0x294   : > { %vm2091_vm14 = vcmp.gt.f32.partialorder %v2061_v20, 0.0  ;;  %v2111_v26 = vmul.f32 0.01, %v2061_v20  ;;  %v1776_v4 = vadd.f32 %v6204_v15, %v1717_v8 }
 0x295   : > { %v2495_v54 = vrot.slane %v2493_v35, 7  ;;  %v2618_v53 = vrot.slane %v2496_v30, 5  ;;  %v2620_v31 = vrot.slane %v2493_v35, 4  ;;  %v5101_v35 = vld [vmem:[#allocation8 + $0xc8] sm:$0xff] }
 0x296   : > { %v2131_v36 = vsel %vm2091_vm14, %v2061_v20, %v2111_v26  ;;  %v2349_v20 = vld [vmem:[#allocation2 + $0x60] sm:$0xf]  ;;  %3601 = vmatpush.bf16.msrb.mxu1 %v5101_v35  ;;  %v1835_v27 = vadd.f32 %v6324_v25, %v1776_v4 }
 0x297   : > { %v2498_v59 = vor.u32 %v2496_v30, %v2495_v54  ;;  %v2258_v12 = vsel %vm6604_vm13, %v2131_v36, 0.0  ;;  %v2621_v9 = vor.u32 %v2620_v31, %v2618_v53  ;;  %v2619_v29 = vsel %vm5865_vm5, %v2617_v23, %v2618_v53  ;;  %v5108_v23 = vld [vmem:[#allocation8 + $0x100] sm:$0xff] }
 0x298   : > { %v2298_v0 = vpack.c.bf16 %v2258_v12, %v2258_v12  ;;  %v1948_v30 = vadd.f32 %v6617_v37, %v1889_v57  ;;  %v2818_v54 = vunpack.c.l.b16 %v2619_v29  ;;  %v2501_v37 = vshrl.u32 %v2349_v20, 16  ;;  %v1893_v57 = vpop.f32.mrf.mxu1  ;;  %3651 = vmatpush.bf16.msrb.mxu2 %v5108_v23  ;;  %v6692_v23 = vld [vmem:[#allocation8 + $0x1d0] sm:$0xff] }
 0x299   : > { %v2499_v34 = vsel %vm6411_vm1, %v2491_v16, %v2498_v59  ;;  %v2063_v50 = vpop.f32.mrf.mxu0  ;;  %v2622_v3 = vrot.slane %v2621_v9, 4  ;;  %v2350_v18 = vld [vmem:[#allocation2 + $0x64] sm:$0xf] }
 0x29a   : > { %v2739_v38 = vunpack.c.l.b16 %v2499_v34  ;;  %2318 = vst [vmem:[#allocation2 + $0x68] sm:$0xf] %v2298_v0  ;;  %v2064_v24 = vadd.f32 %v2063_v50, %v2005_v5  ;;  %v2506_v43 = vshrl.u32 %v2350_v18, 16  ;;  %v2509_v41 = vshll.u32 %v2350_v18, 16  ;;  %v2009_v5 = vpop.f32.mrf.mxu3  ;;  %v6672_v9 = vld [vmem:[#allocation8 + $0x1e0] sm:$0xff] }
 0x29b   : > { %v2627_v19 = vsel %vm5865_vm5, %v2622_v3, %v2626_v58  ;;  %v2007_v15 = vadd.f32 %v6633_v42, %v1948_v30  ;;  %v2352_v0 = vld [vmem:[#allocation2 + $0x6c] sm:$0xf]  ;;  %v1604_v34 = vadd.f32 %v6623_v44, %v6217_v1  ;;  %v1951_v50 = vadd.f32 %v1950_v63, %v1892_v39  ;;  %3794 = vmatpush.bf16.msra.mxu0 %v6672_v9  ;;  %v6684_v63 = vld [vmem:[#allocation8 + $0x1d8] sm:$0xff]  ;;  %v1952_v20 = vpop.f32.mrf.mxu2 }
 0x29c   : > { %v6651_v46 = vpack.c.b16 %v2739_v38, %v2738_v40  ;;  %vm2092_vm2 = vcmp.gt.f32.partialorder %v2064_v24, 0.0  ;;  %v2112_v26 = vmul.f32 0.01, %v2064_v24  ;;  %v2819_v53 = vunpack.c.l.b16 %v2627_v19 }
 0x29d   : > { %v2508_v62 = vrot.slane %v2506_v43, 7  ;;  %v2628_v59 = vrot.slane %v2506_v43, 4  ;;  %v2629_v12 = vrot.slane %v2509_v41, 5  ;;  %v4611_v29 = vrot.slane %v2501_v37, 11 }
 0x29e   : > { %3481 = vmatmul.bf16.gmra.mxu1 %v6651_v46  ;;  %3765 = vmatmul.bf16.gmra.mxu0 %v6651_v46  ;;  %v2132_v31 = vsel %vm2092_vm2, %v2064_v24, %v2112_v26  ;;  %v6666_v36 = vpack.c.b16 %v2819_v53, %v2818_v54  ;;  %v5116_v24 = vld [vmem:[#allocation8 + $0x140] sm:$0xff]  ;;  %v2148_v1 = vadd.s32 8, %v6350_v13  ;;  %v2638_v25 = vshll.u32 %v2352_v0, 16 }
 0x29f   : > { %v2259_v16 = vsel %vm6659_vm3, %v2132_v31, 0.0  ;;  %v2511_v18 = vor.u32 %v2509_v41, %v2508_v62  ;;  %v2630_v44 = vor.u32 %v2629_v12, %v2628_v59  ;;  %3700 = vmatpush.bf16.msrb.mxu3 %v5116_v24  ;;  %v1663_v19 = vadd.f32 %v6290_v48, %v1604_v34  ;;  %3795 = vmatpush.bf16.msra.mxu0 %v6684_v63 }
 0x2a0   : > { %v2299_v58 = vpack.c.bf16 %v2259_v16, %v2259_v16  ;;  %3579 = vmatmul.bf16.gmra.mxu3 %v6666_v36  ;;  %v2010_v41 = vadd.f32 %v2009_v5, %v1951_v50  ;;  %v1894_v26 = vadd.f32 %v1893_v57, %v1835_v27  ;;  %v2513_v4 = vrot.slane %v2508_v62, 4  ;;  %v1896_v5 = vpop.f32.mrf.mxu1  ;;  %v5100_v27 = vld [vmem:[#allocation8 + $0xc0] sm:$0xff] }
 0x2a1   : > { %v2065_v51 = vpop.f32.mrf.mxu0  ;;  %v6679_v40 = vld [vmem:[#allocation2 + $0x64] sm:$0xff]  ;;  %v2512_v37 = vsel %vm6411_vm1, %v4611_v29, %v2511_v18  ;;  %v2631_v16 = vrot.slane %v2630_v44, 4  ;;  %v2640_v12 = vrot.slane %v2638_v25, 5  ;;  %vm2161_vm6 = vcmp.ge.s32.totalorder %v2148_v1, 0  ;;  %v2353_v29 = vld [vmem:[#allocation2 + $0x70] sm:$0xf]  ;;  %3602 = vmatpush.bf16.msrb.mxu1 %v5100_v27 }
 0x2a2   : > { %v2351_v38 = vld [vmem:[#allocation2 + $0x68] sm:$0xf]  ;;  %2319 = vst [vmem:[#allocation2 + $0x74] sm:$0xf] %v2299_v58  ;;  %v2066_v3 = vadd.f32 %v2065_v51, %v2007_v15  ;;  %3535 = vmatmul.bf16.gmra.mxu2 %v6679_v40  ;;  %v2011_v48 = vpop.f32.mrf.mxu3  ;;  %vm2171_vm7 = vcmp.lt.s32.totalorder %v2148_v1, 16  ;;  %v2740_v58 = vunpack.c.l.b16 %v2512_v37  ;;  %v1722_v51 = vadd.f32 %v6296_v10, %v1663_v19 }
 0x2a3   : > { %v2515_v42 = vshrl.u32 %v2351_v38, 16  ;;  %v2518_v8 = vshll.u32 %v2351_v38, 16  ;;  %3796 = vmatpush.bf16.msra.mxu0 %v6692_v23  ;;  %v1953_v18 = vadd.f32 %v1952_v20, %v1894_v26  ;;  %v6704_v44 = vld [vmem:[#allocation8 + $0x1c8] sm:$0xff]  ;;  %vm6708_vm9 = vmand %vm2161_vm6, %vm2171_vm7  ;;  %v2523_v20 = vshrl.u32 %v2353_v29, 16  ;;  %v1955_v19 = vpop.f32.mrf.mxu2 }
 0x2a4   : > { %vm2093_vm4 = vcmp.gt.f32.partialorder %v2066_v3, 0.0  ;;  %v2113_v43 = vmul.f32 0.01, %v2066_v3 }
 0x2a5   : > { %v2517_v35 = vrot.slane %v2515_v42, 7  ;;  %v2632_v30 = vrot.slane %v2518_v8, 5  ;;  %v2634_v54 = vrot.slane %v2515_v42, 4  ;;  %5204 = vmatpush.bf16.msra.mxu1 %v6631_v60 }
 0x2a6   : > { %v2133_v53 = vsel %vm2093_vm4, %v2066_v3, %v2113_v43 }
 0x2a7   : > { %v2520_v31 = vor.u32 %v2518_v8, %v2517_v35  ;;  %v2260_v39 = vsel %vm6659_vm3, %v2133_v53, 0.0  ;;  %v2635_v59 = vor.u32 %v2634_v54, %v2632_v30  ;;  %v2633_v14 = vsel %vm5865_vm5, %v2631_v16, %v2632_v30  ;;  %3797 = vmatpush.bf16.msra.mxu0 %v6704_v44  ;;  %v5147_v16 = vld [vmem:[#allocation8 + $0x238] sm:$0xff] }
 0x2a8   : > { %v2300_v57 = vpack.c.bf16 %v2260_v39, %v2260_v39  ;;  %v2820_v43 = vunpack.c.l.b16 %v2633_v14  ;;  %v1781_v30 = vadd.f32 %v6301_v21, %v1722_v51  ;;  %v1897_v54 = vadd.f32 %v1896_v5, %v6333_v61  ;;  %v2356_v21 = vld [vmem:[#allocation2 + $0x7c] sm:$0xf]  ;;  %5212 = vmatpush.bf16.msra.mxu2 %v5147_v16 }
 0x2a9   : > { %v2521_v15 = vsel %vm6411_vm1, %v2513_v4, %v2520_v31  ;;  %v2068_v62 = vpop.f32.mrf.mxu0  ;;  %v2636_v34 = vrot.slane %v2635_v59, 4  ;;  %v2354_v50 = vld [vmem:[#allocation2 + $0x74] sm:$0xf]  ;;  %v6722_v4 = vld [vmem:[#allocation8 + $0x1c0] sm:$0xff]  ;;  %v2012_v31 = vadd.f32 %v2011_v48, %v1953_v18  ;;  %v6725_v59 = vld [vmem:[#allocation9 + $0x38] sm:$0xff]  ;;  %5205 = vmatpush.bf16.msra.mxu1 %v6642_v45  ;;  %v2149_v45 = vadd.s32 9, %v6350_v13 }
 0x2aa   : > { %v2741_v0 = vunpack.c.l.b16 %v2521_v15  ;;  %2320 = vst [vmem:[#allocation2 + $0x78] sm:$0xf] %v2300_v57  ;;  %v2069_v38 = vadd.f32 %v2068_v62, %v2010_v41  ;;  %v2528_v3 = vshrl.u32 %v2354_v50, 16  ;;  %v2531_v24 = vshll.u32 %v2354_v50, 16  ;;  %5220 = vmatpush.bf16.msra.mxu3 %v6725_v59 }
 0x2ab   : > { %v2641_v8 = vsel %vm5865_vm5, %v2636_v34, %v2640_v12  ;;  %v1956_v12 = vadd.f32 %v1955_v19, %v1897_v54  ;;  %v1840_v61 = vadd.f32 %v6341_v7, %v1781_v30  ;;  %v4612_v62 = vrot.slane %v2523_v20, 11  ;;  %3798 = vmatpush.bf16.msra.mxu0 %v6722_v4  ;;  %v1957_v54 = vpop.f32.mrf.mxu2 }
 0x2ac   : > { %v6700_v42 = vpack.c.b16 %v2741_v0, %v2740_v58  ;;  %vm2094_vm8 = vcmp.gt.f32.partialorder %v2069_v38, 0.0  ;;  %v2114_v25 = vmul.f32 0.01, %v2069_v38  ;;  %v2821_v35 = vunpack.c.l.b16 %v2641_v8  ;;  %v2014_v58 = vpop.f32.mrf.mxu3  ;;  %v1898_v0 = vpop.f32.mrf.mxu1 }
 0x2ad   : > { %v2530_v1 = vrot.slane %v2528_v3, 7  ;;  %v2642_v60 = vrot.slane %v2528_v3, 4  ;;  %v2643_v37 = vrot.slane %v2531_v24, 5  ;;  %v2652_v27 = vshll.u32 %v2356_v21, 16  ;;  %v5146_v3 = vld [vmem:[#allocation8 + $0x230] sm:$0xff]  ;;  %5206 = vmatpush.bf16.msra.mxu1 %v6655_v6 }
 0x2ae   : > { %3486 = vmatmul.bf16.gmra.mxu1 %v6700_v42  ;;  %3770 = vmatmul.bf16.gmra.mxu0 %v6700_v42  ;;  %v2134_v41 = vsel %vm2094_vm8, %v2069_v38, %v2114_v25  ;;  %v6716_v26 = vpack.c.b16 %v2821_v35, %v2820_v43  ;;  %v2015_v18 = vadd.f32 %v2014_v58, %v1956_v12  ;;  %vm2162_vm11 = vcmp.ge.s32.totalorder %v2149_v45, 0  ;;  %v2357_v12 = vld [vmem:[#allocation2 + $0x80] sm:$0xf] }
 0x2af   : > { %v2261_v53 = vsel %vm6708_vm9, %v2134_v41, 0.0  ;;  %v2533_v14 = vor.u32 %v2531_v24, %v2530_v1  ;;  %v2644_v7 = vor.u32 %v2643_v37, %v2642_v60  ;;  %3840 = vmatpush.bf16.msrb.mxu0 %v5147_v16  ;;  %v1899_v8 = vadd.f32 %v1898_v0, %v1840_v61  ;;  %5213 = vmatpush.bf16.msra.mxu2 %v5146_v3  ;;  %v5145_v60 = vld [vmem:[#allocation8 + $0x228] sm:$0xff] }
 0x2b0   : > { %v2301_v39 = vpack.c.bf16 %v2261_v53, %v2261_v53  ;;  %3584 = vmatmul.bf16.gmra.mxu3 %v6716_v26  ;;  %v2535_v13 = vrot.slane %v2530_v1, 4  ;;  %v2654_v41 = vrot.slane %v2652_v27, 5  ;;  %vm2172_vm12 = vcmp.lt.s32.totalorder %v2149_v45, 16 }
 0x2b1   : > { %v2070_v5 = vpop.f32.mrf.mxu0  ;;  %v6729_v57 = vld [vmem:[#allocation2 + $0x74] sm:$0xff]  ;;  %v2534_v43 = vsel %vm6411_vm1, %v4612_v62, %v2533_v14  ;;  %v2645_v30 = vrot.slane %v2644_v7, 4  ;;  %5207 = vmatpush.bf16.msra.mxu1 %v6672_v9  ;;  %vm6751_vm14 = vmand %vm2162_vm11, %vm2172_vm12  ;;  %v2657_v7 = vshrl.u32 %v2357_v12, 16 }
 0x2b2   : > { %v2355_v15 = vld [vmem:[#allocation2 + $0x78] sm:$0xf]  ;;  %2321 = vst [vmem:[#allocation2 + $0x84] sm:$0xf] %v2301_v39  ;;  %v2071_v48 = vadd.f32 %v2070_v5, %v2012_v31  ;;  %3540 = vmatmul.bf16.gmra.mxu2 %v6729_v57  ;;  %v2742_v37 = vunpack.c.l.b16 %v2534_v43  ;;  %v2360_v43 = vld [vmem:[#allocation2 + $0x8c] sm:$0xf] }
 0x2b3   : > { %v2537_v34 = vshrl.u32 %v2355_v15, 16  ;;  %v2540_v50 = vshll.u32 %v2355_v15, 16  ;;  %3841 = vmatpush.bf16.msrb.mxu0 %v5146_v3  ;;  %5214 = vmatpush.bf16.msra.mxu2 %v5145_v60  ;;  %v1958_v15 = vadd.f32 %v1957_v54, %v1899_v8 }
 0x2b4   : > { %vm2095_vm10 = vcmp.gt.f32.partialorder %v2071_v48, 0.0  ;;  %v2115_v51 = vmul.f32 0.01, %v2071_v48 }
 0x2b5   : > { %v2539_v38 = vrot.slane %v2537_v34, 7  ;;  %v2646_v29 = vrot.slane %v2540_v50, 5  ;;  %v2648_v24 = vrot.slane %v2537_v34, 4  ;;  %v5144_v34 = vld [vmem:[#allocation8 + $0x220] sm:$0xff]  ;;  %5208 = vmatpush.bf16.msra.mxu1 %v6684_v63  ;;  %v6763_v63 = vld [vmem:[#allocation9 + $0x30] sm:$0xff] }
 0x2b6   : > { %v2135_v25 = vsel %vm2095_vm10, %v2071_v48, %v2115_v51  ;;  %5221 = vmatpush.bf16.msra.mxu3 %v6763_v63 }
 0x2b7   : > { %v2542_v35 = vor.u32 %v2540_v50, %v2539_v38  ;;  %v2262_v20 = vsel %vm6708_vm9, %v2135_v25, 0.0  ;;  %v2649_v19 = vor.u32 %v2648_v24, %v2646_v29  ;;  %v2647_v10 = vsel %vm5865_vm5, %v2645_v30, %v2646_v29  ;;  %3842 = vmatpush.bf16.msrb.mxu0 %v5145_v60  ;;  %v2016_v50 = vpop.f32.mrf.mxu3  ;;  %5215 = vmatpush.bf16.msra.mxu2 %v5144_v34  ;;  %v5143_v25 = vld [vmem:[#allocation8 + $0x218] sm:$0xff] }
 0x2b8   : > { %v2302_v53 = vpack.c.bf16 %v2262_v20, %v2262_v20  ;;  %v2822_v48 = vunpack.c.l.b16 %v2647_v10  ;;  %v2017_v8 = vadd.f32 %v2016_v50, %v1958_v15  ;;  %v4613_v20 = vrot.slane %v2657_v7, 11 }
 0x2b9   : > { %v2543_v6 = vsel %vm6411_vm1, %v2535_v13, %v2542_v35  ;;  %v2073_v1 = vpop.f32.mrf.mxu0  ;;  %v2650_v39 = vrot.slane %v2649_v19, 4  ;;  %v2358_v21 = vld [vmem:[#allocation2 + $0x84] sm:$0xf]  ;;  %5209 = vmatpush.bf16.msra.mxu1 %v6692_v23  ;;  %v2688_v60 = vshll.u32 %v2360_v43, 16 }
 0x2ba   : > { %v2743_v31 = vunpack.c.l.b16 %v2543_v6  ;;  %2322 = vst [vmem:[#allocation2 + $0x88] sm:$0xf] %v2302_v53  ;;  %v2074_v16 = vadd.f32 %v2073_v1, %v2015_v18  ;;  %v2662_v61 = vshrl.u32 %v2358_v21, 16  ;;  %v2665_v5 = vshll.u32 %v2358_v21, 16  ;;  %v5373_v53 = vld [vmem:[#allocation2 + $0x14] sm:$0xff] }
 0x2bb   : > { %v2655_v9 = vsel %vm5865_vm5, %v2650_v39, %v2654_v41  ;;  %3843 = vmatpush.bf16.msrb.mxu0 %v5144_v34  ;;  %5216 = vmatpush.bf16.msra.mxu2 %v5143_v25  ;;  %v5141_v34 = vld [vmem:[#allocation8 + $0x208] sm:$0xff] }
 0x2bc   : > { %v6745_v62 = vpack.c.b16 %v2743_v31, %v2742_v37  ;;  %vm2096_vm13 = vcmp.gt.f32.partialorder %v2074_v16, 0.0  ;;  %v2116_v58 = vmul.f32 0.01, %v2074_v16  ;;  %v2823_v14 = vunpack.c.l.b16 %v2655_v9  ;;  %v5142_v31 = vld [vmem:[#allocation8 + $0x210] sm:$0xff]  ;;  %v6777_v9 = vld [vmem:[%s7195_s18] ss:$0 sm:$0xff] }
 0x2bd   : > { %v2678_v27 = vrot.slane %v2662_v61, 4  ;;  %v2679_v51 = vrot.slane %v2665_v5, 5  ;;  %v2664_v29 = vrot.slane %v2662_v61, 7  ;;  %5210 = vmatpush.bf16.msra.mxu1 %v6704_v44  ;;  %s5514_s18 = scalar_lea.hbm %s5513_s15, 64 }
 0x2be   : > { %3491 = vmatmul.bf16.gmra.mxu1 %v6745_v62  ;;  %3775 = vmatmul.bf16.gmra.mxu0 %v6745_v62  ;;  %v2136_v38 = vsel %vm2096_vm13, %v2074_v16, %v2116_v58  ;;  %v6758_v45 = vpack.c.b16 %v2823_v14, %v2822_v48  ;;  %v2690_v58 = vrot.slane %v2688_v60, 5  ;;  %v6792_v60 = vld [vmem:[#allocation9 + $0x28] sm:$0xff]  ;;  %p5515_p1 = scmp.ne.s32.totalorder %s5513_s15, %s5514_s18 }
 0x2bf   : > { %v2263_v3 = vsel %vm6751_vm14, %v2136_v38, 0.0  ;;  %v2680_v18 = vor.u32 %v2679_v51, %v2678_v27  ;;  %v2667_v19 = vor.u32 %v2665_v5, %v2664_v29  ;;  %3844 = vmatpush.bf16.msrb.mxu0 %v5143_v25  ;;  %v2669_v39 = vrot.slane %v2664_v29, 4  ;;  %5217 = vmatpush.bf16.msra.mxu2 %v5142_v31  ;;  %v5140_v25 = vld [vmem:[#allocation8 + $0x200] sm:$0xff] }
 0x2c0   : > { %v2303_v24 = vpack.c.bf16 %v2263_v3, %v2263_v3  ;;  %3589 = vmatmul.bf16.gmra.mxu3 %v6758_v45  ;;  %p5516_p4 = pnand %p5515_p1, %p5748_p6 }
 0x2c1   : > { %v2075_v13 = vpop.f32.mrf.mxu0  ;;  %v2359_v35 = vld [vmem:[#allocation2 + $0x88] sm:$0xf]  ;;  %v2681_v6 = vrot.slane %v2680_v18, 4  ;;  %v2668_v12 = vsel %vm6411_vm1, %v4613_v20, %v2667_v19  ;;  %5211 = vmatpush.bf16.msra.mxu1 %v6722_v4  ;;  %5222 = vmatpush.bf16.msra.mxu3 %v6792_v60 }
 0x2c2   : > { %2323 = vst [vmem:[#allocation2 + $0x94] sm:$0xf] %v2303_v24  ;;  %v2076_v30 = vadd.f32 %v2075_v13, %v2017_v8  ;;  %v2671_v41 = vshrl.u32 %v2359_v35, 16  ;;  %v2674_v54 = vshll.u32 %v2359_v35, 16  ;;  %3652 = vmatmul.bf16.vlgmr.msrb.gmra.mxu2 %v5373_v53  ;;  %v2840_v50 = vunpack.c.l.b16 %v2668_v12  ;;  %v2361_v8 = vld [vmem:[#allocation2 + $0x90] sm:$0xf]  ;;  %p5517_p11 = pneg %p5516_p4 }
 0x2c3   : > { %3845 = vmatpush.bf16.msrb.mxu0 %v5142_v31  ;;  %5218 = vmatpush.bf16.msra.mxu2 %v5141_v34  ;;  %v2693_v19 = vshrl.u32 %v2361_v8, 16  ;;  %v2364_v53 = vld [vmem:[#allocation2 + $0x9c] sm:$0xf]  ;;  %v5374_v12 = vld [vmem:[#allocation2 + $0x24] sm:$0xff] }
 0x2c4   : > { %vm2097_vm15 = vcmp.gt.f32.partialorder %v2076_v30, 0.0  ;;  %v2117_v1 = vmul.f32 0.01, %v2076_v30  ;;  %v2673_v37 = vrot.slane %v2671_v41, 7  ;;  %v2682_v10 = vrot.slane %v2674_v54, 5  ;;  %v5152_v8 = vld [vmem:[#allocation9 + $0x20] sm:$0xff] }
 0x2c5   : > { %v2684_v23 = vrot.slane %v2671_v41, 4  ;;  %v3506_v16 = vpop.f32.mrf.mxu2  ;;  %5223 = vmatpush.bf16.msra.mxu3 %v5152_v8 }
 0x2c6   : > { %v2137_v21 = vsel %vm2097_vm15, %v2076_v30, %v2117_v1  ;;  %v2676_v61 = vor.u32 %v2674_v54, %v2673_v37  ;;  %v2683_v5 = vsel %vm5865_vm5, %v2681_v6, %v2682_v10  ;;  %v2724_v37 = vshll.u32 %v2364_v53, 16  ;;  %v5150_v53 = vld [vmem:[#allocation9 + $0x10] sm:$0xff] }
 0x2c7   : > { %v2264_v15 = vsel %vm6751_vm14, %v2137_v21, 0.0  ;;  %v2685_v44 = vor.u32 %v2684_v23, %v2682_v10  ;;  %3846 = vmatpush.bf16.msrb.mxu0 %v5141_v34  ;;  %v2850_v43 = vunpack.c.l.b16 %v2683_v5  ;;  %5219 = vmatpush.bf16.msra.mxu2 %v5140_v25 }
 0x2c8   : > { %v2304_v48 = vpack.c.bf16 %v2264_v15, %v2264_v15  ;;  %v2677_v14 = vsel %vm6411_vm1, %v2669_v39, %v2676_v61 }
 0x2c9   : > { %v2841_v7 = vunpack.c.l.b16 %v2677_v14  ;;  %v2362_v27 = vld [vmem:[#allocation2 + $0x94] sm:$0xf]  ;;  %v2686_v51 = vrot.slane %v2685_v44, 4  ;;  %v2726_v14 = vrot.slane %v2724_v37, 5 }
 0x2ca   : > { %2324 = vst [vmem:[#allocation2 + $0x98] sm:$0xf] %v2304_v48  ;;  %v2698_v38 = vshrl.u32 %v2362_v27, 16  ;;  %v2701_v29 = vshll.u32 %v2362_v27, 16 }
 0x2cb   : > { %v3457_v0 = vpop.f32.mrf.mxu1  ;;  %v6783_v18 = vpack.c.b16 %v2841_v7, %v2840_v50  ;;  %v2691_v24 = vsel %vm5865_vm5, %v2686_v51, %v2690_v58  ;;  %3847 = vmatpush.bf16.msrb.mxu0 %v5140_v25 }
 0x2cc   : > { %v3458_v3 = vadd.f32 %v6777_v9, %v3457_v0  ;;  %v2851_v13 = vunpack.c.l.b16 %v2691_v24  ;;  %v2714_v35 = vrot.slane %v2698_v38, 4  ;;  %v2715_v20 = vrot.slane %v2701_v29, 5 }
 0x2cd   : > { %v3508_v30 = vpop.f32.mrf.mxu2  ;;  %v2700_v41 = vrot.slane %v2698_v38, 7 }
 0x2ce   : > { %3603 = vmatmul.bf16.vlgmr.msrb.gmra.mxu1 %v6470_v2  ;;  %3780 = vmatmul.bf16.gmra.mxu0 %v6783_v18  ;;  %v3507_v4 = vadd.f32 %v3506_v16, %v3458_v3  ;;  %v6789_v54 = vpack.c.b16 %v2851_v13, %v2850_v43  ;;  %v2716_v6 = vor.u32 %v2715_v20, %v2714_v35  ;;  %v4614_v2 = vrot.slane %v2693_v19, 11  ;;  %v5151_v19 = vld [vmem:[#allocation9 + $0x18] sm:$0xff] }
 0x2cf   : > { %v2703_v10 = vor.u32 %v2701_v29, %v2700_v41  ;;  %v2705_v48 = vrot.slane %v2700_v41, 4  ;;  %5224 = vmatpush.bf16.msra.mxu3 %v5151_v19 }
 0x2d0   : > { %3701 = vmatmul.bf16.vlgmr.msrb.gmra.mxu3 %v6483_v49  ;;  %v2717_v61 = vrot.slane %v2716_v6, 4 }
 0x2d1   : > { %v2363_v1 = vld [vmem:[#allocation2 + $0x98] sm:$0xf]  ;;  %v2704_v50 = vsel %vm6411_vm1, %v4614_v2, %v2703_v10  ;;  %v5149_v10 = vld [vmem:[#allocation9 + $0x8] sm:$0xff] }
 0x2d2   : > { %v2707_v39 = vshrl.u32 %v2363_v1, 16  ;;  %v2710_v23 = vshll.u32 %v2363_v1, 16  ;;  %3657 = vmatmul.bf16.gmra.mxu2 %v5374_v12  ;;  %v2854_v29 = vunpack.c.l.b16 %v2704_v50 }
 0x2d3   : > { %v3459_v31 = vpop.f32.mrf.mxu1  ;;  %v3555_v16 = vpop.f32.mrf.mxu3  ;;  %5225 = vmatpush.bf16.msra.mxu3 %v5150_v53 }
 0x2d4   : > { %v3460_v21 = vadd.f32 %v6777_v9, %v3459_v31  ;;  %v6796_v5 = vadd.f32 %v3555_v16, %v3507_v4  ;;  %v2709_v49 = vrot.slane %v2707_v39, 7  ;;  %v2718_v15 = vrot.slane %v2710_v23, 5  ;;  %v6818_v31 = vld [vmem:[#allocation2 + $0x34] sm:$0xff] }
 0x2d5   : > { %v2720_v44 = vrot.slane %v2707_v39, 4  ;;  %v3511_v34 = vpop.f32.mrf.mxu2 }
 0x2d6   : > { %v3509_v58 = vadd.f32 %v3508_v30, %v3460_v21  ;;  %v2712_v7 = vor.u32 %v2710_v23, %v2709_v49  ;;  %v2719_v27 = vsel %vm5865_vm5, %v2717_v61, %v2718_v15  ;;  %v5148_v23 = vld [vmem:[#allocation9] sm:$0xff] }
 0x2d7   : > { %v2721_v51 = vor.u32 %v2720_v44, %v2718_v15  ;;  %v6807_v20 = vunpack.c.l.b16 %v2719_v27  ;;  %5226 = vmatpush.bf16.msra.mxu3 %v5149_v10 }
 0x2d8   : > { %v2713_v0 = vsel %vm6411_vm1, %v2705_v48, %v2712_v7 }
 0x2d9   : > { %v2722_v38 = vrot.slane %v2721_v51, 4  ;;  %v2855_v3 = vunpack.c.l.b16 %v2713_v0 }
 0x2db   : > { %v3462_v24 = vpop.f32.mrf.mxu1  ;;  %v2727_v25 = vsel %vm5865_vm5, %v2722_v38, %v2726_v14  ;;  %v3557_v13 = vpop.f32.mrf.mxu3  ;;  %v2856_v35 = vpack.c.b16 %v2855_v3, %v2854_v29  ;;  %5227 = vmatpush.bf16.msra.mxu3 %v5148_v23 }
 0x2dc   : > { %v3463_v43 = vadd.f32 %v6777_v9, %v3462_v24  ;;  %v6809_v4 = vunpack.c.l.b16 %v2727_v25  ;;  %v6811_v30 = vadd.f32 %v3557_v13, %v3509_v58 }
 0x2dd   : > { %v3513_v41 = vpop.f32.mrf.mxu2 }
 0x2de   : > { %3608 = vmatmul.bf16.gmra.mxu1 %v6511_v22  ;;  %3785 = vmatmul.bf16.gmra.mxu0 %v2856_v35  ;;  %v3512_v33 = vadd.f32 %v3511_v34, %v3463_v43  ;;  %v2866_v47 = vpack.c.b16 %v6809_v4, %v6807_v20 }
 0x2e0   : > { %3706 = vmatmul.bf16.gmra.mxu3 %v6527_v32 }
 0x2e2   : > { %3662 = vmatmul.bf16.gmra.mxu2 %v6818_v31 }
 0x2e3   : > { %v3464_v6 = vpop.f32.mrf.mxu1  ;;  %v3560_v37 = vpop.f32.mrf.mxu3 }
 0x2e4   : > { %v3465_v1 = vadd.f32 %v6777_v9, %v3464_v6  ;;  %v6821_v22 = vadd.f32 %v3560_v37, %v3512_v33 }
 0x2e5   : > { %v3516_v39 = vpop.f32.mrf.mxu2 }
 0x2e6   : > { %v3514_v2 = vadd.f32 %v3513_v41, %v3465_v1 }
 0x2eb   : > { %v3467_v21 = vpop.f32.mrf.mxu1  ;;  %v6823_v16 = vpop.f32.mrf.mxu0 }
 0x2ec   : > { %v3468_v61 = vadd.f32 %v6777_v9, %v3467_v21  ;;  %v3562_v49 = vpop.f32.mrf.mxu3 }
 0x2ed   : > { %v6826_v15 = vadd.f32 %v3562_v49, %v3514_v2  ;;  %v3518_v58 = vpop.f32.mrf.mxu2 }
 0x2ee   : > { %3613 = vmatmul.bf16.gmra.mxu1 %v6555_v17  ;;  %3799 = vmatmul.bf16.vlgmr.msra.gmra.mxu0 %v5374_v12  ;;  %v3517_v44 = vadd.f32 %v3516_v39, %v3468_v61 }
 0x2ef   : > { %3957 = vmatpush.bf16.msra.mxu0 %v6725_v59 }
 0x2f0   : > { %3711 = vmatmul.bf16.gmra.mxu3 %v6569_v52 }
 0x2f2   : > { %3667 = vmatmul.bf16.gmra.mxu2 %v6582_v56 }
 0x2f3   : > { %v3469_v48 = vpop.f32.mrf.mxu1  ;;  %v6831_v14 = vpop.f32.mrf.mxu0  ;;  %3958 = vmatpush.bf16.msra.mxu0 %v6763_v63 }
 0x2f4   : > { %v3470_v34 = vadd.f32 %v6777_v9, %v3469_v48  ;;  %v3565_v50 = vpop.f32.mrf.mxu3 }
 0x2f5   : > { %v6836_v7 = vadd.f32 %v3565_v50, %v3517_v44  ;;  %v3521_v12 = vpop.f32.mrf.mxu2 }
 0x2f6   : > { %v3519_v17 = vadd.f32 %v3518_v58, %v3470_v34 }
 0x2f7   : > { %3959 = vmatpush.bf16.msra.mxu0 %v6792_v60 }
 0x2fb   : > { %v3472_v59 = vpop.f32.mrf.mxu1  ;;  %v6839_v27 = vpop.f32.mrf.mxu0  ;;  %3960 = vmatpush.bf16.msra.mxu0 %v5152_v8 }
 0x2fc   : > { %v3473_v51 = vadd.f32 %v6777_v9, %v3472_v59  ;;  %v3567_v0 = vpop.f32.mrf.mxu3 }
 0x2fd   : > { %v6842_v38 = vadd.f32 %v3567_v0, %v3519_v17  ;;  %v3523_v63 = vpop.f32.mrf.mxu2 }
 0x2fe   : > { %3618 = vmatmul.bf16.gmra.mxu1 %v6598_v28  ;;  %3848 = vmatmul.bf16.vlgmr.msrb.gmra.mxu0 %v6527_v32  ;;  %v3522_v56 = vadd.f32 %v3521_v12, %v3473_v51 }
 0x2ff   : > { %3961 = vmatpush.bf16.msra.mxu0 %v5151_v19  ;;  %v7196_v19 = vld [vmem:[#allocation24_spill] sm:$0xff] }
 0x300   : > { %3716 = vmatmul.bf16.gmra.mxu3 %v6610_v55 }
 0x302   : > { %3672 = vmatmul.bf16.gmra.mxu2 %v6627_v11 }
 0x303   : > { %v3474_v60 = vpop.f32.mrf.mxu1  ;;  %v6847_v29 = vpop.f32.mrf.mxu0  ;;  %3962 = vmatpush.bf16.msra.mxu0 %v5150_v53 }
 0x304   : > { %v3475_v3 = vadd.f32 %v6777_v9, %v3474_v60  ;;  %v3570_v8 = vpop.f32.mrf.mxu3 }
 0x305   : > { %v6851_v24 = vadd.f32 %v3570_v8, %v3522_v56  ;;  %v3526_v28 = vpop.f32.mrf.mxu2 }
 0x306   : > { %v3524_v25 = vadd.f32 %v3523_v63, %v3475_v3 }
 0x307   : > { %3963 = vmatpush.bf16.msra.mxu0 %v5149_v10 }
 0x30b   : > { %v3477_v32 = vpop.f32.mrf.mxu1  ;;  %v6853_v43 = vpop.f32.mrf.mxu0  ;;  %3964 = vmatpush.bf16.msra.mxu0 %v5148_v23 }
 0x30c   : > { %v3478_v13 = vadd.f32 %v6777_v9, %v3477_v32  ;;  %v3572_v35 = vpop.f32.mrf.mxu3 }
 0x30d   : > { %v6856_v33 = vadd.f32 %v3572_v35, %v3524_v25  ;;  %v3528_v11 = vpop.f32.mrf.mxu2  ;;  %v6887_v25 = vld [vmem:[#allocation2 + $0x84] sm:$0xff] }
 0x30e   : > { %3623 = vmatmul.bf16.gmra.mxu1 %v6651_v46  ;;  %3965 = vmatmul.bf16.vlgmr.msra.gmra.mxu0 %v7196_v19  ;;  %v3527_v41 = vadd.f32 %v3526_v28, %v3478_v13 }
 0x310   : > { %3721 = vmatmul.bf16.gmra.mxu3 %v6666_v36 }
 0x312   : > { %3677 = vmatmul.bf16.gmra.mxu2 %v6679_v40 }
 0x313   : > { %v3479_v53 = vpop.f32.mrf.mxu1  ;;  %v6861_v6 = vpop.f32.mrf.mxu0 }
 0x314   : > { %v3480_v1 = vadd.f32 %v6777_v9, %v3479_v53  ;;  %v3575_v37 = vpop.f32.mrf.mxu3 }
 0x315   : > { %v6865_v2 = vadd.f32 %v3575_v37, %v3527_v41  ;;  %v3531_v39 = vpop.f32.mrf.mxu2 }
 0x316   : > { %v3529_v10 = vadd.f32 %v3528_v11, %v3480_v1 }
 0x31b   : > { %v3482_v23 = vpop.f32.mrf.mxu1  ;;  %v6867_v46 = vpop.f32.mrf.mxu0 }
 0x31c   : > { %v3483_v21 = vadd.f32 %v6777_v9, %v3482_v23  ;;  %v3577_v61 = vpop.f32.mrf.mxu3 }
 0x31d   : > { %v6870_v49 = vadd.f32 %v3577_v61, %v3529_v10  ;;  %v3533_v58 = vpop.f32.mrf.mxu2 }
 0x31e   : > { %3628 = vmatmul.bf16.gmra.mxu1 %v6700_v42  ;;  %v3532_v44 = vadd.f32 %v3531_v39, %v3483_v21 }
 0x320   : > { %3726 = vmatmul.bf16.gmra.mxu3 %v6716_v26 }
 0x322   : > { %3682 = vmatmul.bf16.gmra.mxu2 %v6729_v57 }
 0x323   : > { %v3484_v48 = vpop.f32.mrf.mxu1  ;;  %v6874_v34 = vpop.f32.mrf.mxu0 }
 0x324   : > { %v3485_v50 = vadd.f32 %v6777_v9, %v3484_v48  ;;  %v3580_v17 = vpop.f32.mrf.mxu3 }
 0x325   : > { %v6878_v12 = vadd.f32 %v3580_v17, %v3532_v44  ;;  %v3536_v51 = vpop.f32.mrf.mxu2 }
 0x326   : > { %v3534_v59 = vadd.f32 %v3533_v58, %v3485_v50 }
 0x32b   : > { %v3487_v0 = vpop.f32.mrf.mxu1  ;;  %v6880_v56 = vpop.f32.mrf.mxu0 }
 0x32c   : > { %v3488_v42 = vadd.f32 %v6777_v9, %v3487_v0  ;;  %v3582_v63 = vpop.f32.mrf.mxu3 }
 0x32d   : > { %v6883_v60 = vadd.f32 %v3582_v63, %v3534_v59  ;;  %v3538_v8 = vpop.f32.mrf.mxu2  ;;  %v7197_v63 = vld [vmem:[#allocation25_spill] sm:$0xff] }
 0x32e   : > { %3633 = vmatmul.bf16.gmra.mxu1 %v6745_v62  ;;  %v3537_v3 = vadd.f32 %v3536_v51, %v3488_v42 }
 0x330   : > { %3731 = vmatmul.bf16.gmra.mxu3 %v6758_v45 }
 0x332   : > { %3687 = vmatmul.bf16.gmra.mxu2 %v6887_v25 }
 0x333   : > { %v3489_v28 = vpop.f32.mrf.mxu1  ;;  %v6889_v32 = vpop.f32.mrf.mxu0 }
 0x334   : > { %v3490_v13 = vadd.f32 %v6777_v9, %v3489_v28  ;;  %v3585_v35 = vpop.f32.mrf.mxu3 }
 0x335   : > { %v6893_v19 = vadd.f32 %v3585_v35, %v3537_v3  ;;  %v3541_v11 = vpop.f32.mrf.mxu2 }
 0x336   : > { %v3539_v41 = vadd.f32 %v3538_v8, %v3490_v13 }
 0x33b   : > { %v3492_v53 = vpop.f32.mrf.mxu1  ;;  %v6895_v62 = vpop.f32.mrf.mxu0 }
 0x33c   : > { %v3493_v1 = vadd.f32 %v6777_v9, %v3492_v53  ;;  %v3587_v37 = vpop.f32.mrf.mxu3 }
 0x33d   : > { %v6898_v10 = vadd.f32 %v3587_v37, %v3539_v41  ;;  %v3543_v23 = vpop.f32.mrf.mxu2 }
 0x33e   : > { %3638 = vmatmul.bf16.gmra.mxu1 %v6783_v18  ;;  %v3542_v39 = vadd.f32 %v3541_v11, %v3493_v1  ;;  %v5376_v11 = vld [vmem:[#allocation2 + $0x44] sm:$0xff]  ;;  %v7198_v1 = vld [vmem:[#allocation26_spill] sm:$0xff] }
 0x340   : > { %3736 = vmatmul.bf16.gmra.mxu3 %v6789_v54 }
 0x342   : > { %3853 = vmatmul.bf16.vlgmr.msra.gmra.mxu2 %v6569_v52 }
 0x343   : > { %v3494_v21 = vpop.f32.mrf.mxu1  ;;  %v6902_v61 = vpop.f32.mrf.mxu0 }
 0x344   : > { %v3495_v44 = vadd.f32 %v6777_v9, %v3494_v21  ;;  %v3590_v58 = vpop.f32.mrf.mxu3 }
 0x345   : > { %v6906_v48 = vadd.f32 %v3590_v58, %v3542_v39  ;;  %v6908_v17 = vpop.f32.mrf.mxu2 }
 0x346   : > { %v3544_v50 = vadd.f32 %v3543_v23, %v3495_v44 }
 0x34b   : > { %v3604_v59 = vpop.f32.mrf.mxu1  ;;  %v6910_v51 = vpop.f32.mrf.mxu0 }
 0x34c   : > { %v3592_v18 = vpop.f32.mrf.mxu3 }
 0x34d   : > { %v6912_v0 = vadd.f32 %v3592_v18, %v3544_v50  ;;  %v6915_v42 = vpop.f32.mrf.mxu2 }
 0x34e   : > { %3804 = vmatmul.bf16.vlgmr.msra.gmra.mxu1 %v6818_v31 }
 0x350   : > { %3970 = vmatmul.bf16.vlgmr.msra.gmra.mxu3 %v7197_v63 }
 0x352   : > { %3858 = vmatmul.bf16.gmra.mxu2 %v6610_v55 }
 0x353   : > { %v3606_v9 = vpop.f32.mrf.mxu1  ;;  %v6918_v3 = vpop.f32.mrf.mxu0 }
 0x354   : > { %v3702_v52 = vpop.f32.mrf.mxu3 }
 0x355   : > { %v3658_v8 = vpop.f32.mrf.mxu2 }
 0x35b   : > { %v3609_v28 = vpop.f32.mrf.mxu1  ;;  %v6921_v13 = vpop.f32.mrf.mxu0 }
 0x35c   : > { %v3610_v35 = vadd.f32 %v3609_v28, %v6821_v22  ;;  %v3704_v41 = vpop.f32.mrf.mxu3  ;;  %v5377_v28 = vld [vmem:[#allocation2 + $0x54] sm:$0xff] }
 0x35d   : > { %v3660_v53 = vpop.f32.mrf.mxu2 }
 0x35e   : > { %3809 = vmatmul.bf16.gmra.mxu1 %v5376_v11  ;;  %v3659_v31 = vadd.f32 %v3658_v8, %v3610_v35 }
 0x360   : > { %3975 = vmatmul.bf16.gmra.mxu3 %v7198_v1  ;;  %v7199_v1 = vld [vmem:[#allocation27_spill] sm:$0xff] }
 0x362   : > { %3863 = vmatmul.bf16.gmra.mxu2 %v6666_v36 }
 0x363   : > { %v3611_v37 = vpop.f32.mrf.mxu1  ;;  %v6925_v39 = vpop.f32.mrf.mxu0 }
 0x364   : > { %v3612_v23 = vadd.f32 %v3611_v37, %v6826_v15  ;;  %v3707_v21 = vpop.f32.mrf.mxu3 }
 0x365   : > { %v6929_v55 = vadd.f32 %v3707_v21, %v3659_v31  ;;  %v3663_v58 = vpop.f32.mrf.mxu2 }
 0x366   : > { %v3661_v44 = vadd.f32 %v3660_v53, %v3612_v23 }
 0x36b   : > { %v3614_v22 = vpop.f32.mrf.mxu1  ;;  %v3800_v50 = vpop.f32.mrf.mxu0 }
 0x36c   : > { %v3615_v18 = vadd.f32 %v3614_v22, %v6836_v7  ;;  %v3709_v63 = vpop.f32.mrf.mxu3 }
 0x36d   : > { %v6932_v8 = vadd.f32 %v3709_v63, %v3661_v44  ;;  %v3665_v11 = vpop.f32.mrf.mxu2 }
 0x36e   : > { %3814 = vmatmul.bf16.gmra.mxu1 %v5377_v28  ;;  %v3664_v35 = vadd.f32 %v3663_v58, %v3615_v18 }
 0x370   : > { %3980 = vmatmul.bf16.gmra.mxu3 %v7199_v1  ;;  %v7200_v1 = vld [vmem:[#allocation28_spill] sm:$0xff] }
 0x372   : > { %3868 = vmatmul.bf16.gmra.mxu2 %v6716_v26 }
 0x373   : > { %v3616_v15 = vpop.f32.mrf.mxu1  ;;  %v3802_v37 = vpop.f32.mrf.mxu0 }
 0x374   : > { %v3617_v36 = vadd.f32 %v3616_v15, %v6842_v38  ;;  %v3712_v31 = vpop.f32.mrf.mxu3  ;;  %v3605_v38 = vadd.f32 %v3604_v59, %v6796_v5  ;;  %v6955_v5 = vld [vmem:[%s7201_s21] ss:$0 sm:$0xff]  ;;  %s5518_s21 = scalar_lea.hbm %s7207_s5, 256 }
 0x375   : > { %v6937_v53 = vadd.f32 %v3712_v31, %v3664_v35  ;;  %v3668_v7 = vpop.f32.mrf.mxu2  ;;  %p5520_p2 = scmp.lt.s32.totalorder %s5518_s21, %s5514_s18 }
 0x376   : > { %v3666_v23 = vadd.f32 %v3665_v11, %v3617_v36  ;;  %v3654_v31 = vadd.f32 %v6908_v17, %v3605_v38  ;;  %v7203_v38 = vld [vmem:[#allocation29_spill] sm:$0xff] }
 0x377   : > { %p5521_p3 = por %p5520_p2, %p5519_p0 }
 0x379   : > { %p5522_p5 = pnand %p5521_p3, %p5517_p11 }
 0x37b   : > { %v3619_v21 = vpop.f32.mrf.mxu1  ;;  %v3849_v44 = vpop.f32.mrf.mxu0 }
 0x37c   : > { %v3620_v22 = vadd.f32 %v3619_v21, %v6851_v24  ;;  %v3714_v63 = vpop.f32.mrf.mxu3  ;;  %v3607_v24 = vadd.f32 %v3606_v9, %v6811_v30 }
 0x37d   : > { %v6940_v58 = vadd.f32 %v3714_v63, %v3666_v23  ;;  %v3670_v28 = vpop.f32.mrf.mxu2 }
 0x37e   : > { %3819 = vmatmul.bf16.gmra.mxu1 %v6679_v40  ;;  %v3669_v18 = vadd.f32 %v3668_v7, %v3620_v22  ;;  %v3703_v7 = vadd.f32 %v3702_v52, %v3654_v31  ;;  %v3656_v21 = vadd.f32 %v6915_v42, %v3607_v24 }
 0x380   : > { %3985 = vmatmul.bf16.gmra.mxu3 %v7200_v1  ;;  %v3705_v22 = vadd.f32 %v3704_v41, %v3656_v21 }
 0x382   : > { %3873 = vmatmul.bf16.gmra.mxu2 %v6758_v45  ;;  %v3752_v45 = vadd.f32 %v6823_v16, %v3703_v7 }
 0x383   : > { %v3621_v26 = vpop.f32.mrf.mxu1  ;;  %v3851_v35 = vpop.f32.mrf.mxu0 }
 0x384   : > { %v3622_v11 = vadd.f32 %v3621_v26, %v6856_v33  ;;  %v3717_v15 = vpop.f32.mrf.mxu3  ;;  %v3801_v17 = vadd.f32 %v3800_v50, %v3752_v45  ;;  %v7204_v45 = vld [vmem:[#allocation30_spill] sm:$0xff] }
 0x385   : > { %v6947_v36 = vadd.f32 %v3717_v15, %v3669_v18  ;;  %v3673_v23 = vpop.f32.mrf.mxu2 }
 0x386   : > { %v3671_v40 = vadd.f32 %v3670_v28, %v3622_v11  ;;  %v3754_v28 = vadd.f32 %v6831_v14, %v3705_v22  ;;  %v3850_v1 = vadd.f32 %v3849_v44, %v3801_v17 }
 0x388   : > { %v3803_v16 = vadd.f32 %v3802_v37, %v3754_v28 }
 0x38a   : > { %v3852_v11 = vadd.f32 %v3851_v35, %v3803_v16 }
 0x38b   : > { %v3624_v33 = vpop.f32.mrf.mxu1  ;;  %v3966_v59 = vpop.f32.mrf.mxu0 }
 0x38c   : > { %v3625_v63 = vadd.f32 %v3624_v33, %v6865_v2  ;;  %v3719_v30 = vpop.f32.mrf.mxu3  ;;  %v3967_v52 = vadd.f32 %v6955_v5, %v3966_v59 }
 0x38d   : > { %v6959_v9 = vadd.f32 %v3719_v30, %v3671_v40  ;;  %v3675_v18 = vpop.f32.mrf.mxu2 }
 0x38e   : > { %3824 = vmatmul.bf16.gmra.mxu1 %v6729_v57  ;;  %v3674_v42 = vadd.f32 %v3673_v23, %v3625_v63  ;;  %v4006_v41 = vadd.f32 %v3967_v52, %v3850_v1  ;;  %v5075_v1 = vld [vmem:[#allocation2 + $0x94] sm:$0xff] }
 0x390   : > { %3990 = vmatmul.bf16.gmra.mxu3 %v7203_v38  ;;  %v4038_v14 = vmul.f32 0.01, %v4006_v41  ;;  %vm4022_vm5 = vcmp.gt.f32.partialorder %v4006_v41, 0.0 }
 0x392   : > { %3878 = vmatmul.bf16.gmra.mxu2 %v6789_v54  ;;  %v4054_v35 = vsel %vm4022_vm5, %v4006_v41, %v4038_v14 }
 0x393   : > { %v3626_v2 = vpop.f32.mrf.mxu1  ;;  %v3968_v26 = vpop.f32.mrf.mxu0 }
 0x394   : > { %v3627_v15 = vadd.f32 %v3626_v2, %v6870_v49  ;;  %v3722_v50 = vpop.f32.mrf.mxu3  ;;  %v3969_v24 = vadd.f32 %v6955_v5, %v3968_v26 }
 0x395   : > { %v6969_v57 = vadd.f32 %v3722_v50, %v3674_v42  ;;  %v3678_v37 = vpop.f32.mrf.mxu2 }
 0x396   : > { %v4007_v44 = vadd.f32 %v3969_v24, %v3852_v11  ;;  %v3676_v31 = vadd.f32 %v3675_v18, %v3627_v15 }
 0x398   : > { %vm4023_vm1 = vcmp.gt.f32.partialorder %v4007_v44, 0.0  ;;  %v4039_v40 = vmul.f32 0.01, %v4007_v44 }
 0x39a   : > { %v4055_v23 = vsel %vm4023_vm1, %v4007_v44, %v4039_v40 }
 0x39b   : > { %v5160_v49 = vpack.c.bf16 %v4055_v23, %v4054_v35  ;;  %v3629_v7 = vpop.f32.mrf.mxu1 }
 0x39c   : > { %v3630_v21 = vadd.f32 %v3629_v7, %v6878_v12  ;;  %v3724_v33 = vpop.f32.mrf.mxu3 }
 0x39d   : > { %5161 = vst [vmem:[%s6974_s1] sm:$0xff] %v5160_v49   ;;  %v6977_v54 = vadd.f32 %v3724_v33, %v3676_v31  ;;  %v3680_v22 = vpop.f32.mrf.mxu2 }
 0x39e   : > { %3829 = vmatmul.bf16.gmra.mxu1 %v6887_v25  ;;  %v3679_v59 = vadd.f32 %v3678_v37, %v3630_v21 }
 0x3a0   : > { %3995 = vmatmul.bf16.gmra.mxu3 %v7204_v45 }
 0x3a2   : > { %3883 = vmatmul.bf16.gmra.mxu2 %v2866_v47 }
 0x3a3   : > { %v3631_v63 = vpop.f32.mrf.mxu1 }
 0x3a4   : > { %v3632_v30 = vadd.f32 %v3631_v63, %v6883_v60  ;;  %v3727_v17 = vpop.f32.mrf.mxu3  ;;  %v7205_v60 = vld [vmem:[#allocation31_spill] sm:$0xff]  ;;  %v3759_v63 = vadd.f32 %v6847_v29, %v6932_v8  ;;  %v3762_v29 = vadd.f32 %v6853_v43, %v6937_v53 }
 0x3a5   : > { %v6985_v12 = vadd.f32 %v3727_v17, %v3679_v59  ;;  %v3683_v42 = vpop.f32.mrf.mxu2 }
 0x3a6   : > { %v3681_v52 = vadd.f32 %v3680_v22, %v3632_v30 }
 0x3ab   : > { %v3634_v18 = vpop.f32.mrf.mxu1 }
 0x3ac   : > { %v3635_v28 = vadd.f32 %v3634_v18, %v6893_v19  ;;  %v3729_v25 = vpop.f32.mrf.mxu3 }
 0x3ad   : > { %v6988_v38 = vadd.f32 %v3729_v25, %v3681_v52  ;;  %v3685_v41 = vpop.f32.mrf.mxu2 }
 0x3ae   : > { %3834 = vmatmul.bf16.gmra.mxu1 %v5075_v1  ;;  %v3684_v16 = vadd.f32 %v3683_v42, %v3635_v28 }
 0x3b0   : > { %4000 = vmatmul.bf16.gmra.mxu3 %v7205_v60 }
 0x3b3   : > { %v3636_v2 = vpop.f32.mrf.mxu1 }
 0x3b4   : > { %v3637_v20 = vadd.f32 %v3636_v2, %v6898_v10  ;;  %v3732_v4 = vpop.f32.mrf.mxu3 }
 0x3b5   : > { %v6992_v47 = vadd.f32 %v3732_v4, %v3684_v16  ;;  %v3688_v11 = vpop.f32.mrf.mxu2 }
 0x3b6   : > { %v3686_v26 = vadd.f32 %v3685_v41, %v3637_v20 }
 0x3bb   : > { %v3639_v15 = vpop.f32.mrf.mxu1 }
 0x3bc   : > { %v3640_v19 = vadd.f32 %v3639_v15, %v6906_v48  ;;  %v3734_v50 = vpop.f32.mrf.mxu3  ;;  %v3757_v48 = vadd.f32 %v6839_v27, %v6929_v55 }
 0x3bd   : > { %v6995_v24 = vadd.f32 %v3734_v50, %v3686_v26  ;;  %v3690_v44 = vpop.f32.mrf.mxu2 }
 0x3be   : > { %v3689_v14 = vadd.f32 %v3688_v11, %v3640_v19  ;;  %v3764_v11 = vadd.f32 %v6861_v6, %v6940_v58  ;;  %v3767_v6 = vadd.f32 %v6867_v46, %v6947_v36 }
 0x3c3   : > { %v3641_v31 = vpop.f32.mrf.mxu1 }
 0x3c4   : > { %v3642_v37 = vadd.f32 %v3641_v31, %v6912_v0  ;;  %v3737_v40 = vpop.f32.mrf.mxu3 }
 0x3c5   : > { %v6998_v35 = vadd.f32 %v3737_v40, %v3689_v14  ;;  %v3854_v23 = vpop.f32.mrf.mxu2 }
 0x3c6   : > { %v3691_v10 = vadd.f32 %v3690_v44, %v3642_v37 }
 0x3cb   : > { %v3805_v49 = vpop.f32.mrf.mxu1 }
 0x3cc   : > { %v3739_v7 = vpop.f32.mrf.mxu3  ;;  %v3806_v45 = vadd.f32 %v3805_v49, %v3757_v48 }
 0x3cd   : > { %v7000_v21 = vadd.f32 %v3739_v7, %v3691_v10  ;;  %v3856_v33 = vpop.f32.mrf.mxu2 }
 0x3ce   : > { %v3855_v17 = vadd.f32 %v3854_v23, %v3806_v45  ;;  %v3769_v45 = vadd.f32 %v6874_v34, %v6959_v9  ;;  %v3772_v34 = vadd.f32 %v6880_v56, %v6969_v57 }
 0x3d3   : > { %v3807_v59 = vpop.f32.mrf.mxu1 }
 0x3d4   : > { %v3971_v22 = vpop.f32.mrf.mxu3  ;;  %v3808_v52 = vadd.f32 %v3807_v59, %v3759_v63 }
 0x3d5   : > { %v3972_v0 = vadd.f32 %v6955_v5, %v3971_v22  ;;  %v3859_v30 = vpop.f32.mrf.mxu2 }
 0x3d6   : > { %v3857_v25 = vadd.f32 %v3856_v33, %v3808_v52 }
 0x3d7   : > { %v4008_v42 = vadd.f32 %v3972_v0, %v3855_v17 }
 0x3d9   : > { %v4040_v16 = vmul.f32 0.01, %v4008_v42  ;;  %vm4024_vm0 = vcmp.gt.f32.partialorder %v4008_v42, 0.0 }
 0x3db   : > { %v3810_v18 = vpop.f32.mrf.mxu1  ;;  %v4056_v60 = vsel %vm4024_vm0, %v4008_v42, %v4040_v16 }
 0x3dc   : > { %v3973_v28 = vpop.f32.mrf.mxu3  ;;  %v3811_v26 = vadd.f32 %v3810_v18, %v3762_v29 }
 0x3dd   : > { %v3974_v1 = vadd.f32 %v6955_v5, %v3973_v28  ;;  %v3861_v55 = vpop.f32.mrf.mxu2 }
 0x3de   : > { %v3860_v50 = vadd.f32 %v3859_v30, %v3811_v26 }
 0x3df   : > { %v4009_v27 = vadd.f32 %v3974_v1, %v3857_v25 }
 0x3e1   : > { %vm4025_vm2 = vcmp.gt.f32.partialorder %v4009_v27, 0.0  ;;  %v4041_v41 = vmul.f32 0.01, %v4009_v27 }
 0x3e3   : > { %v4057_v8 = vsel %vm4025_vm2, %v4009_v27, %v4041_v41  ;;  %v3812_v2 = vpop.f32.mrf.mxu1 }
 0x3e4   : > { %v5165_v20 = vpack.c.bf16 %v4057_v8, %v4056_v60  ;;  %v3976_v4 = vpop.f32.mrf.mxu3  ;;  %v3813_v14 = vadd.f32 %v3812_v2, %v3764_v11  ;;  %v3774_v8 = vadd.f32 %v6889_v32, %v6977_v54  ;;  %v3777_v32 = vadd.f32 %v6895_v62, %v6985_v12 }
 0x3e5   : > { %v3977_v15 = vadd.f32 %v6955_v5, %v3976_v4  ;;  %v3864_v19 = vpop.f32.mrf.mxu2 }
 0x3e6   : > { %5197 = vst [vmem:[%s6974_s1 + $0x8] sm:$0xff] %v5165_v20   ;;  %v3862_v40 = vadd.f32 %v3861_v55, %v3813_v14 }
 0x3e7   : > { %v4010_v44 = vadd.f32 %v3977_v15, %v3860_v50 }
 0x3e9   : > { %v4042_v53 = vmul.f32 0.01, %v4010_v44  ;;  %vm4026_vm3 = vcmp.gt.f32.partialorder %v4010_v44, 0.0 }
 0x3eb   : > { %v3815_v31 = vpop.f32.mrf.mxu1  ;;  %v4058_v7 = vsel %vm4026_vm3, %v4010_v44, %v4042_v53 }
 0x3ec   : > { %v3978_v37 = vpop.f32.mrf.mxu3  ;;  %v3816_v22 = vadd.f32 %v3815_v31, %v3767_v6 }
 0x3ed   : > { %v3979_v43 = vadd.f32 %v6955_v5, %v3978_v37  ;;  %v3866_v23 = vpop.f32.mrf.mxu2 }
 0x3ee   : > { %v3865_v30 = vadd.f32 %v3864_v19, %v3816_v22 }
 0x3ef   : > { %v4011_v10 = vadd.f32 %v3979_v43, %v3862_v40 }
 0x3f1   : > { %vm4027_vm4 = vcmp.gt.f32.partialorder %v4011_v10, 0.0  ;;  %v4043_v49 = vmul.f32 0.01, %v4011_v10 }
 0x3f3   : > { %v4059_v58 = vsel %vm4027_vm4, %v4011_v10, %v4043_v49  ;;  %v3817_v33 = vpop.f32.mrf.mxu1 }
 0x3f4   : > { %v5170_v48 = vpack.c.bf16 %v4059_v58, %v4058_v7  ;;  %v3981_v59 = vpop.f32.mrf.mxu3  ;;  %v3818_v17 = vadd.f32 %v3817_v33, %v3769_v45 }
 0x3f5   : > { %v3982_v63 = vadd.f32 %v6955_v5, %v3981_v59  ;;  %v3869_v0 = vpop.f32.mrf.mxu2 }
 0x3f6   : > { %5198 = vst [vmem:[%s6974_s1 + $0x10] sm:$0xff] %v5170_v48   ;;  %v3867_v28 = vadd.f32 %v3866_v23, %v3818_v17  ;;  %v3779_v23 = vadd.f32 %v6902_v61, %v6988_v38  ;;  %v3782_v61 = vadd.f32 %v6910_v51, %v6992_v47 }
 0x3f7   : > { %v4012_v52 = vadd.f32 %v3982_v63, %v3865_v30 }
 0x3f9   : > { %v4044_v36 = vmul.f32 0.01, %v4012_v52  ;;  %vm4028_vm6 = vcmp.gt.f32.partialorder %v4012_v52, 0.0 }
 0x3fb   : > { %v3820_v42 = vpop.f32.mrf.mxu1  ;;  %v4060_v27 = vsel %vm4028_vm6, %v4012_v52, %v4044_v36 }
 0x3fc   : > { %v3983_v18 = vpop.f32.mrf.mxu3  ;;  %v3821_v29 = vadd.f32 %v3820_v42, %v3772_v34 }
 0x3fd   : > { %v3984_v46 = vadd.f32 %v6955_v5, %v3983_v18  ;;  %v3871_v1 = vpop.f32.mrf.mxu2  ;;  %v3784_v18 = vadd.f32 %v6918_v3, %v6995_v24 }
 0x3fe   : > { %v3870_v20 = vadd.f32 %v3869_v0, %v3821_v29 }
 0x3ff   : > { %v4013_v25 = vadd.f32 %v3984_v46, %v3867_v28 }
 0x401   : > { %vm4029_vm7 = vcmp.gt.f32.partialorder %v4013_v25, 0.0  ;;  %v4045_v16 = vmul.f32 0.01, %v4013_v25 }
 0x403   : > { %v4061_v9 = vsel %vm4029_vm7, %v4013_v25, %v4045_v16  ;;  %v3822_v55 = vpop.f32.mrf.mxu1 }
 0x404   : > { %v5175_v41 = vpack.c.bf16 %v4061_v9, %v4060_v27  ;;  %v3986_v60 = vpop.f32.mrf.mxu3  ;;  %v3823_v4 = vadd.f32 %v3822_v55, %v3774_v8 }
 0x405   : > { %v3987_v2 = vadd.f32 %v6955_v5, %v3986_v60  ;;  %v3874_v26 = vpop.f32.mrf.mxu2 }
 0x406   : > { %5199 = vst [vmem:[%s6974_s1 + $0x18] sm:$0xff] %v5175_v41   ;;  %v3872_v50 = vadd.f32 %v3871_v1, %v3823_v4  ;;  %v3787_v41 = vadd.f32 %v6921_v13, %v6998_v35  ;;  %v3789_v4 = vadd.f32 %v6925_v39, %v7000_v21 }
 0x407   : > { %v4014_v11 = vadd.f32 %v3987_v2, %v3870_v20 }
 0x409   : > { %v4046_v57 = vmul.f32 0.01, %v4014_v11  ;;  %vm4030_vm8 = vcmp.gt.f32.partialorder %v4014_v11, 0.0 }
 0x40b   : > { %v3825_v15 = vpop.f32.mrf.mxu1  ;;  %v4062_v31 = vsel %vm4030_vm8, %v4014_v11, %v4046_v57 }
 0x40c   : > { %v3988_v19 = vpop.f32.mrf.mxu3  ;;  %v3826_v10 = vadd.f32 %v3825_v15, %v3777_v32 }
 0x40d   : > { %v3989_v56 = vadd.f32 %v6955_v5, %v3988_v19  ;;  %v3876_v43 = vpop.f32.mrf.mxu2 }
 0x40e   : > { %v3875_v7 = vadd.f32 %v3874_v26, %v3826_v10 }
 0x40f   : > { %v4015_v14 = vadd.f32 %v3989_v56, %v3872_v50 }
 0x411   : > { %vm4031_vm9 = vcmp.gt.f32.partialorder %v4015_v14, 0.0  ;;  %v4047_v44 = vmul.f32 0.01, %v4015_v14 }
 0x413   : > { %v4063_v54 = vsel %vm4031_vm9, %v4015_v14, %v4047_v44  ;;  %v3827_v37 = vpop.f32.mrf.mxu1 }
 0x414   : > { %v5180_v40 = vpack.c.bf16 %v4063_v54, %v4062_v31  ;;  %v3991_v53 = vpop.f32.mrf.mxu3  ;;  %v3828_v6 = vadd.f32 %v3827_v37, %v3779_v23 }
 0x415   : > { %v3992_v49 = vadd.f32 %v6955_v5, %v3991_v53  ;;  %v3879_v12 = vpop.f32.mrf.mxu2 }
 0x416   : > { %5200 = vst [vmem:[%s6974_s1 + $0x20] sm:$0xff] %v5180_v40   ;;  %v3877_v59 = vadd.f32 %v3876_v43, %v3828_v6 }
 0x417   : > { %v4016_v58 = vadd.f32 %v3992_v49, %v3875_v7 }
 0x419   : > { %v4048_v22 = vmul.f32 0.01, %v4016_v58  ;;  %vm4032_vm10 = vcmp.gt.f32.partialorder %v4016_v58, 0.0 }
 0x41b   : > { %v3830_v33 = vpop.f32.mrf.mxu1  ;;  %v4064_v0 = vsel %vm4032_vm10, %v4016_v58, %v4048_v22 }
 0x41c   : > { %v3993_v48 = vpop.f32.mrf.mxu3  ;;  %v3831_v42 = vadd.f32 %v3830_v33, %v3782_v61 }
 0x41d   : > { %v3994_v62 = vadd.f32 %v6955_v5, %v3993_v48  ;;  %v3881_v46 = vpop.f32.mrf.mxu2 }
 0x41e   : > { %v3880_v36 = vadd.f32 %v3879_v12, %v3831_v42 }
 0x41f   : > { %v4017_v45 = vadd.f32 %v3994_v62, %v3877_v59 }
 0x421   : > { %vm4033_vm11 = vcmp.gt.f32.partialorder %v4017_v45, 0.0  ;;  %v4049_v63 = vmul.f32 0.01, %v4017_v45 }
 0x423   : > { %v4065_v38 = vsel %vm4033_vm11, %v4017_v45, %v4049_v63  ;;  %v3832_v30 = vpop.f32.mrf.mxu1 }
 0x424   : > { %v5185_v17 = vpack.c.bf16 %v4065_v38, %v4064_v0  ;;  %v3996_v52 = vpop.f32.mrf.mxu3  ;;  %v3833_v25 = vadd.f32 %v3832_v30, %v3784_v18 }
 0x425   : > { %v3997_v28 = vadd.f32 %v6955_v5, %v3996_v52  ;;  %v3884_v3 = vpop.f32.mrf.mxu2 }
 0x426   : > { %5201 = vst [vmem:[%s6974_s1 + $0x28] sm:$0xff] %v5185_v17   ;;  %v3882_v51 = vadd.f32 %v3881_v46, %v3833_v25 }
 0x427   : > { %v4018_v1 = vadd.f32 %v3997_v28, %v3880_v36 }
 0x429   : > { %v4050_v34 = vmul.f32 0.01, %v4018_v1  ;;  %vm4034_vm12 = vcmp.gt.f32.partialorder %v4018_v1, 0.0 }
 0x42b   : > { %v3835_v16 = vpop.f32.mrf.mxu1  ;;  %v4066_v24 = vsel %vm4034_vm12, %v4018_v1, %v4050_v34 }
 0x42c   : > { %v3998_v27 = vpop.f32.mrf.mxu3  ;;  %v3836_v2 = vadd.f32 %v3835_v16, %v3787_v41 }
 0x42d   : > { %v3999_v47 = vadd.f32 %v6955_v5, %v3998_v27  ;;  %v3886_v13 = vpop.f32.mrf.mxu2 }
 0x42e   : > { %v3885_v11 = vadd.f32 %v3884_v3, %v3836_v2 }
 0x42f   : > { %v4019_v9 = vadd.f32 %v3999_v47, %v3882_v51 }
 0x431   : > { %vm4035_vm13 = vcmp.gt.f32.partialorder %v4019_v9, 0.0  ;;  %v4051_v55 = vmul.f32 0.01, %v4019_v9 }
 0x433   : > { %v4067_v60 = vsel %vm4035_vm13, %v4019_v9, %v4051_v55  ;;  %v3837_v20 = vpop.f32.mrf.mxu1 }
 0x434   : > { %v5190_v29 = vpack.c.bf16 %v4067_v60, %v4066_v24  ;;  %v4001_v8 = vpop.f32.mrf.mxu3  ;;  %v3838_v15 = vadd.f32 %v3837_v20, %v3789_v4 }
 0x435   : > { %v4002_v26 = vadd.f32 %v6955_v5, %v4001_v8 }
 0x436   : > { %5202 = vst [vmem:[%s6974_s1 + $0x30] sm:$0xff] %v5190_v29   ;;  %v3887_v50 = vadd.f32 %v3886_v13, %v3838_v15 }
 0x437   : > { %v4020_v19 = vadd.f32 %v4002_v26, %v3885_v11 }
 0x439   : > { %v4052_v57 = vmul.f32 0.01, %v4020_v19  ;;  %vm4036_vm14 = vcmp.gt.f32.partialorder %v4020_v19, 0.0 }
 0x43b   : > { %v4068_v14 = vsel %vm4036_vm14, %v4020_v19, %v4052_v57 }
 0x43c   : > { %v4003_v35 = vpop.f32.mrf.mxu3 }
 0x43d   : > { %v4004_v56 = vadd.f32 %v6955_v5, %v4003_v35 }
 0x43f   : > { %v4021_v39 = vadd.f32 %v4004_v56, %v3887_v50 }
 0x441   : > { %vm4037_vm15 = vcmp.gt.f32.partialorder %v4021_v39, 0.0  ;;  %v4053_v21 = vmul.f32 0.01, %v4021_v39 }
 0x443   : > { %v4069_v44 = vsel %vm4037_vm15, %v4021_v39, %v4053_v21 }
 0x444   : > { %v5195_v31 = vpack.c.bf16 %v4069_v44, %v4068_v14 }
 0x446   : > { %5203 = vst [vmem:[%s6974_s1 + $0x38] sm:$0xff] %v5195_v31  }
 0x447   : > { %5525 = shalt.err (!%p5522_p5)
}
 0x448   : > { %s5636_s22 = smov 64   ;;  %s5637_s12 = smov 4  }
 0x449   : > { %5245 = dma.vmem_to_hbm [thread:$0]  (%p5748_p6), %s4119_s9, 1024, %s4121_s11, %s4103_s14, %s5636_s22, %s5636_s22, %s5637_s12  }
 0x44a PF: > { %s7209_s1 = sld [smem:[#allocation20_spill]] }
 0x44b   : > { %s7210_s13 = sld [smem:[#allocation16_spill]] }
 0x450   : > { %p5272_p7 = scmp.ge.s32.totalorder %s7209_s1, 2 }
 0x451   : > { %s4135_s24 = sand.u32 1, %s7210_s13  }
 0x452   : > { %p5262_p8 = pnand %p5272_p7, %p5754_p10  ;;  %s4136_s6 = scalar_lea.sflag [#allocation5], %s4135_s24 }
 0x454   : > { %p5263_p9 = pneg %p5262_p8 }
 0x456   : > { %5583 = dma.done.wait (%p5263_p9), %s4136_s6, 1024  }
 0x457   : > { %5585 = vsyncadd (%p5263_p9), %s4136_s6, 4294966272  ;;  %s25_s11 = sadd.s32 1, %s7209_s1   ;;  %s7212_s24 = sld [smem:[#allocation17_spill]] }
 0x458   : > { %p22_p12 = scmp.ge.s32.totalorder %s25_s11, 6   ;;  %s7213_s30 = sld [smem:[#allocation19_spill]] }
 0x459   : > { %s7214_s4 = sld [smem:[#allocation23_spill]]  ;;  %s7215_s25 = smov %s5596_s26 }
 0x45a   : > { %s7216_s26 = smov %s5821_s16  ;;  %s7217_s27 = smov %s5604_s28 }
 0x45b   : > { %s7218_s28 = smov %s5608_s29  ;;  %s7219_s29 = smov %s5824_s7 }
 0x45c   : > { %s7220_s8 = smov %s5624_s10  ;;  %s7221_s9 = smov %s7224_s17 }
 0x45d   :  { %24 = sbr.rel (!%p22_p12) target bundleno = 18 (0x12), region = 105 }
 0x45f   : > { %s7222_s10 = smov %s7214_s4 }
 0x462   :  { %4142 = vsyncpa [#allocation4], 1 }
 0x463   :  { %4144 = vsyncpa [#allocation4 + $0x1], 1 }
 0x464   :  { %4145 = vsyncpa [#allocation7], 1 }
 0x465   :  { %4146 = vsyncpa [#allocation10], 1 }
 0x466   :  { %4147 = vsyncpa [#allocation5], 1 }
 0x467   :  { %4149 = vsyncpa [#allocation5 + $0x1], 1 }

</bundles_post_ra>
